<compile_context>
chip_gen: v6e
topology: v6e:2x2x1
jax: 0.10.0
libtpu: 0.0.40
codegen_flags: <defaults>
</compile_context>

<pallas_src>
import functools

import jax
import jax.numpy as jnp
from jax.experimental import pallas as pl
from jax.experimental.pallas import tpu as pltpu

N_ZCPROXIES = 12
HW_EMB_DIM = 20
NUM_DEVICES = 2 * 10          # 2 * len(train_device_list.split(','))
FEAT_LAYERSIZE = 256
FEAT_DEPTH = 5


def _fused_mlp_kernel(x_ref, idx_ref, emb_ref,
                      w0zc_ref, w0emb_ref, wh_ref, w4_ref,
                      bh_ref, b4_ref, out_ref):
    """One batch tile: embedding lookup + concat-MLP + sigmoid, all in VMEM."""
    bb = x_ref.shape[0]
    n_dev = emb_ref.shape[0]

    # --- embedding lookup as a one-hot matmul (exact: f32 table, 0/1 weights) ---
    ids = idx_ref[...]                                              # (bb, 1) int32
    dev_iota = jax.lax.broadcasted_iota(jnp.int32, (bb, n_dev), 1)  # (bb, n_dev)
    onehot = (dev_iota == ids).astype(jnp.float32)
    emb = jnp.dot(onehot, emb_ref[...],
                  preferred_element_type=jnp.float32)               # (bb, hw_emb_dim)

    # --- layer 0: concat([zcprox, emb]) @ W0 + b0, as two bf16 matmuls ---
    h = (jnp.dot(x_ref[...].astype(jnp.bfloat16), w0zc_ref[...],
                 preferred_element_type=jnp.float32)
         + jnp.dot(emb.astype(jnp.bfloat16), w0emb_ref[...],
                   preferred_element_type=jnp.float32)
         + bh_ref[0])                                               # (bb, 256) f32
    h = jnp.maximum(h, 0.0)

    # --- hidden layers 1..3 (bf16 weights, f32 accumulate / bias / ReLU) ---
    for j in range(wh_ref.shape[0]):                                # static unroll (3)
        h = jnp.dot(h.astype(jnp.bfloat16), wh_ref[j],
                    preferred_element_type=jnp.float32) + bh_ref[j + 1]
        h = jnp.maximum(h, 0.0)

    # --- output layer (256 -> 1) + sigmoid, stored lane-dense as a (1, bb) row ---
    logits = jnp.dot(h.astype(jnp.bfloat16), w4_ref[...],
                     preferred_element_type=jnp.float32) + b4_ref[...]   # (bb, 1)
    out_ref[...] = jax.nn.sigmoid(logits).T                              # (1, bb)


def init_params(key, n_zcproxies=N_ZCPROXIES, hw_emb_dim=HW_EMB_DIM,
                num_devices=NUM_DEVICES, feat_layersize=FEAT_LAYERSIZE,
                feat_depth=FEAT_DEPTH):
    """Matches the PyTorch module's init:
       Embedding ~ N(0,1); W ~ N(0, sqrt(2/(m+n))) (stored transposed, (n,m));
       b ~ N(0, sqrt(1/m))."""
    key, k_emb = jax.random.split(key)
    emb_table = jax.random.normal(k_emb, (num_devices, hw_emb_dim), dtype=jnp.float32)
    layers = []
    for i in range(feat_depth):
        n = (n_zcproxies + hw_emb_dim) if i == 0 else feat_layersize
        m = 1 if i == feat_depth - 1 else feat_layersize
        key, kw, kb = jax.random.split(key, 3)
        w_std = jnp.sqrt(2.0 / (m + n))
        b_std = jnp.sqrt(1.0 / m)
        W_T = jax.random.normal(kw, (n, m), dtype=jnp.float32) * w_std
        b = jax.random.normal(kb, (m,), dtype=jnp.float32) * b_std
        layers.append((W_T, b))
    return emb_table, layers


def pack_params(emb_table, layers, n_zcproxies=N_ZCPROXIES):
    """One-time packing into kernel-ready arrays (bf16 weights, f32 biases)."""
    (w0, b0), (w1, b1), (w2, b2), (w3, b3), (w4, b4) = layers
    return dict(
        emb_table=emb_table.astype(jnp.float32),                          # (20, 20)
        w0_zc=w0[:n_zcproxies, :].astype(jnp.bfloat16),                   # (12, 256)
        w0_emb=w0[n_zcproxies:, :].astype(jnp.bfloat16),                  # (20, 256)
        w_hidden=jnp.stack([w1, w2, w3]).astype(jnp.bfloat16),            # (3, 256, 256)
        w_out=w4.astype(jnp.bfloat16),                                    # (256, 1)
        b_hidden=jnp.stack([b0, b1, b2, b3])[:, None, :].astype(jnp.float32),  # (4, 1, 256)
        b_out=b4.reshape(1, 1).astype(jnp.float32),                       # (1, 1)
    )


@functools.partial(jax.jit, static_argnames=("block_batch",))
def cross_domain_multinet_forward(zcprox, device_input, packed, *, block_batch=512):
    """zcprox: (B, 12) float; device_input: (B,) or (B, 1) int; packed: pack_params()."""
    # block_batch = 512 is a multiple of 256 (v6e/v7x MXU) and 128 (v5e MXU);
    # the lane-dense output tile also requires a multiple of 128.
    assert block_batch % 128 == 0, "block_batch must be a multiple of 128"

    zcprox = zcprox.astype(jnp.float32)
    B, n_in = zcprox.shape
    device_input = device_input.reshape(B, 1).astype(jnp.int32)

    B_pad = ((B + block_batch - 1) // block_batch) * block_batch
    if B_pad != B:
        zcprox = jnp.pad(zcprox, ((0, B_pad - B), (0, 0)))
        device_input = jnp.pad(device_input, ((0, B_pad - B), (0, 0)))

    grid = (B_pad // block_batch,)

    in_specs = [
        # per-tile inputs (batch-tiled)
        pl.BlockSpec((block_batch, n_in), lambda i: (i, 0)),              # zcprox
        pl.BlockSpec((block_batch, 1), lambda i: (i, 0)),                 # device idx
        # constant operands: full arrays, constant index_map -> fetched once,
        # stay VMEM-resident across the whole batch grid.
        pl.BlockSpec(packed["emb_table"].shape, lambda i: (0, 0)),
        pl.BlockSpec(packed["w0_zc"].shape, lambda i: (0, 0)),
        pl.BlockSpec(packed["w0_emb"].shape, lambda i: (0, 0)),
        pl.BlockSpec(packed["w_hidden"].shape, lambda i: (0, 0, 0)),
        pl.BlockSpec(packed["w_out"].shape, lambda i: (0, 0)),
        pl.BlockSpec(packed["b_hidden"].shape, lambda i: (0, 0, 0)),
        pl.BlockSpec(packed["b_out"].shape, lambda i: (0, 0)),
    ]

    out = pl.pallas_call(
        _fused_mlp_kernel,
        out_shape=jax.ShapeDtypeStruct((1, B_pad), jnp.float32),
        grid_spec=pltpu.PrefetchScalarGridSpec(
            num_scalar_prefetch=0,
            grid=grid,
            in_specs=in_specs,
            # lane-dense output slab: each grid step writes a (1, block_batch) row chunk
            out_specs=pl.BlockSpec((1, block_batch), lambda i: (0, i)),
        ),
        compiler_params=pltpu.CompilerParams(
            dimension_semantics=("parallel",)),   # batch axis: megacore / 2 TCs on v7x
    )(zcprox, device_input,
      packed["emb_table"], packed["w0_zc"], packed["w0_emb"],
      packed["w_hidden"], packed["w_out"],
      packed["b_hidden"], packed["b_out"])

    return out.reshape(B_pad, 1)[:B]


def reference_forward(zcprox, device_input, emb_table, layers):
    """Pure-JAX f32 reference of the module's forward (for correctness check)."""
    emb = jnp.take(emb_table, device_input.reshape(-1).astype(jnp.int32), axis=0)
    h = jnp.concatenate([zcprox.astype(jnp.float32), emb], axis=1)
    for i, (w, b) in enumerate(layers):
        h = h @ w + b
        if i != len(layers) - 1:
            h = jnp.maximum(h, 0.0)
    return jax.nn.sigmoid(h)


if __name__ == "__main__":
    key = jax.random.PRNGKey(0)
    k_params, k_x, k_d = jax.random.split(key, 3)

    emb_table, layers = init_params(k_params)
    packed = pack_params(emb_table, layers)

    batch = 16  # small demo batch; padded to one 512-row tile inside the wrapper
    zcprox = jax.random.normal(k_x, (batch, N_ZCPROXIES), dtype=jnp.float32)
    device_input = jax.random.randint(k_d, (batch, 1), 0, NUM_DEVICES, dtype=jnp.int32)

    out = cross_domain_multinet_forward(zcprox, device_input, packed)
    out = jax.block_until_ready(out)

    ref = reference_forward(zcprox, device_input, emb_table, layers)
    assert out.shape == (batch, 1), out.shape
    # bf16 weights with f32 accumulation vs f32 reference -> loose tolerance.
    assert jnp.allclose(out, ref, atol=2e-2, rtol=2e-2), \
        float(jnp.max(jnp.abs(out - ref)))

    print("KERNEL_OK")
</pallas_src>

<mosaic_0001>
module attributes {stable_mosaic.version = 11 : i64} {
  func.func @_fused_mlp_kernel(%arg0: i32, %arg1: memref<512x12xf32, #tpu.memory_space<vmem>>, %arg2: memref<512x1xi32, #tpu.memory_space<vmem>>, %arg3: memref<20x20xf32, #tpu.memory_space<vmem>>, %arg4: memref<12x256xbf16, #tpu.memory_space<vmem>>, %arg5: memref<20x256xbf16, #tpu.memory_space<vmem>>, %arg6: memref<3x256x256xbf16, #tpu.memory_space<vmem>>, %arg7: memref<256x1xbf16, #tpu.memory_space<vmem>>, %arg8: memref<4x1x256xf32, #tpu.memory_space<vmem>>, %arg9: memref<1x1xf32, #tpu.memory_space<vmem>>, %arg10: memref<1x512xf32, #tpu.memory_space<vmem>>) attributes {dimension_semantics = [#tpu.dimension_semantics<parallel>], iteration_bounds = array<i64: 1>, scalar_prefetch = 0 : i64, scratch_operands = 0 : i64, tpu.core_type = #tpu.core_type<tc>, window_params = [{transform_indices = @transform_0, window_bounds = array<i64: 512, 12>}, {transform_indices = @transform_1, window_bounds = array<i64: 512, 1>}, {pipeline_mode = #tpu.pipeline_mode<synchronous>, transform_indices = @transform_2, window_bounds = array<i64: 20, 20>}, {pipeline_mode = #tpu.pipeline_mode<synchronous>, transform_indices = @transform_3, window_bounds = array<i64: 12, 256>}, {pipeline_mode = #tpu.pipeline_mode<synchronous>, transform_indices = @transform_4, window_bounds = array<i64: 20, 256>}, {pipeline_mode = #tpu.pipeline_mode<synchronous>, transform_indices = @transform_5, window_bounds = array<i64: 3, 256, 256>}, {pipeline_mode = #tpu.pipeline_mode<synchronous>, transform_indices = @transform_6, window_bounds = array<i64: 256, 1>}, {pipeline_mode = #tpu.pipeline_mode<synchronous>, transform_indices = @transform_7, window_bounds = array<i64: 4, 1, 256>}, {pipeline_mode = #tpu.pipeline_mode<synchronous>, transform_indices = @transform_8, window_bounds = array<i64: 1, 1>}, {transform_indices = @transform_9, window_bounds = array<i64: 1, 512>}]} {
    %c0 = arith.constant 0 : index
    %c0_0 = arith.constant 0 : index
    %0 = vector.load %arg2[%c0, %c0_0] : memref<512x1xi32, #tpu.memory_space<vmem>>, vector<512x1xi32>
    %1 = tpu.iota {dimensions = array<i32: 1>} : vector<512x20xi32>
    %2 = vector.broadcast %0 : vector<512x1xi32> to vector<512x20xi32>
    %3 = arith.cmpi eq, %1, %2 : vector<512x20xi32>
    %4 = arith.extui %3 : vector<512x20xi1> to vector<512x20xi32>
    %5 = arith.sitofp %4 : vector<512x20xi32> to vector<512x20xf32>
    %c0_1 = arith.constant 0 : index
    %c0_2 = arith.constant 0 : index
    %6 = vector.load %arg3[%c0_1, %c0_2] : memref<20x20xf32, #tpu.memory_space<vmem>>, vector<20x20xf32>
    %cst = arith.constant dense<0.000000e+00> : vector<512x20xf32>
    %7 = tpu.matmul %5, %6, %cst {dimension_numbers = #tpu.dot_dimension_numbers<[1], [0], [0], [1], [0, 0, 1, 1], [], []>} : vector<512x20xf32>, vector<20x20xf32>, vector<512x20xf32> -> vector<512x20xf32>
    %c0_3 = arith.constant 0 : index
    %c0_4 = arith.constant 0 : index
    %8 = vector.load %arg1[%c0_3, %c0_4] : memref<512x12xf32, #tpu.memory_space<vmem>>, vector<512x12xf32>
    %9 = arith.truncf %8 : vector<512x12xf32> to vector<512x12xbf16>
    %c0_5 = arith.constant 0 : index
    %c0_6 = arith.constant 0 : index
    %10 = vector.load %arg4[%c0_5, %c0_6] : memref<12x256xbf16, #tpu.memory_space<vmem>>, vector<12x256xbf16>
    %cst_7 = arith.constant dense<0.000000e+00> : vector<512x256xf32>
    %11 = tpu.matmul %9, %10, %cst_7 {dimension_numbers = #tpu.dot_dimension_numbers<[1], [0], [0], [1], [0, 0, 1, 1], [], []>} : vector<512x12xbf16>, vector<12x256xbf16>, vector<512x256xf32> -> vector<512x256xf32>
    %12 = arith.truncf %7 : vector<512x20xf32> to vector<512x20xbf16>
    %c0_8 = arith.constant 0 : index
    %c0_9 = arith.constant 0 : index
    %13 = vector.load %arg5[%c0_8, %c0_9] : memref<20x256xbf16, #tpu.memory_space<vmem>>, vector<20x256xbf16>
    %cst_10 = arith.constant dense<0.000000e+00> : vector<512x256xf32>
    %14 = tpu.matmul %12, %13, %cst_10 {dimension_numbers = #tpu.dot_dimension_numbers<[1], [0], [0], [1], [0, 0, 1, 1], [], []>} : vector<512x20xbf16>, vector<20x256xbf16>, vector<512x256xf32> -> vector<512x256xf32>
    %15 = arith.addf %11, %14 : vector<512x256xf32>
    %c0_11 = arith.constant 0 : index
    %c0_12 = arith.constant 0 : index
    %c0_13 = arith.constant 0 : index
    %16 = vector.load %arg8[%c0_11, %c0_12, %c0_13] : memref<4x1x256xf32, #tpu.memory_space<vmem>>, vector<1x1x256xf32>
    %17 = vector.shape_cast %16 : vector<1x1x256xf32> to vector<1x256xf32>
    %18 = vector.broadcast %17 : vector<1x256xf32> to vector<512x256xf32>
    %19 = arith.addf %15, %18 : vector<512x256xf32>
    %cst_14 = arith.constant 0.000000e+00 : f32
    %20 = vector.broadcast %cst_14 : f32 to vector<512x256xf32>
    %21 = arith.maximumf %19, %20 : vector<512x256xf32>
    %22 = arith.truncf %21 : vector<512x256xf32> to vector<512x256xbf16>
    %c0_15 = arith.constant 0 : index
    %c0_16 = arith.constant 0 : index
    %c0_17 = arith.constant 0 : index
    %23 = vector.load %arg6[%c0_15, %c0_16, %c0_17] : memref<3x256x256xbf16, #tpu.memory_space<vmem>>, vector<1x256x256xbf16>
    %24 = vector.shape_cast %23 : vector<1x256x256xbf16> to vector<256x256xbf16>
    %cst_18 = arith.constant dense<0.000000e+00> : vector<512x256xf32>
    %25 = tpu.matmul %22, %24, %cst_18 {dimension_numbers = #tpu.dot_dimension_numbers<[1], [0], [0], [1], [0, 0, 1, 1], [], []>} : vector<512x256xbf16>, vector<256x256xbf16>, vector<512x256xf32> -> vector<512x256xf32>
    %c1 = arith.constant 1 : index
    %c0_19 = arith.constant 0 : index
    %c0_20 = arith.constant 0 : index
    %26 = vector.load %arg8[%c1, %c0_19, %c0_20] : memref<4x1x256xf32, #tpu.memory_space<vmem>>, vector<1x1x256xf32>
    %27 = vector.shape_cast %26 : vector<1x1x256xf32> to vector<1x256xf32>
    %28 = vector.broadcast %27 : vector<1x256xf32> to vector<512x256xf32>
    %29 = arith.addf %25, %28 : vector<512x256xf32>
    %cst_21 = arith.constant 0.000000e+00 : f32
    %30 = vector.broadcast %cst_21 : f32 to vector<512x256xf32>
    %31 = arith.maximumf %29, %30 : vector<512x256xf32>
    %32 = arith.truncf %31 : vector<512x256xf32> to vector<512x256xbf16>
    %c1_22 = arith.constant 1 : index
    %c0_23 = arith.constant 0 : index
    %c0_24 = arith.constant 0 : index
    %33 = vector.load %arg6[%c1_22, %c0_23, %c0_24] : memref<3x256x256xbf16, #tpu.memory_space<vmem>>, vector<1x256x256xbf16>
    %34 = vector.shape_cast %33 : vector<1x256x256xbf16> to vector<256x256xbf16>
    %cst_25 = arith.constant dense<0.000000e+00> : vector<512x256xf32>
    %35 = tpu.matmul %32, %34, %cst_25 {dimension_numbers = #tpu.dot_dimension_numbers<[1], [0], [0], [1], [0, 0, 1, 1], [], []>} : vector<512x256xbf16>, vector<256x256xbf16>, vector<512x256xf32> -> vector<512x256xf32>
    %c2 = arith.constant 2 : index
    %c0_26 = arith.constant 0 : index
    %c0_27 = arith.constant 0 : index
    %36 = vector.load %arg8[%c2, %c0_26, %c0_27] : memref<4x1x256xf32, #tpu.memory_space<vmem>>, vector<1x1x256xf32>
    %37 = vector.shape_cast %36 : vector<1x1x256xf32> to vector<1x256xf32>
    %38 = vector.broadcast %37 : vector<1x256xf32> to vector<512x256xf32>
    %39 = arith.addf %35, %38 : vector<512x256xf32>
    %cst_28 = arith.constant 0.000000e+00 : f32
    %40 = vector.broadcast %cst_28 : f32 to vector<512x256xf32>
    %41 = arith.maximumf %39, %40 : vector<512x256xf32>
    %42 = arith.truncf %41 : vector<512x256xf32> to vector<512x256xbf16>
    %c2_29 = arith.constant 2 : index
    %c0_30 = arith.constant 0 : index
    %c0_31 = arith.constant 0 : index
    %43 = vector.load %arg6[%c2_29, %c0_30, %c0_31] : memref<3x256x256xbf16, #tpu.memory_space<vmem>>, vector<1x256x256xbf16>
    %44 = vector.shape_cast %43 : vector<1x256x256xbf16> to vector<256x256xbf16>
    %cst_32 = arith.constant dense<0.000000e+00> : vector<512x256xf32>
    %45 = tpu.matmul %42, %44, %cst_32 {dimension_numbers = #tpu.dot_dimension_numbers<[1], [0], [0], [1], [0, 0, 1, 1], [], []>} : vector<512x256xbf16>, vector<256x256xbf16>, vector<512x256xf32> -> vector<512x256xf32>
    %c3 = arith.constant 3 : index
    %c0_33 = arith.constant 0 : index
    %c0_34 = arith.constant 0 : index
    %46 = vector.load %arg8[%c3, %c0_33, %c0_34] : memref<4x1x256xf32, #tpu.memory_space<vmem>>, vector<1x1x256xf32>
    %47 = vector.shape_cast %46 : vector<1x1x256xf32> to vector<1x256xf32>
    %48 = vector.broadcast %47 : vector<1x256xf32> to vector<512x256xf32>
    %49 = arith.addf %45, %48 : vector<512x256xf32>
    %cst_35 = arith.constant 0.000000e+00 : f32
    %50 = vector.broadcast %cst_35 : f32 to vector<512x256xf32>
    %51 = arith.maximumf %49, %50 : vector<512x256xf32>
    %52 = arith.truncf %51 : vector<512x256xf32> to vector<512x256xbf16>
    %c0_36 = arith.constant 0 : index
    %c0_37 = arith.constant 0 : index
    %53 = vector.load %arg7[%c0_36, %c0_37] : memref<256x1xbf16, #tpu.memory_space<vmem>>, vector<256x1xbf16>
    %cst_38 = arith.constant dense<0.000000e+00> : vector<512x1xf32>
    %54 = tpu.matmul %52, %53, %cst_38 {dimension_numbers = #tpu.dot_dimension_numbers<[1], [0], [0], [1], [0, 0, 1, 1], [], []>} : vector<512x256xbf16>, vector<256x1xbf16>, vector<512x1xf32> -> vector<512x1xf32>
    %c0_39 = arith.constant 0 : index
    %c0_40 = arith.constant 0 : index
    %55 = vector.load %arg9[%c0_39, %c0_40] : memref<1x1xf32, #tpu.memory_space<vmem>>, vector<1x1xf32>
    %56 = vector.broadcast %55 : vector<1x1xf32> to vector<512x1xf32>
    %57 = arith.addf %54, %56 : vector<512x1xf32>
    %58 = arith.negf %57 : vector<512x1xf32>
    %59 = math.exp %58 : vector<512x1xf32>
    %cst_41 = arith.constant 1.000000e+00 : f32
    %60 = vector.broadcast %cst_41 : f32 to vector<512x1xf32>
    %61 = arith.addf %60, %59 : vector<512x1xf32>
    %62 = arith.divf %60, %61 : vector<512x1xf32>
    %63 = tpu.transpose %62, [1, 0] : vector<512x1xf32> -> vector<1x512xf32>
    %c0_42 = arith.constant 0 : index
    %c0_43 = arith.constant 0 : index
    %64 = vector.load %arg10[%c0_42, %c0_43] : memref<1x512xf32, #tpu.memory_space<vmem>>, vector<1x512xf32>
    tpu.vector_store %arg10[%c0_42, %c0_43], %63 {strides = array<i32>} : memref<1x512xf32, #tpu.memory_space<vmem>>, vector<1x512xf32>,
    return
  }
  func.func @transform_0(%arg0: i32) -> (i32, i32) {
    %c0_i32 = arith.constant 0 : i32
    %c0_i32_0 = arith.constant 0 : i32
    return %arg0, %c0_i32 : i32, i32
  }
  func.func @transform_1(%arg0: i32) -> (i32, i32) {
    %c0_i32 = arith.constant 0 : i32
    %c0_i32_0 = arith.constant 0 : i32
    return %arg0, %c0_i32 : i32, i32
  }
  func.func @transform_2(%arg0: i32) -> (i32, i32) {
    %c0_i32 = arith.constant 0 : i32
    %c0_i32_0 = arith.constant 0 : i32
    %c0_i32_1 = arith.constant 0 : i32
    return %c0_i32, %c0_i32_0 : i32, i32
  }
  func.func @transform_3(%arg0: i32) -> (i32, i32) {
    %c0_i32 = arith.constant 0 : i32
    %c0_i32_0 = arith.constant 0 : i32
    %c0_i32_1 = arith.constant 0 : i32
    return %c0_i32, %c0_i32_0 : i32, i32
  }
  func.func @transform_4(%arg0: i32) -> (i32, i32) {
    %c0_i32 = arith.constant 0 : i32
    %c0_i32_0 = arith.constant 0 : i32
    %c0_i32_1 = arith.constant 0 : i32
    return %c0_i32, %c0_i32_0 : i32, i32
  }
  func.func @transform_5(%arg0: i32) -> (i32, i32, i32) {
    %c0_i32 = arith.constant 0 : i32
    %c0_i32_0 = arith.constant 0 : i32
    %c0_i32_1 = arith.constant 0 : i32
    %c0_i32_2 = arith.constant 0 : i32
    return %c0_i32, %c0_i32_0, %c0_i32_1 : i32, i32, i32
  }
  func.func @transform_6(%arg0: i32) -> (i32, i32) {
    %c0_i32 = arith.constant 0 : i32
    %c0_i32_0 = arith.constant 0 : i32
    %c0_i32_1 = arith.constant 0 : i32
    return %c0_i32, %c0_i32_0 : i32, i32
  }
  func.func @transform_7(%arg0: i32) -> (i32, i32, i32) {
    %c0_i32 = arith.constant 0 : i32
    %c0_i32_0 = arith.constant 0 : i32
    %c0_i32_1 = arith.constant 0 : i32
    %c0_i32_2 = arith.constant 0 : i32
    return %c0_i32, %c0_i32_0, %c0_i32_1 : i32, i32, i32
  }
  func.func @transform_8(%arg0: i32) -> (i32, i32) {
    %c0_i32 = arith.constant 0 : i32
    %c0_i32_0 = arith.constant 0 : i32
    %c0_i32_1 = arith.constant 0 : i32
    return %c0_i32, %c0_i32_0 : i32, i32
  }
  func.func @transform_9(%arg0: i32) -> (i32, i32) {
    %c0_i32 = arith.constant 0 : i32
    %c0_i32_0 = arith.constant 0 : i32
    return %c0_i32, %arg0 : i32, i32
  }
}

</mosaic_0001>

<bundles_post_ra>
// kernel: cross_domain_multinet_forward.1
= control target key start
LH: loop header
LB: loop body
LE: loop exit
PB: predicated region body
PF: predicated region fallthrough
CT: control target
= control target key end

     0   :  { %v9441_v0 = vmov 0   ;;  %vm681_vm0 = vcmask 1043456   ;;  %vm488_vm1 = vcmask 162816   ;;  %vm1314_vm3 = vcmask 1041408   ;;  %s9429_s1 = inlined_call_operand.vmem [shape: s32[512,1], index: 1, kind: input, shape index: {}]   ;;  %s9430_s2 = inlined_call_operand.vmem [shape: f32[20,20], index: 2, kind: input, shape index: {}]   ;;  %s9431_s4 = inlined_call_operand.vmem [shape: bf16[20,256], index: 4, kind: input, shape index: {}]   ;;  %s9432_s3 = inlined_call_operand.vmem [shape: bf16[12,256], index: 3, kind: input, shape index: {}]   ;;  %s9433_s0 = inlined_call_operand.vmem [shape: f32[512,12], index: 0, kind: input, shape index: {}]   ;;  %s9434_s5 = inlined_call_operand.vmem [shape: bf16[3,256,256], index: 5, kind: input, shape index: {}]   ;;  %s9435_s7 = inlined_call_operand.vmem [shape: f32[4,1,256], index: 7, kind: input, shape index: {}]   ;;  %s9436_s6 = inlined_call_operand.vmem [shape: bf16[256,1], index: 6, kind: input, shape index: {}]   ;;  %s9437_s8 = inlined_call_operand.<no memory space> [shape: f32[1,1], index: 8, kind: input, shape index: {}]   ;;  %s9438_s9 = inlined_call_operand.vmem [shape: f32[1,512], index: 9, kind: output, shape index: {}]  }
   0x1   :  { %6321 = vset.pattern.permute.xlu1 %v9441_v0  ;;  %6320 = vset.pattern.permute.xlu0 %v9441_v0  ;;  %v37_v1 = vld [vmem:[%s9429_s1 + $0x10] sm:$0xff]  ;;  %v35_v2 = vld [vmem:[%s9429_s1] sm:$0xff]  ;;  %v38_v3 = vld [vmem:[%s9429_s1 + $0x18] sm:$0xff]  ;;  %vm1779_vm4 = vcmask 1045504  }
   0x2   :  { %108 = vperm.xlu1 %6321, %v37_v1   ;;  %102 = vperm.xlu0 %6320, %v35_v2   ;;  %v36_v4 = vld [vmem:[%s9429_s1 + $0x8] sm:$0xff]  ;;  %v39_v6 = vld [vmem:[%s9429_s1 + $0x20] sm:$0xff]  ;;  %v42_v7 = vld [vmem:[%s9429_s1 + $0x38] sm:$0xff]  ;;  %v9439_v1 = vlaneseq }
   0x3   :  { %v40_v5 = vld [vmem:[%s9429_s1 + $0x28] sm:$0xff]  ;;  %v41_v8 = vld [vmem:[%s9429_s1 + $0x30] sm:$0xff]  ;;  %v43_v10 = vld [vmem:[%s9429_s1 + $0x40] sm:$0xff] }
   0x4   :  { %v44_v9 = vld [vmem:[%s9429_s1 + $0x48] sm:$0xff]  ;;  %v46_v11 = vld [vmem:[%s9429_s1 + $0x58] sm:$0xff]  ;;  %v45_v12 = vld [vmem:[%s9429_s1 + $0x50] sm:$0xff] }
   0x5   :  { %v487_v13 = vld [vmem:[%s9430_s2 + $0x10] sm:$0xf]  ;;  %v486_v14 = vld [vmem:[%s9430_s2 + $0x8] sm:$0xff]  ;;  %v47_v16 = vld [vmem:[%s9429_s1 + $0x60] sm:$0xff] }
   0x6   :  { %111 = vperm.xlu1 %6321, %v38_v3   ;;  %105 = vperm.xlu0 %6320, %v36_v4   ;;  %v48_v15 = vld [vmem:[%s9429_s1 + $0x68] sm:$0xff]  ;;  %v485_v17 = vld [vmem:[%s9430_s2] sm:$0xff]  ;;  %v50_v18 = vld [vmem:[%s9429_s1 + $0x78] sm:$0xff]  ;;  %v6998_v4 = vand.u32 127, %v9439_v1 }
   0x7   :  { %6209 = vmatprep.subr.msk.mxu0 %vm681_vm0, %v487_v13  ;;  %6311 = vmatprep.subr.msk.mxu1 %vm681_vm0, %v487_v13  ;;  %v49_v19 = vld [vmem:[%s9429_s1 + $0x70] sm:$0xff]  ;;  %v52_v20 = vld [vmem:[%s9429_s1 + $0x88] sm:$0xff]  ;;  %v51_v21 = vld [vmem:[%s9429_s1 + $0x80] sm:$0xff] }
   0x8   :  { %6210 = vmatpush3.msk.msra.mxu0 %vm681_vm0, %v487_v13  ;;  %6314 = vmatpush3.msk.msra.mxu1 %vm681_vm0, %v487_v13  ;;  %v54_v22 = vld [vmem:[%s9429_s1 + $0x98] sm:$0xff]  ;;  %v53_v23 = vld [vmem:[%s9429_s1 + $0x90] sm:$0xff]  ;;  %v56_v24 = vld [vmem:[%s9429_s1 + $0xa8] sm:$0xff] }
   0x9   :  { %6211 = vmatprep.subr.mxu0 %v486_v14  ;;  %6312 = vmatprep.subr.mxu1 %v486_v14  ;;  %v55_v25 = vld [vmem:[%s9429_s1 + $0xa0] sm:$0xff]  ;;  %v58_v26 = vld [vmem:[%s9429_s1 + $0xb8] sm:$0xff]  ;;  %v57_v27 = vld [vmem:[%s9429_s1 + $0xb0] sm:$0xff] }
   0xa   :  { %117 = vperm.xlu1 %6321, %v40_v5   ;;  %114 = vperm.xlu0 %6320, %v39_v6   ;;  %v60_v28 = vld [vmem:[%s9429_s1 + $0xc8] sm:$0xff]  ;;  %v59_v29 = vld [vmem:[%s9429_s1 + $0xc0] sm:$0xff]  ;;  %v62_v30 = vld [vmem:[%s9429_s1 + $0xd8] sm:$0xff] }
   0xb   :  { %6212 = vmatpush3.msra.mxu0 %v486_v14  ;;  %6315 = vmatpush3.msra.mxu1 %v486_v14  ;;  %v61_v31 = vld [vmem:[%s9429_s1 + $0xd0] sm:$0xff]  ;;  %v64_v32 = vld [vmem:[%s9429_s1 + $0xe8] sm:$0xff]  ;;  %v63_v33 = vld [vmem:[%s9429_s1 + $0xe0] sm:$0xff] }
   0xc   :  { %6213 = vmatprep.subr.mxu0 %v485_v17  ;;  %6313 = vmatprep.subr.mxu1 %v485_v17  ;;  %v66_v34 = vld [vmem:[%s9429_s1 + $0xf8] sm:$0xff]  ;;  %v65_v35 = vld [vmem:[%s9429_s1 + $0xf0] sm:$0xff]  ;;  %v68_v36 = vld [vmem:[%s9429_s1 + $0x108] sm:$0xff] }
   0xd   :  { %6214 = vmatpush3.msra.mxu0 %v485_v17  ;;  %6316 = vmatpush3.msra.mxu1 %v485_v17  ;;  %v67_v37 = vld [vmem:[%s9429_s1 + $0x100] sm:$0xff]  ;;  %v70_v38 = vld [vmem:[%s9429_s1 + $0x118] sm:$0xff]  ;;  %v69_v39 = vld [vmem:[%s9429_s1 + $0x110] sm:$0xff] }
   0xe   :  { %123 = vperm.xlu1 %6321, %v42_v7   ;;  %120 = vperm.xlu0 %6320, %v41_v8   ;;  %v72_v40 = vld [vmem:[%s9429_s1 + $0x128] sm:$0xff]  ;;  %v71_v41 = vld [vmem:[%s9429_s1 + $0x120] sm:$0xff]  ;;  %v74_v42 = vld [vmem:[%s9429_s1 + $0x138] sm:$0xff] }
   0xf   :  { %v73_v43 = vld [vmem:[%s9429_s1 + $0x130] sm:$0xff]  ;;  %v76_v44 = vld [vmem:[%s9429_s1 + $0x148] sm:$0xff]  ;;  %v75_v45 = vld [vmem:[%s9429_s1 + $0x140] sm:$0xff] }
  0x10   :  { %v78_v46 = vld [vmem:[%s9429_s1 + $0x158] sm:$0xff]  ;;  %v77_v47 = vld [vmem:[%s9429_s1 + $0x150] sm:$0xff]  ;;  %v80_v48 = vld [vmem:[%s9429_s1 + $0x168] sm:$0xff] }
  0x11   :  { %v79_v49 = vld [vmem:[%s9429_s1 + $0x160] sm:$0xff]  ;;  %v82_v50 = vld [vmem:[%s9429_s1 + $0x178] sm:$0xff]  ;;  %v81_v51 = vld [vmem:[%s9429_s1 + $0x170] sm:$0xff] }
  0x12   :  { %129 = vperm.xlu1 %6321, %v44_v9   ;;  %126 = vperm.xlu0 %6320, %v43_v10   ;;  %v84_v52 = vld [vmem:[%s9429_s1 + $0x188] sm:$0xff]  ;;  %v83_v53 = vld [vmem:[%s9429_s1 + $0x180] sm:$0xff]  ;;  %v86_v54 = vld [vmem:[%s9429_s1 + $0x198] sm:$0xff]  ;;  %v6748_v10 = vmov 0.0  }
  0x13   :  { %v85_v55 = vld [vmem:[%s9429_s1 + $0x190] sm:$0xff]  ;;  %v88_v56 = vld [vmem:[%s9429_s1 + $0x1a8] sm:$0xff]  ;;  %v87_v57 = vld [vmem:[%s9429_s1 + $0x1a0] sm:$0xff] }
  0x14   :  { %v90_v58 = vld [vmem:[%s9429_s1 + $0x1b8] sm:$0xff]  ;;  %v89_v59 = vld [vmem:[%s9429_s1 + $0x1b0] sm:$0xff]  ;;  %v92_v60 = vld [vmem:[%s9429_s1 + $0x1c8] sm:$0xff] }
  0x15   :  { %v91_v61 = vld [vmem:[%s9429_s1 + $0x1c0] sm:$0xff]  ;;  %v94_v62 = vld [vmem:[%s9429_s1 + $0x1d8] sm:$0xff]  ;;  %v93_v63 = vld [vmem:[%s9429_s1 + $0x1d0] sm:$0xff] }
  0x16   :  { %135 = vperm.xlu1 %6321, %v46_v11   ;;  %132 = vperm.xlu0 %6320, %v45_v12   ;;  %v96_v2 = vld [vmem:[%s9429_s1 + $0x1e8] sm:$0xff]  ;;  %v95_v3 = vld [vmem:[%s9429_s1 + $0x1e0] sm:$0xff]  ;;  %v98_v5 = vld [vmem:[%s9429_s1 + $0x1f8] sm:$0xff] }
  0x17   :  { %v97_v6 = vld [vmem:[%s9429_s1 + $0x1f0] sm:$0xff]  ;;  %v6327_v14 = vld [vmem:[%s9432_s3 + $0x4] ss:$8 sps:$4 sm:$0x3f]  }
  0x18   :  { %v1202_v9 = vld [vmem:[%s9431_s4 + $0x10] sm:$0x33]  ;;  %5865 = vmatprep.subr.msk.bf16.mxu0 %vm1779_vm4, %v6327_v14 }
  0x19   :  { %v5829_v12 = vcombine.high %v1202_v9, %v1202_v9  ;;  %v5828_v13 = vcombine.low %v1202_v9, %v1202_v9 }
  0x1a   :  { %141 = vperm.xlu1 %6321, %v48_v15   ;;  %138 = vperm.xlu0 %6320, %v47_v16  }
  0x1b   :  { %5830 = vmatprep.subr.msk.bf16.mxu1 %vm1314_vm3, %v5829_v12  ;;  %v7016_v17 = vsel %vm1314_vm3, %v5828_v13, 0 }
  0x1e   :  { %147 = vperm.xlu1 %6321, %v50_v18   ;;  %144 = vperm.xlu0 %6320, %v49_v19   ;;  %v6329_v18 = vld [vmem:[%s9432_s3] ss:$8 sps:$4 sm:$0x3f]  }
  0x22   :  { %153 = vperm.xlu1 %6321, %v52_v20   ;;  %150 = vperm.xlu0 %6320, %v51_v21   ;;  %v1781_v21 = vsel %vm1779_vm4, %v6329_v18, 0 }
  0x26   :  { %159 = vperm.xlu1 %6321, %v54_v22   ;;  %156 = vperm.xlu0 %6320, %v53_v23  }
  0x2a   :  { %165 = vperm.xlu1 %6321, %v56_v24   ;;  %162 = vperm.xlu0 %6320, %v55_v25  }
  0x2e   :  { %171 = vperm.xlu1 %6321, %v58_v26   ;;  %168 = vperm.xlu0 %6320, %v57_v27  }
  0x32   :  { %177 = vperm.xlu1 %6321, %v60_v28   ;;  %174 = vperm.xlu0 %6320, %v59_v29  }
  0x36   :  { %183 = vperm.xlu1 %6321, %v62_v30   ;;  %180 = vperm.xlu0 %6320, %v61_v31  }
  0x3a   :  { %189 = vperm.xlu1 %6321, %v64_v32   ;;  %186 = vperm.xlu0 %6320, %v63_v33  }
  0x3e   :  { %195 = vperm.xlu1 %6321, %v66_v34   ;;  %192 = vperm.xlu0 %6320, %v65_v35  }
  0x42   :  { %201 = vperm.xlu1 %6321, %v68_v36   ;;  %198 = vperm.xlu0 %6320, %v67_v37  }
  0x46   :  { %207 = vperm.xlu1 %6321, %v70_v38   ;;  %204 = vperm.xlu0 %6320, %v69_v39  }
  0x4a   :  { %213 = vperm.xlu1 %6321, %v72_v40   ;;  %210 = vperm.xlu0 %6320, %v71_v41  }
  0x4e   :  { %219 = vperm.xlu1 %6321, %v74_v42   ;;  %216 = vperm.xlu0 %6320, %v73_v43  }
  0x52   :  { %225 = vperm.xlu1 %6321, %v76_v44   ;;  %222 = vperm.xlu0 %6320, %v75_v45  }
  0x56   :  { %231 = vperm.xlu1 %6321, %v78_v46   ;;  %228 = vperm.xlu0 %6320, %v77_v47  }
  0x5a   :  { %237 = vperm.xlu1 %6321, %v80_v48   ;;  %234 = vperm.xlu0 %6320, %v79_v49  }
  0x5e   :  { %243 = vperm.xlu1 %6321, %v82_v50   ;;  %240 = vperm.xlu0 %6320, %v81_v51  }
  0x62   :  { %249 = vperm.xlu1 %6321, %v84_v52   ;;  %246 = vperm.xlu0 %6320, %v83_v53  }
  0x66   :  { %255 = vperm.xlu1 %6321, %v86_v54   ;;  %252 = vperm.xlu0 %6320, %v85_v55  }
  0x6a   :  { %261 = vperm.xlu1 %6321, %v88_v56   ;;  %258 = vperm.xlu0 %6320, %v87_v57  }
  0x6e   :  { %267 = vperm.xlu1 %6321, %v90_v58   ;;  %264 = vperm.xlu0 %6320, %v89_v59  }
  0x72   :  { %273 = vperm.xlu1 %6321, %v92_v60   ;;  %270 = vperm.xlu0 %6320, %v91_v61  }
  0x76   :  { %279 = vperm.xlu1 %6321, %v94_v62   ;;  %276 = vperm.xlu0 %6320, %v93_v63  }
  0x7a   :  { %285 = vperm.xlu1 %6321, %v96_v2   ;;  %282 = vperm.xlu0 %6320, %v95_v3  }
  0x7d   :  { %v109_v7 = vpop.permute.xlu1 %108  ;;  %v103_v8 = vpop.permute.xlu0 %102 }
  0x7e   :  { %vm293_vm2 = vcmp.eq.s32.totalorder %v6998_v4, %v103_v8  ;;  %291 = vperm.xlu1 %6321, %v98_v5   ;;  %288 = vperm.xlu0 %6320, %v97_v6   ;;  %vm295_vm5 = vcmp.eq.s32.totalorder %v6998_v4, %v109_v7 }
  0x7f   :  { %v5697_v11 = vsel %vm293_vm2, 1.0, %v6748_v10  ;;  %v5699_v19 = vsel %vm295_vm5, 1.0, %v6748_v10 }
  0x80   :  { %6215 = vmatprep.mubr.msk.f32.mxu0 %vm488_vm1, %v5697_v11 }
  0x81   :  { %v112_v15 = vpop.permute.xlu1 %111  ;;  %v106_v16 = vpop.permute.xlu0 %105 }
  0x82   :  { %vm296_vm6 = vcmp.eq.s32.totalorder %v6998_v4, %v112_v15  ;;  %vm294_vm7 = vcmp.eq.s32.totalorder %v6998_v4, %v106_v16 }
  0x83   :  { %v5698_v20 = vsel %vm294_vm7, 1.0, %v6748_v10  ;;  %v5700_v22 = vsel %vm296_vm6, 1.0, %v6748_v10 }
  0x84   :  { %6216 = vmatmul.mubr.msk.f32.vlgmr.msra.gmra.mxu0 %vm488_vm1, %v5698_v20 }
  0x85   :  { %v118_v23 = vpop.permute.xlu1 %117  ;;  %v115_v24 = vpop.permute.xlu0 %114  ;;  %6218 = vmatprep.mubr.msk.f32.mxu0 %vm488_vm1, %v5699_v19  ;;  %1801 = vmatpush1.bf16.msra.mxu0 %v1781_v21 }
  0x86   :  { %vm297_vm8 = vcmp.eq.s32.totalorder %v6998_v4, %v115_v24  ;;  %vm298_vm9 = vcmp.eq.s32.totalorder %v6998_v4, %v118_v23  ;;  %v6326_v24 = vld [vmem:[%s9431_s4 + $0x4] ss:$8 sps:$4 sm:$0xff]  }
  0x87   :  { %v5701_v25 = vsel %vm297_vm8, 1.0, %v6748_v10  ;;  %v5702_v28 = vsel %vm298_vm9, 1.0, %v6748_v10 }
  0x88   :  { %6219 = vmatmul.mubr.msk.f32.gmra.mxu0 %vm488_vm1, %v5700_v22 }
  0x89   :  { %v124_v26 = vpop.permute.xlu1 %123  ;;  %6221 = vmatprep.mubr.msk.f32.mxu0 %vm488_vm1, %v5701_v25  ;;  %v121_v27 = vpop.permute.xlu0 %120 }
  0x8a   :  { %vm299_vm10 = vcmp.eq.s32.totalorder %v6998_v4, %v121_v27  ;;  %vm300_vm11 = vcmp.eq.s32.totalorder %v6998_v4, %v124_v26  ;;  %v6324_v27 = vld [vmem:[%s9431_s4] ss:$8 sps:$4 sm:$0xff]  }
  0x8b   :  { %v5703_v29 = vsel %vm299_vm10, 1.0, %v6748_v10  ;;  %v5704_v32 = vsel %vm300_vm11, 1.0, %v6748_v10 }
  0x8c   :  { %6222 = vmatmul.mubr.msk.f32.gmra.mxu0 %vm488_vm1, %v5702_v28 }
  0x8d   :  { %v130_v30 = vpop.permute.xlu1 %129  ;;  %6224 = vmatprep.mubr.msk.f32.mxu0 %vm488_vm1, %v5703_v29  ;;  %v127_v31 = vpop.permute.xlu0 %126 }
  0x8e   :  { %vm301_vm12 = vcmp.eq.s32.totalorder %v6998_v4, %v127_v31  ;;  %vm302_vm13 = vcmp.eq.s32.totalorder %v6998_v4, %v130_v30 }
  0x8f   :  { %v5705_v33 = vsel %vm301_vm12, 1.0, %v6748_v10  ;;  %v5706_v36 = vsel %vm302_vm13, 1.0, %v6748_v10 }
  0x90   :  { %6225 = vmatmul.mubr.msk.f32.gmra.mxu0 %vm488_vm1, %v5704_v32  ;;  %v1071_v32 = vld [vmem:[%s9433_s0 + $0x8] sm:$0xff] }
  0x91   :  { %v136_v34 = vpop.permute.xlu1 %135  ;;  %6227 = vmatprep.mubr.msk.f32.mxu0 %vm488_vm1, %v5705_v33  ;;  %v133_v35 = vpop.permute.xlu0 %132 }
  0x92   :  { %vm303_vm14 = vcmp.eq.s32.totalorder %v6998_v4, %v133_v35  ;;  %vm304_vm15 = vcmp.eq.s32.totalorder %v6998_v4, %v136_v34 }
  0x93   :  { %v5707_v37 = vsel %vm303_vm14, 1.0, %v6748_v10  ;;  %v5708_v40 = vsel %vm304_vm15, 1.0, %v6748_v10 }
  0x94   :  { %6228 = vmatmul.mubr.msk.f32.gmra.mxu0 %vm488_vm1, %v5706_v36 }
  0x95   :  { %v142_v38 = vpop.permute.xlu1 %141  ;;  %6230 = vmatprep.mubr.msk.f32.mxu0 %vm488_vm1, %v5707_v37  ;;  %v139_v39 = vpop.permute.xlu0 %138 }
  0x96   :  { %vm305_vm0 = vcmp.eq.s32.totalorder %v6998_v4, %v139_v39  ;;  %vm306_vm2 = vcmp.eq.s32.totalorder %v6998_v4, %v142_v38  ;;  %v6332_v38 = vld [vmem:[%s9434_s5 + $0x74] ss:$8 sps:$4 sm:$0xff]  }
  0x97   :  { %v5709_v41 = vsel %vm305_vm0, 1.0, %v6748_v10  ;;  %v5710_v44 = vsel %vm306_vm2, 1.0, %v6748_v10 }
  0x98   :  { %6231 = vmatmul.mubr.msk.f32.gmra.mxu0 %vm488_vm1, %v5708_v40 }
  0x99   :  { %v148_v42 = vpop.permute.xlu1 %147  ;;  %6233 = vmatprep.mubr.msk.f32.mxu0 %vm488_vm1, %v5709_v41  ;;  %v145_v43 = vpop.permute.xlu0 %144 }
  0x9a   :  { %vm307_vm3 = vcmp.eq.s32.totalorder %v6998_v4, %v145_v43  ;;  %vm308_vm4 = vcmp.eq.s32.totalorder %v6998_v4, %v148_v42  ;;  %v1072_v43 = vld [vmem:[%s9433_s0 + $0x10] sm:$0xff] }
  0x9b   :  { %v5711_v45 = vsel %vm307_vm3, 1.0, %v6748_v10  ;;  %v5712_v48 = vsel %vm308_vm4, 1.0, %v6748_v10 }
  0x9c   :  { %6234 = vmatmul.mubr.msk.f32.gmra.mxu0 %vm488_vm1, %v5710_v44  ;;  %v1073_v44 = vld [vmem:[%s9433_s0 + $0x18] sm:$0xff] }
  0x9d   :  { %v154_v46 = vpop.permute.xlu1 %153  ;;  %6236 = vmatprep.mubr.msk.f32.mxu0 %vm488_vm1, %v5711_v45  ;;  %v151_v47 = vpop.permute.xlu0 %150 }
  0x9e   :  { %vm309_vm5 = vcmp.eq.s32.totalorder %v6998_v4, %v151_v47  ;;  %vm310_vm6 = vcmp.eq.s32.totalorder %v6998_v4, %v154_v46  ;;  %v1135_v47 = vpack.c.bf16 %v1073_v44, %v1072_v43 }
  0x9f   :  { %v5713_v49 = vsel %vm309_vm5, 1.0, %v6748_v10  ;;  %v5714_v52 = vsel %vm310_vm6, 1.0, %v6748_v10 }
  0xa0   :  { %6237 = vmatmul.mubr.msk.f32.gmra.mxu0 %vm488_vm1, %v5712_v48 }
  0xa1   :  { %v160_v50 = vpop.permute.xlu1 %159  ;;  %6239 = vmatprep.mubr.msk.f32.mxu0 %vm488_vm1, %v5713_v49  ;;  %v157_v51 = vpop.permute.xlu0 %156 }
  0xa2   :  { %vm311_vm7 = vcmp.eq.s32.totalorder %v6998_v4, %v157_v51  ;;  %vm312_vm8 = vcmp.eq.s32.totalorder %v6998_v4, %v160_v50 }
  0xa3   :  { %v5715_v53 = vsel %vm311_vm7, 1.0, %v6748_v10  ;;  %v5716_v56 = vsel %vm312_vm8, 1.0, %v6748_v10 }
  0xa4   :  { %6240 = vmatmul.mubr.msk.f32.gmra.mxu0 %vm488_vm1, %v5714_v52 }
  0xa5   :  { %v166_v54 = vpop.permute.xlu1 %165  ;;  %6242 = vmatprep.mubr.msk.f32.mxu0 %vm488_vm1, %v5715_v53  ;;  %v163_v55 = vpop.permute.xlu0 %162 }
  0xa6   :  { %vm313_vm9 = vcmp.eq.s32.totalorder %v6998_v4, %v163_v55  ;;  %vm314_vm10 = vcmp.eq.s32.totalorder %v6998_v4, %v166_v54  ;;  %v1074_v54 = vld [vmem:[%s9433_s0 + $0x20] sm:$0xff]  ;;  %v1075_v55 = vld [vmem:[%s9433_s0 + $0x28] sm:$0xff] }
  0xa7   :  { %v5717_v57 = vsel %vm313_vm9, 1.0, %v6748_v10  ;;  %v5718_v60 = vsel %vm314_vm10, 1.0, %v6748_v10 }
  0xa8   :  { %6243 = vmatmul.mubr.msk.f32.gmra.mxu0 %vm488_vm1, %v5716_v56 }
  0xa9   :  { %v172_v58 = vpop.permute.xlu1 %171  ;;  %6245 = vmatprep.mubr.msk.f32.mxu0 %vm488_vm1, %v5717_v57  ;;  %v169_v59 = vpop.permute.xlu0 %168 }
  0xaa   :  { %vm315_vm11 = vcmp.eq.s32.totalorder %v6998_v4, %v169_v59  ;;  %vm316_vm12 = vcmp.eq.s32.totalorder %v6998_v4, %v172_v58  ;;  %v1136_v58 = vpack.c.bf16 %v1075_v55, %v1074_v54  ;;  %v1090_v54 = vld [vmem:[%s9433_s0 + $0xa0] sm:$0xff]  ;;  %v1091_v55 = vld [vmem:[%s9433_s0 + $0xa8] sm:$0xff] }
  0xab   :  { %v5719_v61 = vsel %vm315_vm11, 1.0, %v6748_v10  ;;  %v5720_v2 = vsel %vm316_vm12, 1.0, %v6748_v10  ;;  %vm1682_vm12 = vcmask 97280  }
  0xac   :  { %6246 = vmatmul.mubr.msk.f32.gmra.mxu0 %vm488_vm1, %v5718_v60 }
  0xad   :  { %v178_v62 = vpop.permute.xlu1 %177  ;;  %6248 = vmatprep.mubr.msk.f32.mxu0 %vm488_vm1, %v5719_v61  ;;  %v175_v63 = vpop.permute.xlu0 %174 }
  0xae   :  { %vm317_vm13 = vcmp.eq.s32.totalorder %v6998_v4, %v175_v63  ;;  %vm318_vm14 = vcmp.eq.s32.totalorder %v6998_v4, %v178_v62 }
  0xaf   :  { %v5721_v3 = vsel %vm317_vm13, 1.0, %v6748_v10  ;;  %v5722_v7 = vsel %vm318_vm14, 1.0, %v6748_v10 }
  0xb0   :  { %6249 = vmatmul.mubr.msk.f32.gmra.mxu0 %vm488_vm1, %v5720_v2 }
  0xb1   :  { %v184_v5 = vpop.permute.xlu1 %183  ;;  %6251 = vmatprep.mubr.msk.f32.mxu0 %vm488_vm1, %v5721_v3  ;;  %v181_v6 = vpop.permute.xlu0 %180  ;;  %v1076_v3 = vld [vmem:[%s9433_s0 + $0x30] sm:$0xff] }
  0xb2   :  { %vm319_vm15 = vcmp.eq.s32.totalorder %v6998_v4, %v181_v6  ;;  %vm320_vm0 = vcmp.eq.s32.totalorder %v6998_v4, %v184_v5  ;;  %v1077_v5 = vld [vmem:[%s9433_s0 + $0x38] sm:$0xff] }
  0xb3   :  { %v5723_v8 = vsel %vm319_vm15, 1.0, %v6748_v10  ;;  %v5724_v12 = vsel %vm320_vm0, 1.0, %v6748_v10 }
  0xb4   :  { %6252 = vmatmul.mubr.msk.f32.gmra.mxu0 %vm488_vm1, %v5722_v7 }
  0xb5   :  { %v190_v9 = vpop.permute.xlu1 %189  ;;  %6254 = vmatprep.mubr.msk.f32.mxu0 %vm488_vm1, %v5723_v8  ;;  %v187_v11 = vpop.permute.xlu0 %186  ;;  %v1137_v8 = vpack.c.bf16 %v1077_v5, %v1076_v3  ;;  %v1098_v5 = vld [vmem:[%s9433_s0 + $0xe0] sm:$0xff] }
  0xb6   :  { %vm321_vm2 = vcmp.eq.s32.totalorder %v6998_v4, %v187_v11  ;;  %vm322_vm3 = vcmp.eq.s32.totalorder %v6998_v4, %v190_v9 }
  0xb7   :  { %v5725_v13 = vsel %vm321_vm2, 1.0, %v6748_v10  ;;  %v5726_v16 = vsel %vm322_vm3, 1.0, %v6748_v10 }
  0xb8   :  { %6255 = vmatmul.mubr.msk.f32.gmra.mxu0 %vm488_vm1, %v5724_v12 }
  0xb9   :  { %v196_v14 = vpop.permute.xlu1 %195  ;;  %6257 = vmatprep.mubr.msk.f32.mxu0 %vm488_vm1, %v5725_v13  ;;  %v193_v15 = vpop.permute.xlu0 %192 }
  0xba   :  { %vm323_vm4 = vcmp.eq.s32.totalorder %v6998_v4, %v193_v15  ;;  %vm324_vm5 = vcmp.eq.s32.totalorder %v6998_v4, %v196_v14 }
  0xbb   :  { %v5727_v18 = vsel %vm323_vm4, 1.0, %v6748_v10  ;;  %v5728_v21 = vsel %vm324_vm5, 1.0, %v6748_v10 }
  0xbc   :  { %6258 = vmatmul.mubr.msk.f32.gmra.mxu0 %vm488_vm1, %v5726_v16  ;;  %v1078_v16 = vld [vmem:[%s9433_s0 + $0x40] sm:$0xff] }
  0xbd   :  { %v202_v19 = vpop.permute.xlu1 %201  ;;  %6260 = vmatprep.mubr.msk.f32.mxu0 %vm488_vm1, %v5727_v18  ;;  %v199_v20 = vpop.permute.xlu0 %198  ;;  %v1079_v18 = vld [vmem:[%s9433_s0 + $0x48] sm:$0xff] }
  0xbe   :  { %vm326_vm6 = vcmp.eq.s32.totalorder %v6998_v4, %v202_v19  ;;  %vm325_vm7 = vcmp.eq.s32.totalorder %v6998_v4, %v199_v20 }
  0xbf   :  { %v5730_v22 = vsel %vm326_vm6, 1.0, %v6748_v10  ;;  %v5729_v23 = vsel %vm325_vm7, 1.0, %v6748_v10 }
  0xc0   :  { %6261 = vmatmul.mubr.msk.f32.gmra.mxu0 %vm488_vm1, %v5728_v21  ;;  %6263 = vmatprep.mubr.msk.f32.mxu1 %vm488_vm1, %v5729_v23  ;;  %v1138_v21 = vpack.c.bf16 %v1079_v18, %v1078_v16  ;;  %v1103_v16 = vld [vmem:[%s9433_s0 + $0x108] sm:$0xff] }
  0xc1   :  { %v208_v25 = vpop.permute.xlu1 %207  ;;  %6264 = vmatmul.mubr.msk.f32.vlgmr.msra.gmra.mxu1 %vm488_vm1, %v5730_v22  ;;  %v205_v26 = vpop.permute.xlu0 %204  ;;  %1818 = vmatprep.mubr.bf16.mxu0 %v9441_v0 }
  0xc2   :  { %vm328_vm8 = vcmp.eq.s32.totalorder %v6998_v4, %v208_v25  ;;  %vm327_vm9 = vcmp.eq.s32.totalorder %v6998_v4, %v205_v26  ;;  %1334 = vmatpush1.bf16.msra.mxu1 %v7016_v17  ;;  %v1070_v17 = vld [vmem:[%s9433_s0] sm:$0xff] }
  0xc3   :  { %v5732_v28 = vsel %vm328_vm8, 1.0, %v6748_v10  ;;  %v5731_v29 = vsel %vm327_vm9, 1.0, %v6748_v10  ;;  %1335 = vmatprep.subr.bf16.mxu1 %v6326_v24  ;;  %v1134_v35 = vpack.c.bf16 %v1071_v32, %v1070_v17 }
  0xc4   :  { %6266 = vmatprep.mubr.msk.f32.mxu1 %vm488_vm1, %v5731_v29  ;;  %v1081_v29 = vld [vmem:[%s9433_s0 + $0x58] sm:$0xff] }
  0xc5   :  { %v214_v30 = vpop.permute.xlu1 %213  ;;  %6267 = vmatmul.mubr.msk.f32.gmra.mxu1 %vm488_vm1, %v5732_v28  ;;  %v211_v31 = vpop.permute.xlu0 %210  ;;  %5866 = vmatmul.mubr.msk.bf16.vlgmr.msra.gmra.mxu0 %vm1682_vm12, %v1134_v35  ;;  %v1080_v28 = vld [vmem:[%s9433_s0 + $0x50] sm:$0xff] }
  0xc6   :  { %vm330_vm10 = vcmp.eq.s32.totalorder %v6998_v4, %v214_v30  ;;  %vm329_vm11 = vcmp.eq.s32.totalorder %v6998_v4, %v211_v31  ;;  %1336 = vmatpush1.bf16.msra.mxu1 %v6324_v27  ;;  %1828 = vmatprep.mubr.bf16.mxu0 %v9441_v0  ;;  %v1139_v17 = vpack.c.bf16 %v1081_v29, %v1080_v28  ;;  %v1104_v28 = vld [vmem:[%s9433_s0 + $0x110] sm:$0xff]  ;;  %v1105_v29 = vld [vmem:[%s9433_s0 + $0x118] sm:$0xff] }
  0xc7   :  { %v5734_v33 = vsel %vm330_vm10, 1.0, %v6748_v10  ;;  %v5733_v34 = vsel %vm329_vm11, 1.0, %v6748_v10  ;;  %2676 = vmatprep.subr.bf16.mxu1 %v6332_v38  ;;  %v1082_v38 = vld [vmem:[%s9433_s0 + $0x60] sm:$0xff] }
  0xc8   :  { %6269 = vmatprep.mubr.msk.f32.mxu1 %vm488_vm1, %v5733_v34 }
  0xc9   :  { %v220_v36 = vpop.permute.xlu1 %219  ;;  %6270 = vmatmul.mubr.msk.f32.gmra.mxu1 %vm488_vm1, %v5734_v33  ;;  %v217_v37 = vpop.permute.xlu0 %216 }
  0xca   :  { %vm332_vm13 = vcmp.eq.s32.totalorder %v6998_v4, %v220_v36  ;;  %vm331_vm14 = vcmp.eq.s32.totalorder %v6998_v4, %v217_v37 }
  0xcb   :  { %v5736_v39 = vsel %vm332_vm13, 1.0, %v6748_v10  ;;  %v5735_v40 = vsel %vm331_vm14, 1.0, %v6748_v10 }
  0xcc   :  { %6272 = vmatprep.mubr.msk.f32.mxu1 %vm488_vm1, %v5735_v40 }
  0xcd   :  { %v226_v41 = vpop.permute.xlu1 %225  ;;  %6273 = vmatmul.mubr.msk.f32.gmra.mxu1 %vm488_vm1, %v5736_v39  ;;  %v223_v42 = vpop.permute.xlu0 %222  ;;  %5867 = vmatmul.mubr.msk.bf16.gmra.mxu0 %vm1682_vm12, %v1135_v47  ;;  %v1083_v39 = vld [vmem:[%s9433_s0 + $0x68] sm:$0xff]  ;;  %v1084_v47 = vld [vmem:[%s9433_s0 + $0x70] sm:$0xff] }
  0xce   :  { %vm334_vm15 = vcmp.eq.s32.totalorder %v6998_v4, %v226_v41  ;;  %vm333_vm0 = vcmp.eq.s32.totalorder %v6998_v4, %v223_v42  ;;  %1838 = vmatprep.mubr.bf16.mxu0 %v9441_v0  ;;  %v1140_v42 = vpack.c.bf16 %v1083_v39, %v1082_v38  ;;  %v6342_v38 = vld [vmem:[%s9434_s5 + $0x30] ss:$8 sps:$4 sm:$0xff]   ;;  %v1106_v39 = vld [vmem:[%s9433_s0 + $0x120] sm:$0xff] }
  0xcf   :  { %v5738_v45 = vsel %vm334_vm15, 1.0, %v6748_v10  ;;  %v5737_v46 = vsel %vm333_vm0, 1.0, %v6748_v10 }
  0xd0   :  { %6275 = vmatprep.mubr.msk.f32.mxu1 %vm488_vm1, %v5737_v46 }
  0xd1   :  { %v232_v48 = vpop.permute.xlu1 %231  ;;  %6276 = vmatmul.mubr.msk.f32.gmra.mxu1 %vm488_vm1, %v5738_v45  ;;  %v229_v49 = vpop.permute.xlu0 %228 }
  0xd2   :  { %vm336_vm2 = vcmp.eq.s32.totalorder %v6998_v4, %v232_v48  ;;  %vm335_vm3 = vcmp.eq.s32.totalorder %v6998_v4, %v229_v49  ;;  %v1087_v49 = vld [vmem:[%s9433_s0 + $0x88] sm:$0xff] }
  0xd3   :  { %v5740_v50 = vsel %vm336_vm2, 1.0, %v6748_v10  ;;  %v5739_v51 = vsel %vm335_vm3, 1.0, %v6748_v10 }
  0xd4   :  { %6278 = vmatprep.mubr.msk.f32.mxu1 %vm488_vm1, %v5739_v51  ;;  %v1088_v51 = vld [vmem:[%s9433_s0 + $0x90] sm:$0xff] }
  0xd5   :  { %v238_v52 = vpop.permute.xlu1 %237  ;;  %6279 = vmatmul.mubr.msk.f32.gmra.mxu1 %vm488_vm1, %v5740_v50  ;;  %v235_v53 = vpop.permute.xlu0 %234  ;;  %5868 = vmatmul.mubr.msk.bf16.gmra.mxu0 %vm1682_vm12, %v1136_v58  ;;  %v1093_v58 = vld [vmem:[%s9433_s0 + $0xb8] sm:$0xff] }
  0xd6   :  { %vm338_vm4 = vcmp.eq.s32.totalorder %v6998_v4, %v238_v52  ;;  %vm337_vm5 = vcmp.eq.s32.totalorder %v6998_v4, %v235_v53  ;;  %1848 = vmatprep.mubr.bf16.mxu0 %v9441_v0  ;;  %v1089_v52 = vld [vmem:[%s9433_s0 + $0x98] sm:$0xff] }
  0xd7   :  { %v5742_v56 = vsel %vm338_vm4, 1.0, %v6748_v10  ;;  %v5741_v57 = vsel %vm337_vm5, 1.0, %v6748_v10  ;;  %v1143_v53 = vpack.c.bf16 %v1089_v52, %v1088_v51  ;;  %v6353_v52 = vld [vmem:[%s9434_s5 + $0x4] ss:$8 sps:$4 sm:$0xff]  }
  0xd8   :  { %6281 = vmatprep.mubr.msk.f32.mxu1 %vm488_vm1, %v5741_v57  ;;  %v1092_v57 = vld [vmem:[%s9433_s0 + $0xb0] sm:$0xff] }
  0xd9   :  { %v244_v59 = vpop.permute.xlu1 %243  ;;  %6282 = vmatmul.mubr.msk.f32.gmra.mxu1 %vm488_vm1, %v5742_v56  ;;  %v241_v60 = vpop.permute.xlu0 %240  ;;  %v1144_v56 = vpack.c.bf16 %v1091_v55, %v1090_v54 }
  0xda   :  { %vm340_vm6 = vcmp.eq.s32.totalorder %v6998_v4, %v244_v59  ;;  %vm339_vm7 = vcmp.eq.s32.totalorder %v6998_v4, %v241_v60  ;;  %v1145_v59 = vpack.c.bf16 %v1093_v58, %v1092_v57  ;;  %v1094_v60 = vld [vmem:[%s9433_s0 + $0xc0] sm:$0xff]  ;;  %v6356_v57 = vld [vmem:[%s9434_s5 + $0xf4] ss:$8 sps:$4 sm:$0xff]  }
  0xdb   :  { %v5744_v61 = vsel %vm340_vm6, 1.0, %v6748_v10  ;;  %v5743_v62 = vsel %vm339_vm7, 1.0, %v6748_v10 }
  0xdc   :  { %6284 = vmatprep.mubr.msk.f32.mxu1 %vm488_vm1, %v5743_v62 }
  0xdd   :  { %v250_v63 = vpop.permute.xlu1 %249  ;;  %6285 = vmatmul.mubr.msk.f32.gmra.mxu1 %vm488_vm1, %v5744_v61  ;;  %v247_v2 = vpop.permute.xlu0 %246  ;;  %5869 = vmatmul.mubr.msk.bf16.gmra.mxu0 %vm1682_vm12, %v1137_v8  ;;  %v1095_v61 = vld [vmem:[%s9433_s0 + $0xc8] sm:$0xff]  ;;  %v1100_v8 = vld [vmem:[%s9433_s0 + $0xf0] sm:$0xff] }
  0xde   :  { %vm342_vm8 = vcmp.eq.s32.totalorder %v6998_v4, %v250_v63  ;;  %vm341_vm9 = vcmp.eq.s32.totalorder %v6998_v4, %v247_v2  ;;  %1858 = vmatprep.mubr.bf16.mxu0 %v9441_v0  ;;  %v1146_v62 = vpack.c.bf16 %v1095_v61, %v1094_v60  ;;  %v1096_v63 = vld [vmem:[%s9433_s0 + $0xd0] sm:$0xff]  ;;  %v1097_v2 = vld [vmem:[%s9433_s0 + $0xd8] sm:$0xff]  ;;  %v1110_v61 = vld [vmem:[%s9433_s0 + $0x140] sm:$0xff] }
  0xdf   :  { %v5746_v6 = vsel %vm342_vm8, 1.0, %v6748_v10  ;;  %v5745_v7 = vsel %vm341_vm9, 1.0, %v6748_v10  ;;  %v1147_v3 = vpack.c.bf16 %v1097_v2, %v1096_v63  ;;  %v6354_v60 = vld [vmem:[%s9434_s5 + $0xf0] ss:$8 sps:$4 sm:$0xff]   ;;  %v6359_v2 = vld [vmem:[%s9434_s5 + $0xe4] ss:$8 sps:$4 sm:$0xff]  }
  0xe0   :  { %6287 = vmatprep.mubr.msk.f32.mxu1 %vm488_vm1, %v5745_v7 }
  0xe1   :  { %v256_v9 = vpop.permute.xlu1 %255  ;;  %6288 = vmatmul.mubr.msk.f32.gmra.mxu1 %vm488_vm1, %v5746_v6  ;;  %v253_v11 = vpop.permute.xlu0 %252  ;;  %v1099_v6 = vld [vmem:[%s9433_s0 + $0xe8] sm:$0xff] }
  0xe2   :  { %vm344_vm10 = vcmp.eq.s32.totalorder %v6998_v4, %v256_v9  ;;  %vm343_vm11 = vcmp.eq.s32.totalorder %v6998_v4, %v253_v11  ;;  %v1148_v7 = vpack.c.bf16 %v1099_v6, %v1098_v5  ;;  %v1101_v9 = vld [vmem:[%s9433_s0 + $0xf8] sm:$0xff] }
  0xe3   :  { %v5748_v12 = vsel %vm344_vm10, 1.0, %v6748_v10  ;;  %v5747_v13 = vsel %vm343_vm11, 1.0, %v6748_v10  ;;  %v1149_v11 = vpack.c.bf16 %v1101_v9, %v1100_v8  ;;  %v6362_v8 = vld [vmem:[%s9434_s5 + $0xd4] ss:$8 sps:$4 sm:$0xff]  }
  0xe4   :  { %6290 = vmatprep.mubr.msk.f32.mxu1 %vm488_vm1, %v5747_v13 }
  0xe5   :  { %v262_v14 = vpop.permute.xlu1 %261  ;;  %6291 = vmatmul.mubr.msk.f32.gmra.mxu1 %vm488_vm1, %v5748_v12  ;;  %v259_v15 = vpop.permute.xlu0 %258  ;;  %5870 = vmatmul.mubr.msk.bf16.gmra.mxu0 %vm1682_vm12, %v1138_v21 }
  0xe6   :  { %vm346_vm13 = vcmp.eq.s32.totalorder %v6998_v4, %v262_v14  ;;  %vm345_vm14 = vcmp.eq.s32.totalorder %v6998_v4, %v259_v15  ;;  %1868 = vmatprep.mubr.bf16.mxu0 %v9441_v0  ;;  %v6330_v14 = vld [vmem:[%s9434_s5 + $0x70] ss:$8 sps:$4 sm:$0xff]   ;;  %v1102_v15 = vld [vmem:[%s9433_s0 + $0x100] sm:$0xff] }
  0xe7   :  { %v5750_v19 = vsel %vm346_vm13, 1.0, %v6748_v10  ;;  %v5749_v20 = vsel %vm345_vm14, 1.0, %v6748_v10 }
  0xe8   :  { %6293 = vmatprep.mubr.msk.f32.mxu1 %vm488_vm1, %v5749_v20  ;;  %v1150_v20 = vpack.c.bf16 %v1103_v16, %v1102_v15 }
  0xe9   :  { %v268_v22 = vpop.permute.xlu1 %267  ;;  %6294 = vmatmul.mubr.msk.f32.gmra.mxu1 %vm488_vm1, %v5750_v19  ;;  %v265_v23 = vpop.permute.xlu0 %264  ;;  %v6335_v19 = vld [vmem:[%s9434_s5 + $0x64] ss:$8 sps:$4 sm:$0xff]  }
  0xea   :  { %vm348_vm15 = vcmp.eq.s32.totalorder %v6998_v4, %v268_v22  ;;  %vm347_vm0 = vcmp.eq.s32.totalorder %v6998_v4, %v265_v23  ;;  %v6333_v23 = vld [vmem:[%s9434_s5 + $0x60] ss:$8 sps:$4 sm:$0xff]  }
  0xeb   :  { %v5752_v24 = vsel %vm348_vm15, 1.0, %v6748_v10  ;;  %v5751_v25 = vsel %vm347_vm0, 1.0, %v6748_v10 }
  0xec   :  { %6296 = vmatprep.mubr.msk.f32.mxu1 %vm488_vm1, %v5751_v25 }
  0xed   :  { %v274_v26 = vpop.permute.xlu1 %273  ;;  %6297 = vmatmul.mubr.msk.f32.gmra.mxu1 %vm488_vm1, %v5752_v24  ;;  %v271_v27 = vpop.permute.xlu0 %270  ;;  %5871 = vmatmul.mubr.msk.bf16.gmra.mxu0 %vm1682_vm12, %v1139_v17  ;;  %v6338_v24 = vld [vmem:[%s9434_s5 + $0x54] ss:$8 sps:$4 sm:$0xff]   ;;  %v1151_v17 = vpack.c.bf16 %v1105_v29, %v1104_v28 }
  0xee   :  { %vm350_vm2 = vcmp.eq.s32.totalorder %v6998_v4, %v274_v26  ;;  %vm349_vm3 = vcmp.eq.s32.totalorder %v6998_v4, %v271_v27  ;;  %1878 = vmatprep.mubr.bf16.mxu0 %v9441_v0  ;;  %v6336_v27 = vld [vmem:[%s9434_s5 + $0x50] ss:$8 sps:$4 sm:$0xff]  }
  0xef   :  { %v5754_v30 = vsel %vm350_vm2, 1.0, %v6748_v10  ;;  %v5753_v31 = vsel %vm349_vm3, 1.0, %v6748_v10 }
  0xf0   :  { %6299 = vmatprep.mubr.msk.f32.mxu1 %vm488_vm1, %v5753_v31  ;;  %v6341_v31 = vld [vmem:[%s9434_s5 + $0x44] ss:$8 sps:$4 sm:$0xff]  }
  0xf1   :  { %v280_v32 = vpop.permute.xlu1 %279  ;;  %6300 = vmatmul.mubr.msk.f32.gmra.mxu1 %vm488_vm1, %v5754_v30  ;;  %v277_v33 = vpop.permute.xlu0 %276 }
  0xf2   :  { %vm352_vm4 = vcmp.eq.s32.totalorder %v6998_v4, %v280_v32  ;;  %vm351_vm5 = vcmp.eq.s32.totalorder %v6998_v4, %v277_v33 }
  0xf3   :  { %v5756_v34 = vsel %vm352_vm4, 1.0, %v6748_v10  ;;  %v5755_v35 = vsel %vm351_vm5, 1.0, %v6748_v10 }
  0xf4   :  { %6302 = vmatprep.mubr.msk.f32.mxu1 %vm488_vm1, %v5755_v35  ;;  %v6344_v35 = vld [vmem:[%s9434_s5 + $0x34] ss:$8 sps:$4 sm:$0xff]  }
  0xf5   :  { %v286_v36 = vpop.permute.xlu1 %285  ;;  %6303 = vmatmul.mubr.msk.f32.gmra.mxu1 %vm488_vm1, %v5756_v34  ;;  %v283_v37 = vpop.permute.xlu0 %282  ;;  %5872 = vmatmul.mubr.msk.bf16.gmra.mxu0 %vm1682_vm12, %v1140_v42  ;;  %v6339_v34 = vld [vmem:[%s9434_s5 + $0x40] ss:$8 sps:$4 sm:$0xff]   ;;  %v6347_v42 = vld [vmem:[%s9434_s5 + $0x24] ss:$8 sps:$4 sm:$0xff]  }
  0xf6   :  { %vm354_vm6 = vcmp.eq.s32.totalorder %v6998_v4, %v286_v36  ;;  %vm353_vm7 = vcmp.eq.s32.totalorder %v6998_v4, %v283_v37  ;;  %1888 = vmatprep.mubr.bf16.mxu0 %v9441_v0 }
  0xf7   :  { %v5758_v40 = vsel %vm354_vm6, 1.0, %v6748_v10  ;;  %v5757_v41 = vsel %vm353_vm7, 1.0, %v6748_v10 }
  0xf8   :  { %6305 = vmatprep.mubr.msk.f32.mxu1 %vm488_vm1, %v5757_v41 }
  0xf9   :  { %v292_v43 = vpop.permute.xlu1 %291  ;;  %6306 = vmatmul.mubr.msk.f32.gmra.mxu1 %vm488_vm1, %v5758_v40  ;;  %v289_v44 = vpop.permute.xlu0 %288  ;;  %v1107_v40 = vld [vmem:[%s9433_s0 + $0x128] sm:$0xff] }
  0xfa   :  { %vm356_vm8 = vcmp.eq.s32.totalorder %v6998_v4, %v292_v43  ;;  %vm355_vm9 = vcmp.eq.s32.totalorder %v6998_v4, %v289_v44  ;;  %v1085_v4 = vld [vmem:[%s9433_s0 + $0x78] sm:$0xff]  ;;  %v1152_v43 = vpack.c.bf16 %v1107_v40, %v1106_v39  ;;  %v1119_v39 = vld [vmem:[%s9433_s0 + $0x188] sm:$0xff] }
  0xfb   :  { %v5760_v45 = vsel %vm356_vm8, 1.0, %v6748_v10  ;;  %v5759_v46 = vsel %vm355_vm9, 1.0, %v6748_v10  ;;  %v1141_v48 = vpack.c.bf16 %v1085_v4, %v1084_v47  ;;  %v1086_v10 = vld [vmem:[%s9433_s0 + $0x80] sm:$0xff]  ;;  %v6350_v47 = vld [vmem:[%s9434_s5 + $0x14] ss:$8 sps:$4 sm:$0xff]  }
  0xfc   :  { %6308 = vmatprep.mubr.msk.f32.mxu1 %vm488_vm1, %v5759_v46  ;;  %v1142_v50 = vpack.c.bf16 %v1087_v49, %v1086_v10  ;;  %v6345_v46 = vld [vmem:[%s9434_s5 + $0x20] ss:$8 sps:$4 sm:$0xff]   ;;  %v6348_v10 = vld [vmem:[%s9434_s5 + $0x10] ss:$8 sps:$4 sm:$0xff]  }
  0xfd   :  { %6309 = vmatmul.mubr.msk.f32.gmra.mxu1 %vm488_vm1, %v5760_v45  ;;  %5873 = vmatmul.mubr.msk.bf16.gmra.mxu0 %vm1682_vm12, %v1141_v48  ;;  %v1108_v49 = vld [vmem:[%s9433_s0 + $0x130] sm:$0xff] }
  0xfe   :  { %1353 = vmatprep.mubr.bf16.mxu1 %v9441_v0  ;;  %1898 = vmatprep.mubr.bf16.mxu0 %v9441_v0 }
 0x105   :  { %5874 = vmatmul.mubr.msk.bf16.gmra.mxu0 %vm1682_vm12, %v1142_v50  ;;  %v1109_v50 = vld [vmem:[%s9433_s0 + $0x138] sm:$0xff] }
 0x106   :  { %1908 = vmatprep.mubr.bf16.mxu0 %v9441_v0 }
 0x10d   :  { %5875 = vmatmul.mubr.msk.bf16.gmra.mxu0 %vm1682_vm12, %v1143_v53  ;;  %v1153_v53 = vpack.c.bf16 %v1109_v50, %v1108_v49 }
 0x10e   :  { %1918 = vmatprep.mubr.bf16.mxu0 %v9441_v0 }
 0x115   :  { %5876 = vmatmul.mubr.msk.bf16.gmra.mxu0 %vm1682_vm12, %v1144_v56  ;;  %v6351_v56 = vld [vmem:[%s9434_s5] ss:$8 sps:$4 sm:$0xff]  }
 0x116   :  { %1928 = vmatprep.mubr.bf16.mxu0 %v9441_v0 }
 0x11d   :  { %5877 = vmatmul.mubr.msk.bf16.gmra.mxu0 %vm1682_vm12, %v1145_v59 }
 0x11e   :  { %1938 = vmatprep.mubr.bf16.mxu0 %v9441_v0 }
 0x125   :  { %5878 = vmatmul.mubr.msk.bf16.gmra.mxu0 %vm1682_vm12, %v1146_v62  ;;  %v1111_v62 = vld [vmem:[%s9433_s0 + $0x148] sm:$0xff] }
 0x126   :  { %1948 = vmatprep.mubr.bf16.mxu0 %v9441_v0 }
 0x12d   :  { %5879 = vmatmul.mubr.msk.bf16.gmra.mxu0 %vm1682_vm12, %v1147_v3  ;;  %v1154_v3 = vpack.c.bf16 %v1111_v62, %v1110_v61 }
 0x12e   :  { %1958 = vmatprep.mubr.bf16.mxu0 %v9441_v0 }
 0x135   :  { %5880 = vmatmul.mubr.msk.bf16.gmra.mxu0 %vm1682_vm12, %v1148_v7  ;;  %v6357_v7 = vld [vmem:[%s9434_s5 + $0xe0] ss:$8 sps:$4 sm:$0xff]  }
 0x136   :  { %1968 = vmatprep.mubr.bf16.mxu0 %v9441_v0 }
 0x13d   :  { %5881 = vmatmul.mubr.msk.bf16.gmra.mxu0 %vm1682_vm12, %v1149_v11 }
 0x13e   :  { %1978 = vmatprep.mubr.bf16.mxu0 %v9441_v0 }
 0x144   :  { %v6217_v12 = vpop.f32.mrf.mxu0 }
 0x145   :  { %5882 = vmatmul.mubr.msk.bf16.gmra.mxu0 %vm1682_vm12, %v1150_v20  ;;  %v6363_v20 = vld [vmem:[%s9434_s5 + $0xc0] ss:$8 sps:$4 sm:$0xff]  }
 0x146   :  { %v751_v13 = vpop.f32.mrf.mxu0  ;;  %1988 = vmatprep.mubr.bf16.mxu0 %v9441_v0 }
 0x147   :  { %v1168_v18 = vpack.c.bf16 %v6217_v12, %v751_v13  ;;  %v6360_v12 = vld [vmem:[%s9434_s5 + $0xd0] ss:$8 sps:$4 sm:$0xff]  }
 0x148   :  { %v6220_v21 = vpop.f32.mrf.mxu0  ;;  %v1112_v13 = vld [vmem:[%s9433_s0 + $0x150] sm:$0xff] }
 0x149   :  { %5831 = vmatmul.mubr.msk.bf16.vlgmr.msra.gmra.mxu1 %vm488_vm1, %v1168_v18 }
 0x14a   :  { %2677 = vmatpush1.bf16.msra.mxu1 %v6330_v14  ;;  %v761_v22 = vpop.f32.mrf.mxu0  ;;  %1363 = vmatprep.mubr.bf16.mxu1 %v9441_v0  ;;  %v1113_v14 = vld [vmem:[%s9433_s0 + $0x158] sm:$0xff] }
 0x14b   :  { %2678 = vmatprep.subr.bf16.mxu1 %v6335_v19  ;;  %v1169_v30 = vpack.c.bf16 %v6220_v21, %v761_v22  ;;  %v1155_v16 = vpack.c.bf16 %v1113_v14, %v1112_v13  ;;  %v6365_v21 = vld [vmem:[%s9434_s5 + $0xc4] ss:$8 sps:$4 sm:$0xff]  }
 0x14c   :  { %v6223_v25 = vpop.f32.mrf.mxu0 }
 0x14d   :  { %5883 = vmatmul.mubr.msk.bf16.gmra.mxu0 %vm1682_vm12, %v1151_v17  ;;  %v1117_v17 = vld [vmem:[%s9433_s0 + $0x178] sm:$0xff] }
 0x14e   :  { %v771_v26 = vpop.f32.mrf.mxu0  ;;  %2679 = vmatpush1.bf16.msra.mxu1 %v6333_v23  ;;  %1998 = vmatprep.mubr.bf16.mxu0 %v9441_v0 }
 0x14f   :  { %2680 = vmatprep.subr.bf16.mxu1 %v6338_v24  ;;  %v1170_v41 = vpack.c.bf16 %v6223_v25, %v771_v26  ;;  %v1114_v24 = vld [vmem:[%s9433_s0 + $0x160] sm:$0xff]  ;;  %v1115_v25 = vld [vmem:[%s9433_s0 + $0x168] sm:$0xff] }
 0x150   :  { %v6226_v32 = vpop.f32.mrf.mxu0 }
 0x151   :  { %5832 = vmatmul.mubr.msk.bf16.gmra.mxu1 %vm488_vm1, %v1169_v30 }
 0x152   :  { %v781_v33 = vpop.f32.mrf.mxu0  ;;  %1373 = vmatprep.mubr.bf16.mxu1 %v9441_v0  ;;  %2681 = vmatpush1.bf16.msra.mxu1 %v6336_v27  ;;  %v1156_v27 = vpack.c.bf16 %v1115_v25, %v1114_v24 }
 0x153   :  { %2682 = vmatprep.subr.bf16.mxu1 %v6341_v31  ;;  %v1171_v51 = vpack.c.bf16 %v6226_v32, %v781_v33  ;;  %v1116_v31 = vld [vmem:[%s9433_s0 + $0x170] sm:$0xff] }
 0x154   :  { %v6229_v36 = vpop.f32.mrf.mxu0 }
 0x155   :  { %5884 = vmatmul.mubr.msk.bf16.gmra.mxu0 %vm1682_vm12, %v1152_v43 }
 0x156   :  { %v791_v37 = vpop.f32.mrf.mxu0  ;;  %2683 = vmatpush1.bf16.msra.mxu1 %v6339_v34  ;;  %2008 = vmatprep.mubr.bf16.mxu0 %v9441_v0  ;;  %v1157_v34 = vpack.c.bf16 %v1117_v17, %v1116_v31 }
 0x157   :  { %2684 = vmatprep.subr.bf16.mxu1 %v6344_v35  ;;  %v1172_v63 = vpack.c.bf16 %v6229_v36, %v791_v37  ;;  %v6366_v35 = vld [vmem:[%s9434_s5 + $0xb0] ss:$8 sps:$4 sm:$0xff]   ;;  %v6368_v36 = vld [vmem:[%s9434_s5 + $0xb4] ss:$8 sps:$4 sm:$0xff]  }
 0x158   :  { %v6232_v44 = vpop.f32.mrf.mxu0 }
 0x159   :  { %5833 = vmatmul.mubr.msk.bf16.gmra.mxu1 %vm488_vm1, %v1170_v41 }
 0x15a   :  { %v801_v45 = vpop.f32.mrf.mxu0  ;;  %1383 = vmatprep.mubr.bf16.mxu1 %v9441_v0  ;;  %2685 = vmatpush1.bf16.msra.mxu1 %v6342_v38  ;;  %v1118_v38 = vld [vmem:[%s9433_s0 + $0x180] sm:$0xff] }
 0x15b   :  { %2686 = vmatprep.subr.bf16.mxu1 %v6347_v42  ;;  %v1173_v15 = vpack.c.bf16 %v6232_v44, %v801_v45  ;;  %v1158_v42 = vpack.c.bf16 %v1119_v39, %v1118_v38  ;;  %v1128_v38 = vld [vmem:[%s9433_s0 + $0x1d0] sm:$0xff]  ;;  %v1129_v39 = vld [vmem:[%s9433_s0 + $0x1d8] sm:$0xff] }
 0x15c   :  { %v7417_v4 = vpop.f32.mrf.mxu0 }
 0x15d   :  { %5885 = vmatmul.mubr.msk.bf16.gmra.mxu0 %vm1682_vm12, %v1153_v53 }
 0x15e   :  { %v7419_v48 = vpop.f32.mrf.mxu0  ;;  %2687 = vmatpush1.bf16.msra.mxu1 %v6345_v46  ;;  %2018 = vmatprep.mubr.bf16.mxu0 %v9441_v0 }
 0x15f   :  { %2688 = vmatprep.subr.bf16.mxu1 %v6350_v47  ;;  %v1174_v26 = vpack.c.bf16 %v7417_v4, %v7419_v48  ;;  %v1120_v47 = vld [vmem:[%s9433_s0 + $0x190] sm:$0xff]  ;;  %v1121_v4 = vld [vmem:[%s9433_s0 + $0x198] sm:$0xff] }
 0x160   :  { %v7433_v54 = vpop.f32.mrf.mxu0  ;;  %v1159_v50 = vpack.c.bf16 %v1121_v4, %v1120_v47  ;;  %v1163_v4 = vpack.c.bf16 %v1129_v39, %v1128_v38 }
 0x161   :  { %5834 = vmatmul.mubr.msk.bf16.gmra.mxu1 %vm488_vm1, %v1171_v51 }
 0x162   :  { %v7437_v55 = vpop.f32.mrf.mxu0  ;;  %1393 = vmatprep.mubr.bf16.mxu1 %v9441_v0  ;;  %2689 = vmatpush1.bf16.msra.mxu1 %v6348_v10 }
 0x163   :  { %2690 = vmatprep.subr.bf16.mxu1 %v6353_v52  ;;  %v1175_v32 = vpack.c.bf16 %v7433_v54, %v7437_v55  ;;  %v1122_v55 = vld [vmem:[%s9433_s0 + $0x1a0] sm:$0xff] }
 0x164   :  { %v7447_v58 = vpop.f32.mrf.mxu0 }
 0x165   :  { %5886 = vmatmul.mubr.msk.bf16.gmra.mxu0 %vm1682_vm12, %v1154_v3  ;;  %v6371_v3 = vld [vmem:[%s9434_s5 + $0x174] ss:$8 sps:$4 sm:$0xff]  }
 0x166   :  { %v7449_v59 = vpop.f32.mrf.mxu0  ;;  %2691 = vmatpush1.bf16.msra.mxu1 %v6351_v56  ;;  %2028 = vmatprep.mubr.bf16.mxu0 %v9441_v0  ;;  %v1123_v56 = vld [vmem:[%s9433_s0 + $0x1a8] sm:$0xff] }
 0x167   :  { %2692 = vmatprep.subr.bf16.mxu1 %v6356_v57  ;;  %v1176_v40 = vpack.c.bf16 %v7447_v58, %v7449_v59  ;;  %3427 = vmatprep.subr.bf16.mxu0 %v6371_v3 }
 0x168   :  { %v7463_v5 = vpop.f32.mrf.mxu0 }
 0x169   :  { %5835 = vmatmul.mubr.msk.bf16.gmra.mxu1 %vm488_vm1, %v1172_v63 }
 0x16a   :  { %v7467_v6 = vpop.f32.mrf.mxu0  ;;  %1403 = vmatprep.mubr.bf16.mxu1 %v9441_v0  ;;  %2693 = vmatpush2.bf16.msra.mxu1 %v6354_v60  ;;  %v1160_v60 = vpack.c.bf16 %v1123_v56, %v1122_v55  ;;  %v1130_v55 = vld [vmem:[%s9433_s0 + $0x1e0] sm:$0xff]  ;;  %v1131_v56 = vld [vmem:[%s9433_s0 + $0x1e8] sm:$0xff] }
 0x16b   :  { %2694 = vmatprep.subr.bf16.mxu1 %v6359_v2  ;;  %v1177_v48 = vpack.c.bf16 %v7463_v5, %v7467_v6  ;;  %v6369_v2 = vld [vmem:[%s9434_s5 + $0x170] ss:$8 sps:$4 sm:$0xff]   ;;  %v6372_v5 = vld [vmem:[%s9434_s5 + $0xa0] ss:$8 sps:$4 sm:$0xff]   ;;  %v6374_v6 = vld [vmem:[%s9434_s5 + $0xa4] ss:$8 sps:$4 sm:$0xff]   ;;  %v1164_v3 = vpack.c.bf16 %v1131_v56, %v1130_v55 }
 0x16c   :  { %v7477_v9 = vpop.f32.mrf.mxu0  ;;  %3428 = vmatpush1.bf16.msra.mxu0 %v6369_v2 }
 0x16d   :  { %5887 = vmatmul.mubr.msk.bf16.gmra.mxu0 %vm1682_vm12, %v1155_v16 }
 0x16e   :  { %v7479_v11 = vpop.f32.mrf.mxu0  ;;  %2695 = vmatpush2.bf16.msra.mxu1 %v6357_v7  ;;  %2038 = vmatprep.mubr.bf16.mxu0 %v9441_v0 }
 0x16f   :  { %2696 = vmatprep.subr.bf16.mxu1 %v6362_v8  ;;  %v1178_v57 = vpack.c.bf16 %v7477_v9, %v7479_v11  ;;  %v1124_v8 = vld [vmem:[%s9433_s0 + $0x1b0] sm:$0xff]  ;;  %v1125_v9 = vld [vmem:[%s9433_s0 + $0x1b8] sm:$0xff] }
 0x170   :  { %v7490_v18 = vpop.f32.mrf.mxu0  ;;  %v1161_v14 = vpack.c.bf16 %v1125_v9, %v1124_v8  ;;  %v6384_v9 = vld [vmem:[%s9434_s5 + $0x80] ss:$8 sps:$4 sm:$0xff]  }
 0x171   :  { %5836 = vmatmul.mubr.msk.bf16.gmra.mxu1 %vm488_vm1, %v1173_v15 }
 0x172   :  { %v7494_v19 = vpop.f32.mrf.mxu0  ;;  %1413 = vmatprep.mubr.bf16.mxu1 %v9441_v0  ;;  %2697 = vmatpush2.bf16.msra.mxu1 %v6360_v12 }
 0x173   :  { %2698 = vmatprep.subr.bf16.mxu1 %v6365_v21  ;;  %v1179_v11 = vpack.c.bf16 %v7490_v18, %v7494_v19  ;;  %v1127_v21 = vld [vmem:[%s9433_s0 + $0x1c8] sm:$0xff] }
 0x174   :  { %v7504_v22 = vpop.f32.mrf.mxu0 }
 0x175   :  { %5888 = vmatmul.mubr.msk.bf16.gmra.mxu0 %vm1682_vm12, %v1156_v27 }
 0x176   :  { %v7506_v23 = vpop.f32.mrf.mxu0  ;;  %2699 = vmatpush2.bf16.msra.mxu1 %v6363_v20  ;;  %2048 = vmatprep.mubr.bf16.mxu0 %v9441_v0  ;;  %v1126_v20 = vld [vmem:[%s9433_s0 + $0x1c0] sm:$0xff] }
 0x177   :  { %2700 = vmatprep.subr.bf16.mxu1 %v6368_v36  ;;  %v1180_v24 = vpack.c.bf16 %v7504_v22, %v7506_v23  ;;  %v1162_v27 = vpack.c.bf16 %v1127_v21, %v1126_v20  ;;  %v6375_v22 = vld [vmem:[%s9434_s5 + $0x160] ss:$8 sps:$4 sm:$0xff]   ;;  %v6377_v23 = vld [vmem:[%s9434_s5 + $0x164] ss:$8 sps:$4 sm:$0xff]   ;;  %v1132_v20 = vld [vmem:[%s9433_s0 + $0x1f0] sm:$0xff] }
 0x178   :  { %v7516_v28 = vpop.f32.mrf.mxu0  ;;  %3429 = vmatprep.subr.bf16.mxu0 %v6377_v23  ;;  %v1133_v21 = vld [vmem:[%s9433_s0 + $0x1f8] sm:$0xff] }
 0x179   :  { %5837 = vmatmul.mubr.msk.bf16.gmra.mxu1 %vm488_vm1, %v1174_v26  ;;  %3430 = vmatpush1.bf16.msra.mxu0 %v6375_v22  ;;  %v1165_v23 = vpack.c.bf16 %v1133_v21, %v1132_v20 }
 0x17a   :  { %v7520_v29 = vpop.f32.mrf.mxu0  ;;  %1423 = vmatprep.mubr.bf16.mxu1 %v9441_v0  ;;  %2701 = vmatpush2.bf16.msra.mxu1 %v6366_v35  ;;  %v6380_v35 = vld [vmem:[%s9434_s5 + $0x94] ss:$8 sps:$4 sm:$0xff]  }
 0x17b   :  { %2702 = vmatprep.subr.bf16.mxu1 %v6374_v6 }
 0x17c   :  { %v7524_v30 = vpop.f32.mrf.mxu0 }
 0x17d   :  { %5889 = vmatmul.mubr.msk.bf16.gmra.mxu0 %vm1682_vm12, %v1157_v34  ;;  %v6378_v34 = vld [vmem:[%s9434_s5 + $0x90] ss:$8 sps:$4 sm:$0xff]  }
 0x17e   :  { %v7534_v33 = vpop.f32.mrf.mxu0  ;;  %2058 = vmatprep.mubr.bf16.mxu0 %v9441_v0  ;;  %2703 = vmatpush2.bf16.msra.mxu1 %v6372_v5 }
 0x17f   :  { %2704 = vmatprep.subr.bf16.mxu1 %v6380_v35 }
 0x180   :  { %v7546_v37 = vpop.f32.mrf.mxu0 }
 0x181   :  { %5838 = vmatmul.mubr.msk.bf16.gmra.mxu1 %vm488_vm1, %v1175_v32  ;;  %v7564_v44 = vpop.f32.mrf.mxu1 }
 0x182   :  { %1433 = vmatprep.mubr.bf16.mxu1 %v9441_v0  ;;  %v7556_v41 = vpop.f32.mrf.mxu0  ;;  %2705 = vmatpush2.bf16.msra.mxu1 %v6378_v34 }
 0x183   :  { %v7578_v10 = vpop.f32.mrf.mxu1 }
 0x185   :  { %v7559_v43 = vpop.f32.mrf.mxu0  ;;  %5890 = vmatmul.mubr.msk.bf16.gmra.mxu0 %vm1682_vm12, %v1158_v42  ;;  %v7588_v52 = vpop.f32.mrf.mxu1 }
 0x186   :  { %2068 = vmatprep.mubr.bf16.mxu0 %v9441_v0 }
 0x187   :  { %v7566_v45 = vpop.f32.mrf.mxu0  ;;  %v7602_v58 = vpop.f32.mrf.mxu1 }
 0x189   :  { %5839 = vmatmul.mubr.msk.bf16.gmra.mxu1 %vm488_vm1, %v1176_v40  ;;  %v7568_v46 = vpop.f32.mrf.mxu0  ;;  %v7612_v62 = vpop.f32.mrf.mxu1  ;;  %v1181_v40 = vpack.c.bf16 %v7516_v28, %v7520_v29 }
 0x18a   :  { %1443 = vmatprep.mubr.bf16.mxu1 %v9441_v0 }
 0x18b   :  { %v7580_v49 = vpop.f32.mrf.mxu0  ;;  %v7638_v12 = vpop.f32.mrf.mxu1 }
 0x18d   :  { %v7583_v51 = vpop.f32.mrf.mxu0  ;;  %5891 = vmatmul.mubr.msk.bf16.gmra.mxu0 %vm1682_vm12, %v1159_v50  ;;  %v7648_v16 = vpop.f32.mrf.mxu1 }
 0x18e   :  { %2078 = vmatprep.mubr.bf16.mxu0 %v9441_v0 }
 0x18f   :  { %v7590_v53 = vpop.f32.mrf.mxu0  ;;  %v7662_v25 = vpop.f32.mrf.mxu1 }
 0x191   :  { %5840 = vmatmul.mubr.msk.bf16.gmra.mxu1 %vm488_vm1, %v1177_v48  ;;  %v7592_v54 = vpop.f32.mrf.mxu0  ;;  %v7672_v17 = vpop.f32.mrf.mxu1 }
 0x192   :  { %1453 = vmatprep.mubr.bf16.mxu1 %v9441_v0 }
 0x193   :  { %v7604_v59 = vpop.f32.mrf.mxu0  ;;  %v7698_v42 = vpop.f32.mrf.mxu1 }
 0x195   :  { %v7607_v61 = vpop.f32.mrf.mxu0  ;;  %5892 = vmatmul.mubr.msk.bf16.gmra.mxu0 %vm1682_vm12, %v1160_v60  ;;  %v7708_v50 = vpop.f32.mrf.mxu1 }
 0x196   :  { %2088 = vmatprep.mubr.bf16.mxu0 %v9441_v0 }
 0x197   :  { %v7614_v63 = vpop.f32.mrf.mxu0  ;;  %v7722_v60 = vpop.f32.mrf.mxu1 }
 0x199   :  { %5841 = vmatmul.mubr.msk.bf16.gmra.mxu1 %vm488_vm1, %v1178_v57  ;;  %v7628_v7 = vpop.f32.mrf.mxu0  ;;  %v1182_v57 = vpack.c.bf16 %v7524_v30, %v7534_v33  ;;  %v7732_v6 = vpop.f32.mrf.mxu1  ;;  %v6381_v30 = vld [vmem:[%s9434_s5 + $0x150] ss:$8 sps:$4 sm:$0xff]   ;;  %v6383_v33 = vld [vmem:[%s9434_s5 + $0x154] ss:$8 sps:$4 sm:$0xff]  }
 0x19a   :  { %1463 = vmatprep.mubr.bf16.mxu1 %v9441_v0  ;;  %3431 = vmatprep.subr.bf16.mxu0 %v6383_v33 }
 0x19b   :  { %v7640_v13 = vpop.f32.mrf.mxu0  ;;  %3432 = vmatpush1.bf16.msra.mxu0 %v6381_v30 }
 0x19d   :  { %v7643_v15 = vpop.f32.mrf.mxu0  ;;  %5893 = vmatmul.mubr.msk.bf16.gmra.mxu0 %vm1682_vm12, %v1161_v14 }
 0x19e   :  { %2098 = vmatprep.mubr.bf16.mxu0 %v9441_v0 }
 0x19f   :  { %v7650_v18 = vpop.f32.mrf.mxu0 }
 0x1a1   :  { %5842 = vmatmul.mubr.msk.bf16.gmra.mxu1 %vm488_vm1, %v1179_v11  ;;  %v7652_v19 = vpop.f32.mrf.mxu0  ;;  %v6386_v11 = vld [vmem:[%s9434_s5 + $0x84] ss:$8 sps:$4 sm:$0xff]  }
 0x1a2   :  { %1473 = vmatprep.mubr.bf16.mxu1 %v9441_v0  ;;  %2706 = vmatprep.subr.bf16.mxu1 %v6386_v11 }
 0x1a3   :  { %v7664_v26 = vpop.f32.mrf.mxu0  ;;  %2707 = vmatpush2.bf16.msra.mxu1 %v6384_v9 }
 0x1a5   :  { %v7667_v31 = vpop.f32.mrf.mxu0  ;;  %5894 = vmatmul.mubr.msk.bf16.gmra.mxu0 %vm1682_vm12, %v1162_v27  ;;  %v7758_v27 = vpop.f32.mrf.mxu1 }
 0x1a6   :  { %2108 = vmatprep.mubr.bf16.mxu0 %v9441_v0 }
 0x1a7   :  { %v7674_v32 = vpop.f32.mrf.mxu0  ;;  %v7767_v35 = vpop.f32.mrf.mxu1 }
 0x1a9   :  { %5843 = vmatmul.mubr.msk.bf16.gmra.mxu1 %vm488_vm1, %v1180_v24  ;;  %v7688_v36 = vpop.f32.mrf.mxu0  ;;  %v1183_v24 = vpack.c.bf16 %v7546_v37, %v7556_v41  ;;  %v1184_v41 = vpack.c.bf16 %v7564_v44, %v7578_v10  ;;  %v7775_v39 = vpop.f32.mrf.mxu1  ;;  %v6389_v44 = vld [vmem:[%s9434_s5 + $0x144] ss:$8 sps:$4 sm:$0xff]  }
 0x1aa   :  { %1483 = vmatprep.mubr.bf16.mxu1 %v9441_v0  ;;  %3433 = vmatprep.subr.bf16.mxu0 %v6389_v44  ;;  %v6390_v44 = vld [vmem:[%s9434_s5 + $0x130] ss:$8 sps:$4 sm:$0xff]  }
 0x1ab   :  { %v7700_v47 = vpop.f32.mrf.mxu0  ;;  %v7783_v55 = vpop.f32.mrf.mxu1 }
 0x1ad   :  { %v7703_v48 = vpop.f32.mrf.mxu0  ;;  %5895 = vmatmul.mubr.msk.bf16.gmra.mxu0 %vm1682_vm12, %v1163_v4  ;;  %v7797_v30 = vpop.f32.mrf.mxu1 }
 0x1ae   :  { %2118 = vmatprep.mubr.bf16.mxu0 %v9441_v0 }
 0x1af   :  { %v7710_v28 = vpop.f32.mrf.mxu0  ;;  %v7805_v11 = vpop.f32.mrf.mxu1 }
 0x1b1   :  { %5844 = vmatmul.mubr.msk.bf16.gmra.mxu1 %vm488_vm1, %v1181_v40  ;;  %v7712_v29 = vpop.f32.mrf.mxu0 }
 0x1b2   :  { %1493 = vmatprep.mubr.bf16.mxu1 %v9441_v0 }
 0x1b3   :  { %v7724_v2 = vpop.f32.mrf.mxu0 }
 0x1b5   :  { %v7727_v5 = vpop.f32.mrf.mxu0  ;;  %5896 = vmatmul.mubr.msk.bf16.gmra.mxu0 %vm1682_vm12, %v1164_v3  ;;  %v1185_v3 = vpack.c.bf16 %v7588_v52, %v7602_v58  ;;  %v1186_v52 = vpack.c.bf16 %v7612_v62, %v7638_v12  ;;  %v7813_v58 = vpop.f32.mrf.mxu1  ;;  %v6392_v62 = vld [vmem:[%s9434_s5 + $0x134] ss:$8 sps:$4 sm:$0xff]  }
 0x1b6   :  { %9449 = vst [vmem:[#allocation3_spill] sm:$0xff] %v7727_v5  ;;  %2128 = vmatprep.mubr.bf16.mxu0 %v9441_v0 }
 0x1b7   :  { %v7734_v8 = vpop.f32.mrf.mxu0 }
 0x1b9   :  { %5845 = vmatmul.mubr.msk.bf16.gmra.mxu1 %vm488_vm1, %v1182_v57  ;;  %v7748_v14 = vpop.f32.mrf.mxu0  ;;  %v6387_v57 = vld [vmem:[%s9434_s5 + $0x140] ss:$8 sps:$4 sm:$0xff]  }
 0x1ba   :  { %1503 = vmatprep.mubr.bf16.mxu1 %v9441_v0  ;;  %9450 = vst [vmem:[#allocation4_spill] sm:$0xff] %v7748_v14  ;;  %3434 = vmatpush1.bf16.msra.mxu0 %v6387_v57 }
 0x1bb   :  { %v7760_v22 = vpop.f32.mrf.mxu0  ;;  %3435 = vmatprep.subr.bf16.mxu0 %v6392_v62 }
 0x1bd   :  { %v7763_v34 = vpop.f32.mrf.mxu0  ;;  %5897 = vmatmul.mubr.msk.bf16.gmra.mxu0 %vm1682_vm12, %v1165_v23 }
 0x1be   :  { %9451 = vst [vmem:[#allocation5_spill] sm:$0xff] %v7763_v34  ;;  %3436 = vmatpush1.bf16.msra.mxu0 %v6390_v44  ;;  %v9489_v34 = vlaneseq }
 0x1bf   :  { %v7769_v38 = vpop.f32.mrf.mxu0 }
 0x1c0   :  { %9452 = vst [vmem:[#allocation6_spill] sm:$0xff] %v7769_v38 }
 0x1c1   :  { %5846 = vmatmul.mubr.msk.bf16.gmra.mxu1 %vm488_vm1, %v1183_v24  ;;  %v7771_v37 = vpop.f32.mrf.mxu0 }
 0x1c2   :  { %1513 = vmatprep.mubr.bf16.mxu1 %v9441_v0  ;;  %9453 = vst [vmem:[#allocation7_spill] sm:$0xff] %v7771_v37 }
 0x1c3   :  { %v7777_v40 = vpop.f32.mrf.mxu0 }
 0x1c4   :  { %9454 = vst [vmem:[#allocation8_spill] sm:$0xff] %v7777_v40 }
 0x1c5   :  { %v7780_v4 = vpop.f32.mrf.mxu0 }
 0x1c6   :  { %9455 = vst [vmem:[#allocation9_spill] sm:$0xff] %v7780_v4 }
 0x1c7   :  { %v7785_v56 = vpop.f32.mrf.mxu0 }
 0x1c8   :  { %9456 = vst [vmem:[#allocation10_spill] sm:$0xff] %v7785_v56 }
 0x1c9   :  { %5847 = vmatmul.mubr.msk.bf16.gmra.mxu1 %vm488_vm1, %v1184_v41  ;;  %v7793_v10 = vpop.f32.mrf.mxu0  ;;  %v7821_v41 = vpop.f32.mrf.mxu1 }
 0x1ca   :  { %1523 = vmatprep.mubr.bf16.mxu1 %v9441_v0  ;;  %9457 = vst [vmem:[#allocation11_spill] sm:$0xff] %v7793_v10 }
 0x1cb   :  { %v7799_v33 = vpop.f32.mrf.mxu0 }
 0x1cc   :  { %9458 = vst [vmem:[#allocation12_spill] sm:$0xff] %v7799_v33  ;;  %v8008_v33 = vshrl.u32 %v9489_v34, 7 }
 0x1cd   :  { %v7802_v9 = vpop.f32.mrf.mxu0 }
 0x1ce   :  { %9459 = vst [vmem:[#allocation13_spill] sm:$0xff] %v7802_v9  ;;  %9490 = vst [vmem:[#allocation42_spill] sm:$0xff] %v8008_v33  ;;  %v8016_v5 = vsub.s32 1, %v8008_v33 }
 0x1cf   :  { %v7807_v20 = vpop.f32.mrf.mxu0 }
 0x1d0   :  { %9460 = vst [vmem:[#allocation14_spill] sm:$0xff] %v7807_v20  ;;  %9492 = vst [vmem:[#allocation44_spill] sm:$0xff] %v8016_v5 }
 0x1d1   :  { %5848 = vmatmul.mubr.msk.bf16.gmra.mxu1 %vm488_vm1, %v1185_v3  ;;  %v7809_v21 = vpop.f32.mrf.mxu0  ;;  %v1187_v3 = vpack.c.bf16 %v7648_v16, %v7662_v25  ;;  %v1188_v16 = vpack.c.bf16 %v7672_v17, %v7698_v42  ;;  %v1189_v17 = vpack.c.bf16 %v7708_v50, %v7722_v60 }
 0x1d2   :  { %1533 = vmatprep.mubr.bf16.mxu1 %v9441_v0  ;;  %9461 = vst [vmem:[#allocation15_spill] sm:$0xff] %v7809_v21 }
 0x1d3   :  { %v7815_v24 = vpop.f32.mrf.mxu0 }
 0x1d4   :  { %9462 = vst [vmem:[#allocation16_spill] sm:$0xff] %v7815_v24 }
 0x1d5   :  { %v7818_v23 = vpop.f32.mrf.mxu0 }
 0x1d6   :  { %9463 = vst [vmem:[#allocation17_spill] sm:$0xff] %v7818_v23  ;;  %v9468_v23 = vmov 0  }
 0x1d7   :  { %v7823_v57 = vpop.f32.mrf.mxu0 }
 0x1d8   :  { %9464 = vst [vmem:[#allocation18_spill] sm:$0xff] %v7823_v57 }
 0x1d9   :  { %5849 = vmatmul.mubr.msk.bf16.gmra.mxu1 %vm488_vm1, %v1186_v52  ;;  %v7831_v12 = vpop.f32.mrf.mxu0  ;;  %v7835_v52 = vpop.f32.mrf.mxu1 }
 0x1da   :  { %1543 = vmatprep.mubr.bf16.mxu1 %v9441_v0  ;;  %9465 = vst [vmem:[#allocation19_spill] sm:$0xff] %v7831_v12 }
 0x1db   :  { %v7837_v1 = vpop.f32.mrf.mxu0  ;;  %v7843_v57 = vpop.f32.mrf.mxu1 }
 0x1dc   :  { %9466 = vst [vmem:[#allocation20_spill] sm:$0xff] %v7837_v1 }
 0x1dd   :  { %v7840_v0 = vpop.f32.mrf.mxu0  ;;  %v7851_v25 = vpop.f32.mrf.mxu1 }
 0x1de   :  { %9467 = vst [vmem:[#allocation21_spill] sm:$0xff] %v7840_v0  ;;  %v6395_v0 = vld [vmem:[%s9434_s5 + $0x124] ss:$8 sps:$4 sm:$0xff]  }
 0x1df   :  { %v7845_v9 = vpop.f32.mrf.mxu0  ;;  %v7857_v62 = vpop.f32.mrf.mxu1  ;;  %3437 = vmatprep.subr.bf16.mxu0 %v6395_v0 }
 0x1e0   :  { %9469 = vst [vmem:[#allocation22_spill] sm:$0xff] %v7845_v9 }
 0x1e1   :  { %5850 = vmatmul.mubr.msk.bf16.gmra.mxu1 %vm488_vm1, %v1187_v3  ;;  %v7847_v12 = vpop.f32.mrf.mxu0  ;;  %v6393_v3 = vld [vmem:[%s9434_s5 + $0x120] ss:$8 sps:$4 sm:$0xff]   ;;  %v7869_v42 = vpop.f32.mrf.mxu1 }
 0x1e2   :  { %1553 = vmatprep.mubr.bf16.mxu1 %v9468_v23  ;;  %9470 = vst [vmem:[#allocation23_spill] sm:$0xff] %v7847_v12  ;;  %3438 = vmatpush1.bf16.msra.mxu0 %v6393_v3  ;;  %v6396_v3 = vld [vmem:[%s9434_s5 + $0x110] ss:$8 sps:$4 sm:$0xff]  }
 0x1e3   :  { %v7854_v44 = vpop.f32.mrf.mxu0  ;;  %v7875_v9 = vpop.f32.mrf.mxu1 }
 0x1e4   :  { %9471 = vst [vmem:[#allocation24_spill] sm:$0xff] %v7854_v44 }
 0x1e5   :  { %v7865_v12 = vpop.f32.mrf.mxu0  ;;  %v7881_v0 = vpop.f32.mrf.mxu1 }
 0x1e6   :  { %9472 = vst [vmem:[#allocation25_spill] sm:$0xff] %v7865_v12  ;;  %v1190_v12 = vpack.c.bf16 %v7732_v6, %v7758_v27  ;;  %v1191_v6 = vpack.c.bf16 %v7767_v35, %v7775_v39 }
 0x1e7   :  { %v7887_v60 = vpop.f32.mrf.mxu1 }
 0x1e9   :  { %5851 = vmatmul.mubr.msk.bf16.gmra.mxu1 %vm488_vm1, %v1188_v16  ;;  %v7872_v16 = vpop.f32.mrf.mxu0  ;;  %v7899_v27 = vpop.f32.mrf.mxu1 }
 0x1ea   :  { %1563 = vmatprep.mubr.bf16.mxu1 %v9468_v23  ;;  %9473 = vst [vmem:[#allocation26_spill] sm:$0xff] %v7872_v16 }
 0x1eb   :  { %v7877_v44 = vpop.f32.mrf.mxu0  ;;  %v7905_v16 = vpop.f32.mrf.mxu1 }
 0x1ec   :  { %9474 = vst [vmem:[#allocation27_spill] sm:$0xff] %v7877_v44 }
 0x1ed   :  { %v7884_v50 = vpop.f32.mrf.mxu0 }
 0x1ee   :  { %9475 = vst [vmem:[#allocation28_spill] sm:$0xff] %v7884_v50 }
 0x1ef   :  { %v7895_v44 = vpop.f32.mrf.mxu0 }
 0x1f0   :  { %9476 = vst [vmem:[#allocation29_spill] sm:$0xff] %v7895_v44  ;;  %v1192_v44 = vpack.c.bf16 %v7783_v55, %v7797_v30  ;;  %v6401_v55 = vld [vmem:[%s9434_s5 + $0x104] ss:$8 sps:$4 sm:$0xff]  }
 0x1f1   :  { %5852 = vmatmul.mubr.msk.bf16.gmra.mxu1 %vm488_vm1, %v1189_v17  ;;  %v6398_v17 = vld [vmem:[%s9434_s5 + $0x114] ss:$8 sps:$4 sm:$0xff]  }
 0x1f2   :  { %1573 = vmatprep.mubr.bf16.mxu1 %v9468_v23  ;;  %3439 = vmatprep.subr.bf16.mxu0 %v6398_v17  ;;  %v7911_v17 = vpop.f32.mrf.mxu1 }
 0x1f3   :  { %3440 = vmatpush1.bf16.msra.mxu0 %v6396_v3  ;;  %v6399_v3 = vld [vmem:[%s9434_s5 + $0x100] ss:$8 sps:$4 sm:$0xff]  }
 0x1f4   :  { %3441 = vmatprep.subr.bf16.mxu0 %v6401_v55  ;;  %v1194_v55 = vpack.c.bf16 %v7821_v41, %v7835_v52 }
 0x1f7   :  { %3442 = vmatpush1.bf16.msra.mxu0 %v6399_v3 }
 0x1f9   :  { %5853 = vmatmul.mubr.msk.bf16.gmra.mxu1 %vm488_vm1, %v1190_v12  ;;  %v7902_v12 = vpop.f32.mrf.mxu0 }
 0x1fa   :  { %1583 = vmatprep.mubr.bf16.mxu1 %v9468_v23  ;;  %9477 = vst [vmem:[#allocation30_spill] sm:$0xff] %v7902_v12 }
 0x1fb   :  { %v7907_v50 = vpop.f32.mrf.mxu0 }
 0x1fc   :  { %9478 = vst [vmem:[#allocation31_spill] sm:$0xff] %v7907_v50 }
 0x1fd   :  { %v7916_v35 = vpop.f32.mrf.mxu0 }
 0x1fe   :  { %9479 = vst [vmem:[#allocation32_spill] sm:$0xff] %v7916_v35 }
 0x201   :  { %5854 = vmatmul.mubr.msk.bf16.gmra.mxu1 %vm488_vm1, %v1191_v6  ;;  %v7929_v6 = vpop.f32.mrf.mxu0 }
 0x202   :  { %1593 = vmatprep.mubr.bf16.mxu1 %v9468_v23  ;;  %9480 = vst [vmem:[#allocation33_spill] sm:$0xff] %v7929_v6  ;;  %v6402_v6 = vld [vmem:[%s9434_s5 + $0x1f0] ss:$8 sps:$4 sm:$0xff]  }
 0x203   :  { %v7936_v35 = vpop.f32.mrf.mxu0 }
 0x204   :  { %9481 = vst [vmem:[#allocation34_spill] sm:$0xff] %v7936_v35 }
 0x205   :  { %v7943_v4 = vpop.f32.mrf.mxu0 }
 0x206   :  { %9482 = vst [vmem:[#allocation35_spill] sm:$0xff] %v7943_v4  ;;  %v6404_v4 = vld [vmem:[%s9434_s5 + $0x1f4] ss:$8 sps:$4 sm:$0xff]  }
 0x207   :  { %v7950_v3 = vpop.f32.mrf.mxu0  ;;  %3443 = vmatprep.subr.bf16.mxu0 %v6404_v4  ;;  %v1196_v4 = vpack.c.bf16 %v7857_v62, %v7869_v42  ;;  %v6407_v62 = vld [vmem:[%s9434_s5 + $0x1e4] ss:$8 sps:$4 sm:$0xff]  }
 0x208   :  { %9483 = vst [vmem:[#allocation36_spill] sm:$0xff] %v7950_v3  ;;  %3444 = vmatpush2.bf16.msra.mxu0 %v6402_v6 }
 0x209   :  { %v7913_v1 = vpop.f32.mrf.mxu1  ;;  %5855 = vmatmul.mubr.msk.bf16.gmra.mxu1 %vm488_vm1, %v1192_v44  ;;  %v1193_v44 = vpack.c.bf16 %v7805_v11, %v7813_v58  ;;  %v7963_v52 = vpop.f32.mrf.mxu0  ;;  %3445 = vmatprep.subr.bf16.mxu0 %v6407_v62 }
 0x20a   :  { %1603 = vmatprep.mubr.bf16.mxu1 %v9468_v23  ;;  %9484 = vst [vmem:[#allocation37_spill] sm:$0xff] %v7963_v52 }
 0x20b   :  { %v7919_v39 = vpop.f32.mrf.mxu1  ;;  %v7972_v24 = vpop.f32.mrf.mxu0 }
 0x20c   :  { %9485 = vst [vmem:[#allocation38_spill] sm:$0xff] %v7972_v24  ;;  %v6405_v24 = vld [vmem:[%s9434_s5 + $0x1e0] ss:$8 sps:$4 sm:$0xff]  }
 0x20d   :  { %v7927_v30 = vpop.f32.mrf.mxu1  ;;  %v7979_v52 = vpop.f32.mrf.mxu0  ;;  %3446 = vmatpush2.bf16.msra.mxu0 %v6405_v24  ;;  %v2139_v24 = vld [vmem:[%s9435_s7] sm:$0x3] }
 0x20e   :  { %9486 = vst [vmem:[#allocation39_spill] sm:$0xff] %v7979_v52 }
 0x20f   :  { %v1361_v50 = vpop.f32.mrf.mxu1  ;;  %v7988_v6 = vpop.f32.mrf.mxu0 }
 0x210   :  { %9487 = vst [vmem:[#allocation40_spill] sm:$0xff] %v7988_v6 }
 0x211   :  { %v7933_v12 = vpop.f32.mrf.mxu1  ;;  %5856 = vmatmul.mubr.msk.bf16.gmra.mxu1 %vm488_vm1, %v1193_v44  ;;  %v8001_v52 = vpop.f32.mrf.mxu0 }
 0x212   :  { %1613 = vmatprep.mubr.bf16.mxu1 %v9468_v23  ;;  %9488 = vst [vmem:[#allocation41_spill] sm:$0xff] %v8001_v52  ;;  %v8032_v52 = vrot.slane %v2139_v24, %v8016_v5 }
 0x213   :  { %v7939_v21 = vpop.f32.mrf.mxu1  ;;  %v8013_v38 = vpop.f32.mrf.mxu0 }
 0x214   :  { %9491 = vst [vmem:[#allocation43_spill] sm:$0xff] %v8013_v38  ;;  %v1198_v38 = vpack.c.bf16 %v7887_v60, %v7899_v27  ;;  %v1825_v60 = vadd.f32 %v7568_v46, %v7927_v30 }
 0x215   :  { %v7941_v20 = vpop.f32.mrf.mxu1  ;;  %v8027_v34 = vpop.f32.mrf.mxu0 }
 0x216   :  { %9493 = vst [vmem:[#allocation45_spill] sm:$0xff] %v8027_v34 }
 0x217   :  { %v1371_v11 = vpop.f32.mrf.mxu1  ;;  %v8045_v34 = vpop.f32.mrf.mxu0 }
 0x218   :  { %9495 = vst [vmem:[#allocation47_spill] sm:$0xff] %v8045_v34 }
 0x219   :  { %v7947_v58 = vpop.f32.mrf.mxu1  ;;  %5857 = vmatmul.mubr.msk.bf16.gmra.mxu1 %vm488_vm1, %v1194_v55  ;;  %v1195_v55 = vpack.c.bf16 %v7843_v57, %v7851_v25  ;;  %v8067_v30 = vpop.f32.mrf.mxu0 }
 0x21a   :  { %1623 = vmatprep.mubr.bf16.mxu1 %v9468_v23 }
 0x21b   :  { %v7953_v44 = vpop.f32.mrf.mxu1 }
 0x21d   :  { %v7961_v41 = vpop.f32.mrf.mxu1 }
 0x21f   :  { %v7967_v35 = vpop.f32.mrf.mxu1 }
 0x221   :  { %v7969_v3 = vpop.f32.mrf.mxu1  ;;  %5858 = vmatmul.mubr.msk.bf16.gmra.mxu1 %vm488_vm1, %v1195_v55 }
 0x222   :  { %1633 = vmatprep.mubr.bf16.mxu1 %v9468_v23 }
 0x223   :  { %v7975_v10 = vpop.f32.mrf.mxu1 }
 0x225   :  { %v7977_v56 = vpop.f32.mrf.mxu1 }
 0x227   :  { %v7983_v57 = vpop.f32.mrf.mxu1 }
 0x229   :  { %v7985_v25 = vpop.f32.mrf.mxu1  ;;  %5859 = vmatmul.mubr.msk.bf16.gmra.mxu1 %vm488_vm1, %v1196_v4  ;;  %v1197_v4 = vpack.c.bf16 %v7875_v9, %v7881_v0  ;;  %v1827_v9 = vadd.f32 %v7580_v49, %v1361_v50  ;;  %v8040_v50 = vsub.s32 0, %v8008_v33  ;;  %v6408_v33 = vld [vmem:[%s9434_s5 + $0x1d0] ss:$8 sps:$4 sm:$0xff]  }
 0x22a   :  { %1643 = vmatprep.mubr.bf16.mxu1 %v9468_v23 }
 0x22b   :  { %v7991_v55 = vpop.f32.mrf.mxu1  ;;  %v2154_v49 = vadd.f32 %v8032_v52, %v1827_v9  ;;  %9494 = vst [vmem:[#allocation46_spill] sm:$0xff] %v8040_v50  ;;  %v1837_v9 = vadd.f32 %v7604_v59, %v1371_v11  ;;  %v8063_v5 = vrot.slane %v2139_v24, %v8040_v50  ;;  %v1833_v59 = vadd.f32 %v7590_v53, %v7939_v21 }
 0x22c   :  { %v1199_v11 = vpack.c.bf16 %v7905_v16, %v7911_v17  ;;  %v1835_v16 = vadd.f32 %v7592_v54, %v7941_v20 }
 0x22d   :  { %v7999_v42 = vpop.f32.mrf.mxu1  ;;  %v2153_v34 = vadd.f32 %v8063_v5, %v1825_v60  ;;  %v2156_v53 = vadd.f32 %v8032_v52, %v1833_v59  ;;  %v1847_v60 = vadd.f32 %v7640_v13, %v7967_v35 }
 0x22e   :  { %v2157_v54 = vadd.f32 %v8063_v5, %v1835_v16  ;;  %v6413_v16 = vld [vmem:[%s9434_s5 + $0x1c4] ss:$8 sps:$4 sm:$0xff]  }
 0x22f   :  { %v8005_v6 = vpop.f32.mrf.mxu1  ;;  %v2281_v21 = vmax.f32 %v2153_v34, 0.0  ;;  %v1843_v34 = vadd.f32 %v7614_v63, %v7953_v44  ;;  %v1845_v63 = vadd.f32 %v7628_v7, %v7961_v41 }
 0x231   :  { %v8010_v37 = vpop.f32.mrf.mxu1  ;;  %5860 = vmatmul.mubr.msk.bf16.gmra.mxu1 %vm488_vm1, %v1197_v4  ;;  %v1823_v4 = vadd.f32 %v7566_v45, %v7919_v39  ;;  %v2282_v39 = vmax.f32 %v2154_v49, 0.0 }
 0x232   :  { %1653 = vmatprep.mubr.bf16.mxu1 %v9468_v23 }
 0x233   :  { %v8019_v62 = vpop.f32.mrf.mxu1  ;;  %v2152_v45 = vadd.f32 %v8032_v52, %v1823_v4  ;;  %v1821_v4 = vadd.f32 %v7559_v43, %v7913_v1  ;;  %v2158_v1 = vadd.f32 %v8032_v52, %v1837_v9  ;;  %v1831_v9 = vadd.f32 %v7583_v51, %v7933_v12 }
 0x234   :  { %v2160_v12 = vadd.f32 %v8032_v52, %v1843_v34 }
 0x235   :  { %v8025_v0 = vpop.f32.mrf.mxu1  ;;  %v2280_v49 = vmax.f32 %v2152_v45, 0.0  ;;  %v2151_v24 = vadd.f32 %v8063_v5, %v1821_v4  ;;  %v8081_v45 = vpop.f32.mrf.mxu0  ;;  %v2155_v35 = vadd.f32 %v8063_v5, %v1831_v9  ;;  %v2161_v9 = vadd.f32 %v8063_v5, %v1845_v63 }
 0x236   :  { %v2288_v41 = vmax.f32 %v2160_v12, 0.0  ;;  %v1867_v12 = vadd.f32 %v7700_v47, %v8005_v6  ;;  %v1851_v63 = vadd.f32 %v7643_v15, %v7969_v3 }
 0x237   :  { %v8036_v40 = vpop.f32.mrf.mxu1  ;;  %v2408_v43 = vpack.c.bf16 %v2282_v39, %v2280_v49  ;;  %v2279_v39 = vmax.f32 %v2151_v24, 0.0  ;;  %v8094_v4 = vpop.f32.mrf.mxu0  ;;  %v2284_v49 = vmax.f32 %v2156_v53, 0.0  ;;  %v1857_v53 = vadd.f32 %v7664_v26, %v7983_v57 }
 0x238   :  { %v1853_v26 = vadd.f32 %v7650_v18, %v7975_v10  ;;  %v2289_v18 = vmax.f32 %v2161_v9, 0.0  ;;  %v1855_v10 = vadd.f32 %v7652_v19, %v7977_v56  ;;  %v2163_v6 = vadd.f32 %v8063_v5, %v1851_v63 }
 0x239   :  { %v8042_v14 = vpop.f32.mrf.mxu1  ;;  %5861 = vmatmul.mubr.msk.bf16.gmra.mxu1 %vm488_vm1, %v1198_v38  ;;  %v6410_v38 = vld [vmem:[%s9434_s5 + $0x1d4] ss:$8 sps:$4 sm:$0xff]   ;;  %v2407_v59 = vpack.c.bf16 %v2281_v21, %v2279_v39  ;;  %v8105_v51 = vpop.f32.mrf.mxu0  ;;  %v6411_v21 = vld [vmem:[%s9434_s5 + $0x1c0] ss:$8 sps:$4 sm:$0xff]   ;;  %v2166_v34 = vadd.f32 %v8032_v52, %v1857_v53  ;;  %v1877_v9 = vadd.f32 %v7724_v2, %v8036_v40  ;;  %v1873_v2 = vadd.f32 %v7710_v28, %v8019_v62 }
 0x23a   :  { %1663 = vmatprep.mubr.bf16.mxu1 %v9468_v23  ;;  %3447 = vmatprep.subr.bf16.mxu0 %v6410_v38  ;;  %v2165_v19 = vadd.f32 %v8063_v5, %v1855_v10  ;;  %v1875_v62 = vadd.f32 %v7712_v29, %v8025_v0 }
 0x23b   :  { %v8051_v27 = vpop.f32.mrf.mxu1  ;;  %3448 = vmatpush2.bf16.msra.mxu0 %v6408_v33  ;;  %v2286_v33 = vmax.f32 %v2158_v1, 0.0  ;;  %v8124_v7 = vpop.f32.mrf.mxu0 }
 0x23c   :  { %3449 = vmatprep.subr.bf16.mxu0 %v6413_v16  ;;  %v1863_v16 = vadd.f32 %v7674_v32, %v7991_v55  ;;  %v1865_v32 = vadd.f32 %v7688_v36, %v7999_v42  ;;  %v2173_v29 = vadd.f32 %v8063_v5, %v1875_v62 }
 0x23d   :  { %v8065_v46 = vpop.f32.mrf.mxu1  ;;  %v2410_v13 = vpack.c.bf16 %v2286_v33, %v2284_v49  ;;  %v2283_v33 = vmax.f32 %v2155_v35, 0.0  ;;  %v2294_v35 = vmax.f32 %v2166_v34, 0.0  ;;  %v6414_v34 = vld [vmem:[%s9434_s5 + $0x1b0] ss:$8 sps:$4 sm:$0xff]  }
 0x23e   :  { %v2168_v3 = vadd.f32 %v8032_v52, %v1863_v16  ;;  %v2169_v10 = vadd.f32 %v8063_v5, %v1865_v32  ;;  %v1883_v32 = vadd.f32 %v7734_v8, %v8051_v27 }
 0x23f   :  { %v8074_v23 = vpop.f32.mrf.mxu1  ;;  %3450 = vmatpush2.bf16.msra.mxu0 %v6411_v21 }
 0x240   :  { %v2296_v42 = vmax.f32 %v2168_v3, 0.0  ;;  %v2297_v28 = vmax.f32 %v2169_v10, 0.0  ;;  %v2176_v27 = vadd.f32 %v8032_v52, %v1883_v32 }
 0x241   :  { %v8078_v50 = vpop.f32.mrf.mxu1  ;;  %5862 = vmatmul.mubr.msk.bf16.gmra.mxu1 %vm488_vm1, %v1199_v11  ;;  %v2162_v11 = vadd.f32 %v8032_v52, %v1847_v60  ;;  %v1841_v60 = vadd.f32 %v7607_v61, %v7947_v58 }
 0x242   :  { %2708 = vmatprep.mubr.bf16.mxu1 %v2408_v43  ;;  %v2285_v43 = vmax.f32 %v2157_v54, 0.0  ;;  %v8135_v54 = vpop.f32.mrf.mxu0 }
 0x243   :  { %v8086_v17 = vpop.f32.mrf.mxu1  ;;  %v2290_v24 = vmax.f32 %v2162_v11, 0.0  ;;  %v2159_v61 = vadd.f32 %v8063_v5, %v1841_v60  ;;  %v2164_v11 = vadd.f32 %v8032_v52, %v1853_v26  ;;  %v2170_v60 = vadd.f32 %v8032_v52, %v1867_v12 }
 0x244   :  { %v2409_v57 = vpack.c.bf16 %v2285_v43, %v2283_v33  ;;  %v8148_v53 = vpop.f32.mrf.mxu0  ;;  %v2293_v26 = vmax.f32 %v2165_v19, 0.0  ;;  %v2174_v12 = vadd.f32 %v8032_v52, %v1877_v9  ;;  %v1887_v19 = vadd.f32 %v7760_v22, %v8074_v23 }
 0x245   :  { %v8092_v38 = vpop.f32.mrf.mxu1  ;;  %v2287_v43 = vmax.f32 %v2159_v61, 0.0  ;;  %v2292_v21 = vmax.f32 %v2164_v11, 0.0  ;;  %v2291_v61 = vmax.f32 %v2163_v6, 0.0  ;;  %v1861_v11 = vadd.f32 %v7667_v31, %v7985_v25 }
 0x246   :  { %v8159_v15 = vpop.f32.mrf.mxu0  ;;  %v2178_v9 = vadd.f32 %v8032_v52, %v1887_v19  ;;  %v9499_v19 = vld [vmem:[#allocation6_spill] sm:$0xff] }
 0x247   :  { %v8099_v20 = vpop.f32.mrf.mxu1  ;;  %v2411_v33 = vpack.c.bf16 %v2289_v18, %v2287_v43  ;;  %v2414_v47 = vpack.c.bf16 %v2294_v35, %v2292_v21  ;;  %v2413_v40 = vpack.c.bf16 %v2293_v26, %v2291_v61  ;;  %v2167_v31 = vadd.f32 %v8063_v5, %v1861_v11  ;;  %v9496_v61 = vld [vmem:[#allocation4_spill] sm:$0xff] }
 0x248   :  { %v8178_v36 = vpop.f32.mrf.mxu0  ;;  %v2172_v21 = vadd.f32 %v8032_v52, %v1873_v2  ;;  %v1885_v11 = vadd.f32 %v9496_v61, %v8065_v46  ;;  %v2306_v2 = vmax.f32 %v2178_v9, 0.0 }
 0x249   :  { %v8103_v1 = vpop.f32.mrf.mxu1  ;;  %2709 = vmatmul.mubr.bf16.vlgmr.msra.gmra.mxu1 %v2407_v59  ;;  %v2412_v59 = vpack.c.bf16 %v2290_v24, %v2288_v41 }
 0x24a   :  { %2718 = vmatprep.mubr.bf16.mxu1 %v2410_v13  ;;  %v8189_v63 = vpop.f32.mrf.mxu0  ;;  %v2300_v26 = vmax.f32 %v2172_v21, 0.0  ;;  %v9498_v21 = vld [vmem:[#allocation3_spill] sm:$0xff] }
 0x24b   :  { %v8110_v44 = vpop.f32.mrf.mxu1 }
 0x24c   :  { %v8202_v3 = vpop.f32.mrf.mxu0 }
 0x24d   :  { %v8122_v39 = vpop.f32.mrf.mxu1 }
 0x24e   :  { %v8219_v8 = vpop.f32.mrf.mxu0 }
 0x24f   :  { %v8129_v49 = vpop.f32.mrf.mxu1 }
 0x250   :  { %v8238_v62 = vpop.f32.mrf.mxu0 }
 0x251   :  { %v8133_v58 = vpop.f32.mrf.mxu1  ;;  %2719 = vmatmul.mubr.bf16.gmra.mxu1 %v2409_v57  ;;  %v2298_v57 = vmax.f32 %v2170_v60, 0.0  ;;  %v2295_v60 = vmax.f32 %v2167_v31, 0.0 }
 0x252   :  { %2728 = vmatprep.mubr.bf16.mxu1 %v2412_v59  ;;  %v6416_v59 = vld [vmem:[%s9434_s5 + $0x1b4] ss:$8 sps:$4 sm:$0xff]   ;;  %v8249_v9 = vpop.f32.mrf.mxu0 }
 0x253   :  { %v8140_v13 = vpop.f32.mrf.mxu1  ;;  %3451 = vmatprep.subr.bf16.mxu0 %v6416_v59  ;;  %v2416_v43 = vpack.c.bf16 %v2298_v57, %v2296_v42  ;;  %v2415_v57 = vpack.c.bf16 %v2297_v28, %v2295_v60  ;;  %v2301_v59 = vmax.f32 %v2173_v29, 0.0  ;;  %v1881_v28 = vadd.f32 %v9498_v21, %v8042_v14 }
 0x254   :  { %3452 = vmatpush2.bf16.msra.mxu0 %v6414_v34 }
 0x255   :  { %v8146_v24 = vpop.f32.mrf.mxu1  ;;  %v2175_v14 = vadd.f32 %v8063_v5, %v1881_v28 }
 0x257   :  { %v8153_v56 = vpop.f32.mrf.mxu1 }
 0x259   :  { %v8157_v41 = vpop.f32.mrf.mxu1  ;;  %2729 = vmatmul.mubr.bf16.gmra.mxu1 %v2411_v33  ;;  %v2302_v33 = vmax.f32 %v2174_v12, 0.0  ;;  %v6420_v12 = vld [vmem:[%s9434_s5 + $0x1a0] ss:$8 sps:$4 sm:$0xff]  }
 0x25a   :  { %2738 = vmatprep.mubr.bf16.mxu1 %v2414_v47  ;;  %v1871_v47 = vadd.f32 %v7703_v48, %v8010_v37  ;;  %v6417_v48 = vld [vmem:[%s9434_s5 + $0x270] ss:$8 sps:$4 sm:$0xff]   ;;  %v6419_v37 = vld [vmem:[%s9434_s5 + $0x274] ss:$8 sps:$4 sm:$0xff]  }
 0x25b   :  { %v8164_v55 = vpop.f32.mrf.mxu1  ;;  %v2418_v22 = vpack.c.bf16 %v2302_v33, %v2300_v26  ;;  %4178 = vmatprep.subr.bf16.mxu1 %v6419_v37  ;;  %v2304_v33 = vmax.f32 %v2176_v27, 0.0 }
 0x25c   :  { %v2171_v23 = vadd.f32 %v8063_v5, %v1871_v47  ;;  %4179 = vmatpush1.bf16.msra.mxu1 %v6417_v48  ;;  %v2177_v47 = vadd.f32 %v8063_v5, %v1885_v11  ;;  %v9500_v48 = vld [vmem:[#allocation7_spill] sm:$0xff]  ;;  %v2303_v11 = vmax.f32 %v2175_v14, 0.0 }
 0x25d   :  { %v8176_v18 = vpop.f32.mrf.mxu1  ;;  %v1895_v37 = vadd.f32 %v9500_v48, %v8092_v38  ;;  %v9504_v14 = vld [vmem:[#allocation11_spill] sm:$0xff] }
 0x25e   :  { %v2299_v31 = vmax.f32 %v2171_v23, 0.0 }
 0x25f   :  { %v8183_v35 = vpop.f32.mrf.mxu1  ;;  %v2181_v38 = vadd.f32 %v8063_v5, %v1895_v37  ;;  %v9505_v37 = vld [vmem:[#allocation16_spill] sm:$0xff] }
 0x260   :  { %v2417_v60 = vpack.c.bf16 %v2301_v59, %v2299_v31  ;;  %v9501_v59 = vld [vmem:[#allocation12_spill] sm:$0xff]  ;;  %v9503_v31 = vld [vmem:[#allocation10_spill] sm:$0xff] }
 0x261   :  { %v8187_v25 = vpop.f32.mrf.mxu1  ;;  %2739 = vmatmul.mubr.bf16.gmra.mxu1 %v2413_v40  ;;  %v9497_v40 = vld [vmem:[#allocation8_spill] sm:$0xff]  ;;  %v1907_v61 = vadd.f32 %v9501_v59, %v8129_v49  ;;  %v1903_v21 = vadd.f32 %v9503_v31, %v8110_v44 }
 0x262   :  { %2748 = vmatprep.mubr.bf16.mxu1 %v2416_v43  ;;  %v1897_v10 = vadd.f32 %v9497_v40, %v8099_v20  ;;  %v6422_v43 = vld [vmem:[%s9434_s5 + $0x1a4] ss:$8 sps:$4 sm:$0xff]   ;;  %v1893_v20 = vadd.f32 %v9499_v19, %v8086_v17  ;;  %v2305_v17 = vmax.f32 %v2177_v47, 0.0  ;;  %v6426_v59 = vld [vmem:[%s9434_s5 + $0x190] ss:$8 sps:$4 sm:$0xff]  }
 0x263   :  { %v8194_v16 = vpop.f32.mrf.mxu1  ;;  %3453 = vmatprep.subr.bf16.mxu0 %v6422_v43  ;;  %v2186_v19 = vadd.f32 %v8032_v52, %v1907_v61  ;;  %v6428_v61 = vld [vmem:[%s9434_s5 + $0x194] ss:$8 sps:$4 sm:$0xff]  }
 0x264   :  { %3454 = vmatpush2.bf16.msra.mxu0 %v6420_v12  ;;  %v2182_v32 = vadd.f32 %v8032_v52, %v1897_v10  ;;  %v8262_v12 = vpop.f32.mrf.mxu0  ;;  %v2419_v28 = vpack.c.bf16 %v2305_v17, %v2303_v11 }
 0x265   :  { %v8200_v6 = vpop.f32.mrf.mxu1  ;;  %v2314_v48 = vmax.f32 %v2186_v19, 0.0  ;;  %3455 = vmatprep.subr.bf16.mxu0 %v6428_v61  ;;  %v9511_v61 = vld [vmem:[#allocation13_spill] sm:$0xff] }
 0x266   :  { %v2310_v27 = vmax.f32 %v2182_v32, 0.0  ;;  %v8279_v44 = vpop.f32.mrf.mxu0  ;;  %v2184_v32 = vadd.f32 %v8032_v52, %v1903_v21  ;;  %v9508_v21 = vld [vmem:[#allocation14_spill] sm:$0xff] }
 0x267   :  { %v8207_v0 = vpop.f32.mrf.mxu1 }
 0x268   :  { %v2312_v31 = vmax.f32 %v2184_v32, 0.0  ;;  %3456 = vmatpush2.bf16.msra.mxu0 %v6426_v59 }
 0x269   :  { %v8217_v34 = vpop.f32.mrf.mxu1  ;;  %2749 = vmatmul.mubr.bf16.gmra.mxu1 %v2415_v57  ;;  %v2420_v57 = vpack.c.bf16 %v2306_v2, %v2304_v33  ;;  %v9502_v2 = vld [vmem:[#allocation5_spill] sm:$0xff] }
 0x26a   :  { %2758 = vmatprep.mubr.bf16.mxu1 %v2418_v22  ;;  %v2180_v22 = vadd.f32 %v8032_v52, %v1893_v20  ;;  %v1891_v40 = vadd.f32 %v9502_v2, %v8078_v50  ;;  %v6423_v50 = vld [vmem:[%s9434_s5 + $0x260] ss:$8 sps:$4 sm:$0xff]   ;;  %v6425_v20 = vld [vmem:[%s9434_s5 + $0x264] ss:$8 sps:$4 sm:$0xff]   ;;  %v9506_v2 = vld [vmem:[#allocation9_spill] sm:$0xff] }
 0x26b   :  { %v8224_v42 = vpop.f32.mrf.mxu1  ;;  %4180 = vmatprep.subr.bf16.mxu1 %v6425_v20 }
 0x26c   :  { %v2308_v43 = vmax.f32 %v2180_v22, 0.0  ;;  %v1905_v22 = vadd.f32 %v9504_v14, %v8122_v39  ;;  %4181 = vmatpush1.bf16.msra.mxu1 %v6423_v50  ;;  %v2424_v50 = vpack.c.bf16 %v2314_v48, %v2312_v31 }
 0x26d   :  { %v8236_v46 = vpop.f32.mrf.mxu1 }
 0x26e   :  { %v2422_v49 = vpack.c.bf16 %v2310_v27, %v2308_v43  ;;  %v1917_v27 = vadd.f32 %v9505_v37, %v8153_v56  ;;  %v8298_v43 = vpop.f32.mrf.mxu0  ;;  %v1913_v56 = vadd.f32 %v9508_v21, %v8140_v13  ;;  %v9512_v21 = vld [vmem:[#allocation18_spill] sm:$0xff] }
 0x26f   :  { %v8243_v26 = vpop.f32.mrf.mxu1  ;;  %9507 = vst [vmem:[#allocation4_spill] sm:$0xff] %v8298_v43  ;;  %v9518_v43 = vmov 0  }
 0x270   :  { %v2188_v32 = vadd.f32 %v8032_v52, %v1913_v56  ;;  %v1923_v56 = vadd.f32 %v9512_v21, %v8164_v55 }
 0x271   :  { %v8247_v29 = vpop.f32.mrf.mxu1  ;;  %2759 = vmatmul.mubr.bf16.gmra.mxu1 %v2417_v60  ;;  %v2179_v60 = vadd.f32 %v8063_v5, %v1891_v40  ;;  %v1901_v40 = vadd.f32 %v9506_v2, %v8103_v1 }
 0x272   :  { %2768 = vmatprep.mubr.bf16.mxu1 %v2420_v57  ;;  %v2309_v57 = vmax.f32 %v2181_v38, 0.0  ;;  %v2185_v38 = vadd.f32 %v8063_v5, %v1905_v22  ;;  %v2316_v31 = vmax.f32 %v2188_v32, 0.0 }
 0x273   :  { %v8254_v23 = vpop.f32.mrf.mxu1  ;;  %v2307_v11 = vmax.f32 %v2179_v60, 0.0  ;;  %v2183_v1 = vadd.f32 %v8063_v5, %v1901_v40  ;;  %v8309_v60 = vpop.f32.mrf.mxu0 }
 0x274   :  { %v2313_v13 = vmax.f32 %v2185_v38, 0.0 }
 0x275   :  { %v8260_v10 = vpop.f32.mrf.mxu1  ;;  %v2311_v59 = vmax.f32 %v2183_v1, 0.0  ;;  %v8322_v40 = vpop.f32.mrf.mxu0 }
 0x277   :  { %v8267_v33 = vpop.f32.mrf.mxu1  ;;  %v8339_v55 = vpop.f32.mrf.mxu0 }
 0x279   :  { %v8277_v47 = vpop.f32.mrf.mxu1  ;;  %2769 = vmatmul.mubr.bf16.gmra.mxu1 %v2419_v28  ;;  %v2421_v28 = vpack.c.bf16 %v2309_v57, %v2307_v11  ;;  %v9509_v57 = vld [vmem:[#allocation15_spill] sm:$0xff]  ;;  %v1911_v11 = vadd.f32 %v9511_v61, %v8133_v58  ;;  %v6429_v58 = vld [vmem:[%s9434_s5 + $0x250] ss:$8 sps:$4 sm:$0xff]  }
 0x27a   :  { %2778 = vmatprep.mubr.bf16.mxu1 %v2422_v49  ;;  %v2190_v49 = vadd.f32 %v8032_v52, %v1917_v27  ;;  %v1915_v14 = vadd.f32 %v9509_v57, %v8146_v24  ;;  %v9510_v27 = vld [vmem:[#allocation20_spill] sm:$0xff] }
 0x27b   :  { %v8284_v17 = vpop.f32.mrf.mxu1  ;;  %v1927_v48 = vadd.f32 %v9510_v27, %v8183_v35  ;;  %v2187_v1 = vadd.f32 %v8063_v5, %v1911_v11  ;;  %v6432_v11 = vld [vmem:[%s9434_s5 + $0x180] ss:$8 sps:$4 sm:$0xff]  }
 0x27c   :  { %v2318_v37 = vmax.f32 %v2190_v49, 0.0  ;;  %v2189_v24 = vadd.f32 %v8063_v5, %v1915_v14  ;;  %v9513_v14 = vld [vmem:[#allocation19_spill] sm:$0xff] }
 0x27d   :  { %v8296_v39 = vpop.f32.mrf.mxu1  ;;  %v2194_v49 = vadd.f32 %v8032_v52, %v1927_v48  ;;  %v2315_v21 = vmax.f32 %v2187_v1, 0.0 }
 0x27e   :  { %v2426_v35 = vpack.c.bf16 %v2318_v37, %v2316_v31  ;;  %v2317_v57 = vmax.f32 %v2189_v24, 0.0  ;;  %v1925_v37 = vadd.f32 %v9513_v14, %v8176_v18  ;;  %v6434_v31 = vld [vmem:[%s9434_s5 + $0x184] ss:$8 sps:$4 sm:$0xff]   ;;  %v8358_v24 = vpop.f32.mrf.mxu0 }
 0x27f   :  { %v8303_v19 = vpop.f32.mrf.mxu1  ;;  %v2322_v48 = vmax.f32 %v2194_v49, 0.0  ;;  %9516 = vst [vmem:[#allocation8_spill] sm:$0xff] %v8358_v24  ;;  %3457 = vmatprep.subr.bf16.mxu0 %v6434_v31 }
 0x280   :  { %3458 = vmatpush2.bf16.msra.mxu0 %v6432_v11 }
 0x281   :  { %v8307_v20 = vpop.f32.mrf.mxu1  ;;  %2779 = vmatmul.mubr.bf16.gmra.mxu1 %v2421_v28  ;;  %v2423_v28 = vpack.c.bf16 %v2313_v13, %v2311_v59  ;;  %v2192_v13 = vadd.f32 %v8032_v52, %v1923_v56  ;;  %v9514_v59 = vld [vmem:[#allocation24_spill] sm:$0xff]  ;;  %v9515_v56 = vld [vmem:[#allocation17_spill] sm:$0xff]  ;;  %4858 = vmatprep.subr.bf16.mxu0 %v9518_v43 }
 0x282   :  { %2788 = vmatprep.mubr.bf16.mxu1 %v2424_v50  ;;  %v6431_v50 = vld [vmem:[%s9434_s5 + $0x254] ss:$8 sps:$4 sm:$0xff]   ;;  %v1937_v61 = vadd.f32 %v9514_v59, %v8207_v0 }
 0x283   :  { %v8314_v22 = vpop.f32.mrf.mxu1  ;;  %4182 = vmatprep.subr.bf16.mxu1 %v6431_v50  ;;  %v2320_v49 = vmax.f32 %v2192_v13, 0.0  ;;  %v2193_v50 = vadd.f32 %v8063_v5, %v1925_v37  ;;  %v8370_v13 = vpop.f32.mrf.mxu0  ;;  %v9520_v37 = vld [vmem:[#allocation23_spill] sm:$0xff] }
 0x284   :  { %4183 = vmatpush1.bf16.msra.mxu1 %v6429_v58  ;;  %v2425_v58 = vpack.c.bf16 %v2317_v57, %v2315_v21  ;;  %v2198_v1 = vadd.f32 %v8032_v52, %v1937_v61  ;;  %9519 = vst [vmem:[#allocation3_spill] sm:$0xff] %v8370_v13  ;;  %v1935_v31 = vadd.f32 %v9520_v37, %v8200_v6  ;;  %v6435_v6 = vld [vmem:[%s9434_s5 + $0x240] ss:$8 sps:$4 sm:$0xff]  }
 0x285   :  { %v8320_v2 = vpop.f32.mrf.mxu1  ;;  %v2428_v59 = vpack.c.bf16 %v2322_v48, %v2320_v49  ;;  %v2321_v57 = vmax.f32 %v2193_v50, 0.0  ;;  %v9521_v48 = vld [vmem:[#allocation28_spill] sm:$0xff]  ;;  %v8383_v43 = vpop.f32.mrf.mxu0  ;;  %v9524_v50 = vld [vmem:[#allocation26_spill] sm:$0xff] }
 0x286   :  { %v2326_v61 = vmax.f32 %v2198_v1, 0.0  ;;  %v1947_v21 = vadd.f32 %v9521_v48, %v8243_v26  ;;  %9523 = vst [vmem:[#allocation6_spill] sm:$0xff] %v8383_v43  ;;  %v6437_v26 = vld [vmem:[%s9434_s5 + $0x244] ss:$8 sps:$4 sm:$0xff]  }
 0x287   :  { %v8327_v38 = vpop.f32.mrf.mxu1  ;;  %4184 = vmatprep.subr.bf16.mxu1 %v6437_v26  ;;  %v9527_v26 = vld [vmem:[#allocation25_spill] sm:$0xff] }
 0x288   :  { %v2202_v37 = vadd.f32 %v8032_v52, %v1947_v21  ;;  %4185 = vmatpush1.bf16.msra.mxu1 %v6435_v6  ;;  %v9529_v6 = vld [vmem:[#allocation30_spill] sm:$0xff] }
 0x289   :  { %v8337_v32 = vpop.f32.mrf.mxu1  ;;  %2789 = vmatmul.mubr.bf16.gmra.mxu1 %v2423_v28  ;;  %v1921_v28 = vadd.f32 %v9515_v56, %v8157_v41 }
 0x28a   :  { %2798 = vmatprep.mubr.bf16.mxu1 %v2426_v35  ;;  %v9517_v35 = vld [vmem:[#allocation22_spill] sm:$0xff]  ;;  %v2330_v21 = vmax.f32 %v2202_v37, 0.0 }
 0x28b   :  { %v8344_v27 = vpop.f32.mrf.mxu1  ;;  %v1933_v0 = vadd.f32 %v9517_v35, %v8194_v16  ;;  %v2191_v41 = vadd.f32 %v8063_v5, %v1921_v28  ;;  %v9522_v28 = vld [vmem:[#allocation21_spill] sm:$0xff] }
 0x28c   :  { %v1931_v35 = vadd.f32 %v9522_v28, %v8187_v25  ;;  %v8400_v28 = vpop.f32.mrf.mxu0 }
 0x28d   :  { %v8356_v18 = vpop.f32.mrf.mxu1  ;;  %v2196_v16 = vadd.f32 %v8032_v52, %v1933_v0  ;;  %v2319_v49 = vmax.f32 %v2191_v41, 0.0  ;;  %v2197_v41 = vadd.f32 %v8063_v5, %v1935_v31  ;;  %v9525_v31 = vld [vmem:[#allocation27_spill] sm:$0xff] }
 0x28e   :  { %v8413_v13 = vpop.f32.mrf.mxu0 }
 0x28f   :  { %v8363_v14 = vpop.f32.mrf.mxu1  ;;  %v2324_v0 = vmax.f32 %v2196_v16, 0.0  ;;  %v2427_v1 = vpack.c.bf16 %v2321_v57, %v2319_v49  ;;  %v2195_v16 = vadd.f32 %v8063_v5, %v1931_v35  ;;  %v2325_v57 = vmax.f32 %v2197_v41, 0.0  ;;  %9528 = vst [vmem:[#allocation7_spill] sm:$0xff] %v8413_v13 }
 0x290   :  { %v1945_v49 = vadd.f32 %v9525_v31, %v8236_v46  ;;  %v1953_v41 = vadd.f32 %v9529_v6, %v8254_v23  ;;  %v9531_v23 = vld [vmem:[#allocation31_spill] sm:$0xff] }
 0x291   :  { %v8368_v56 = vpop.f32.mrf.mxu1  ;;  %2799 = vmatmul.mubr.bf16.gmra.mxu1 %v2425_v58  ;;  %v2430_v48 = vpack.c.bf16 %v2326_v61, %v2324_v0  ;;  %v9526_v61 = vld [vmem:[#allocation32_spill] sm:$0xff]  ;;  %v2323_v35 = vmax.f32 %v2195_v16, 0.0 }
 0x292   :  { %2808 = vmatprep.mubr.bf16.mxu1 %v2428_v59  ;;  %v1943_v59 = vadd.f32 %v9524_v50, %v8224_v42  ;;  %v1957_v0 = vadd.f32 %v9526_v61, %v8267_v33  ;;  %v2201_v46 = vadd.f32 %v8063_v5, %v1945_v49 }
 0x293   :  { %v8375_v11 = vpop.f32.mrf.mxu1 }
 0x294   :  { %v2200_v50 = vadd.f32 %v8032_v52, %v1943_v59  ;;  %v2206_v37 = vadd.f32 %v8032_v52, %v1957_v0  ;;  %v9532_v0 = vld [vmem:[#allocation36_spill] sm:$0xff] }
 0x295   :  { %v8381_v58 = vpop.f32.mrf.mxu1 }
 0x296   :  { %v2328_v59 = vmax.f32 %v2200_v50, 0.0  ;;  %v2204_v50 = vadd.f32 %v8032_v52, %v1953_v41 }
 0x297   :  { %v8394_v25 = vpop.f32.mrf.mxu1 }
 0x298   :  { %v2432_v33 = vpack.c.bf16 %v2330_v21, %v2328_v59  ;;  %v1967_v21 = vadd.f32 %v9532_v0, %v8303_v19  ;;  %v2332_v41 = vmax.f32 %v2204_v50, 0.0  ;;  %v6440_v19 = vld [vmem:[%s9434_s5 + $0x234] ss:$8 sps:$4 sm:$0xff]  }
 0x299   :  { %v8398_v42 = vpop.f32.mrf.mxu1  ;;  %2809 = vmatmul.mubr.bf16.gmra.mxu1 %v2427_v1  ;;  %v1941_v1 = vadd.f32 %v9527_v26, %v8217_v34  ;;  %v8424_v34 = vpop.f32.mrf.mxu0  ;;  %v2329_v26 = vmax.f32 %v2201_v46, 0.0  ;;  %v9535_v46 = vld [vmem:[#allocation34_spill] sm:$0xff]  ;;  %4186 = vmatprep.subr.bf16.mxu1 %v6440_v19  ;;  %v9539_v19 = vld [vmem:[#allocation33_spill] sm:$0xff] }
 0x29a   :  { %2818 = vmatprep.mubr.bf16.mxu1 %v2430_v48  ;;  %v2429_v48 = vpack.c.bf16 %v2325_v57, %v2323_v35  ;;  %9530 = vst [vmem:[#allocation12_spill] sm:$0xff] %v8424_v34  ;;  %v1955_v57 = vadd.f32 %v9531_v23, %v8260_v10  ;;  %v2334_v35 = vmax.f32 %v2206_v37, 0.0  ;;  %v6438_v10 = vld [vmem:[%s9434_s5 + $0x230] ss:$8 sps:$4 sm:$0xff]   ;;  %v2210_v23 = vadd.f32 %v8032_v52, %v1967_v21 }
 0x29b   :  { %v8405_v24 = vpop.f32.mrf.mxu1  ;;  %v2199_v16 = vadd.f32 %v8063_v5, %v1941_v1  ;;  %v9533_v1 = vld [vmem:[#allocation29_spill] sm:$0xff]  ;;  %v8437_v13 = vpop.f32.mrf.mxu0  ;;  %4187 = vmatpush1.bf16.msra.mxu1 %v6438_v10  ;;  %v9541_v10 = vld [vmem:[#allocation38_spill] sm:$0xff] }
 0x29c   :  { %v1951_v6 = vadd.f32 %v9533_v1, %v8247_v29  ;;  %9534 = vst [vmem:[#allocation5_spill] sm:$0xff] %v8437_v13  ;;  %v2434_v0 = vpack.c.bf16 %v2334_v35, %v2332_v41  ;;  %v2338_v21 = vmax.f32 %v2210_v23, 0.0  ;;  %v9538_v35 = vld [vmem:[#allocation40_spill] sm:$0xff] }
 0x29d   :  { %v8411_v43 = vpop.f32.mrf.mxu1  ;;  %v2327_v59 = vmax.f32 %v2199_v16, 0.0  ;;  %v2205_v16 = vadd.f32 %v8063_v5, %v1955_v57  ;;  %v8454_v1 = vpop.f32.mrf.mxu0  ;;  %v9537_v57 = vld [vmem:[#allocation35_spill] sm:$0xff]  ;;  %v1977_v41 = vadd.f32 %v9538_v35, %v8327_v38 }
 0x29e   :  { %v2203_v50 = vadd.f32 %v8063_v5, %v1951_v6  ;;  %9536 = vst [vmem:[#allocation10_spill] sm:$0xff] %v8454_v1 }
 0x29f   :  { %v8418_v31 = vpop.f32.mrf.mxu1  ;;  %v2431_v37 = vpack.c.bf16 %v2329_v26, %v2327_v59  ;;  %v2333_v26 = vmax.f32 %v2205_v16, 0.0  ;;  %v1965_v59 = vadd.f32 %v9537_v57, %v8296_v39  ;;  %v8467_v1 = vpop.f32.mrf.mxu0  ;;  %v1973_v16 = vadd.f32 %v9541_v10, %v8314_v22  ;;  %v9543_v22 = vld [vmem:[#allocation39_spill] sm:$0xff] }
 0x2a0   :  { %v2331_v6 = vmax.f32 %v2203_v50, 0.0  ;;  %9540 = vst [vmem:[#allocation11_spill] sm:$0xff] %v8467_v1  ;;  %v2214_v23 = vadd.f32 %v8032_v52, %v1977_v41  ;;  %v9544_v41 = vld [vmem:[#allocation47_spill] sm:$0xff] }
 0x2a1   :  { %v8422_v61 = vpop.f32.mrf.mxu1  ;;  %2819 = vmatmul.mubr.bf16.gmra.mxu1 %v2429_v48  ;;  %v2209_v39 = vadd.f32 %v8063_v5, %v1965_v59 }
 0x2a2   :  { %2828 = vmatprep.mubr.bf16.mxu1 %v2432_v33  ;;  %v1963_v33 = vadd.f32 %v9535_v46, %v8284_v17 }
 0x2a3   :  { %v8429_v49 = vpop.f32.mrf.mxu1 }
 0x2a4   :  { %v2208_v46 = vadd.f32 %v8032_v52, %v1963_v33 }
 0x2a5   :  { %v8435_v48 = vpop.f32.mrf.mxu1 }
 0x2a6   :  { %v2336_v33 = vmax.f32 %v2208_v46, 0.0  ;;  %v2212_v46 = vadd.f32 %v8032_v52, %v1973_v16 }
 0x2a7   :  { %v8448_v29 = vpop.f32.mrf.mxu1 }
 0x2a8   :  { %v2436_v38 = vpack.c.bf16 %v2338_v21, %v2336_v33  ;;  %v1987_v21 = vadd.f32 %v9544_v41, %v8363_v14  ;;  %v2340_v16 = vmax.f32 %v2212_v46, 0.0  ;;  %v6443_v14 = vld [vmem:[%s9434_s5 + $0x224] ss:$8 sps:$4 sm:$0xff]  }
 0x2a9   :  { %v8452_v17 = vpop.f32.mrf.mxu1  ;;  %2829 = vmatmul.mubr.bf16.gmra.mxu1 %v2431_v37  ;;  %v1961_v37 = vadd.f32 %v9539_v19, %v8277_v47  ;;  %v8478_v47 = vpop.f32.mrf.mxu0  ;;  %v2337_v19 = vmax.f32 %v2209_v39, 0.0  ;;  %v9547_v39 = vld [vmem:[#allocation43_spill] sm:$0xff]  ;;  %4188 = vmatprep.subr.bf16.mxu1 %v6443_v14 }
 0x2aa   :  { %2838 = vmatprep.mubr.bf16.mxu1 %v2434_v0  ;;  %v2433_v0 = vpack.c.bf16 %v2333_v26, %v2331_v6  ;;  %9542 = vst [vmem:[#allocation16_spill] sm:$0xff] %v8478_v47  ;;  %v1975_v26 = vadd.f32 %v9543_v22, %v8320_v2  ;;  %v2342_v6 = vmax.f32 %v2214_v23, 0.0  ;;  %v6441_v2 = vld [vmem:[%s9434_s5 + $0x220] ss:$8 sps:$4 sm:$0xff]   ;;  %v2218_v22 = vadd.f32 %v8032_v52, %v1987_v21 }
 0x2ab   :  { %v8459_v13 = vpop.f32.mrf.mxu1  ;;  %v2207_v50 = vadd.f32 %v8063_v5, %v1961_v37  ;;  %v9545_v37 = vld [vmem:[#allocation37_spill] sm:$0xff]  ;;  %v8491_v1 = vpop.f32.mrf.mxu0  ;;  %4189 = vmatpush1.bf16.msra.mxu1 %v6441_v2  ;;  %v1993_v2 = vadd.f32 %v8081_v45, %v8375_v11  ;;  %v1995_v45 = vadd.f32 %v8094_v4, %v8381_v58 }
 0x2ac   :  { %v1971_v10 = vadd.f32 %v9545_v37, %v8307_v20  ;;  %9546 = vst [vmem:[#allocation9_spill] sm:$0xff] %v8491_v1  ;;  %v2438_v41 = vpack.c.bf16 %v2342_v6, %v2340_v16  ;;  %v2346_v21 = vmax.f32 %v2218_v22, 0.0  ;;  %v1997_v6 = vadd.f32 %v8105_v51, %v8394_v25  ;;  %v9549_v16 = vld [vmem:[#allocation41_spill] sm:$0xff] }
 0x2ad   :  { %v8465_v34 = vpop.f32.mrf.mxu1  ;;  %v2335_v33 = vmax.f32 %v2207_v50, 0.0  ;;  %v2213_v50 = vadd.f32 %v8063_v5, %v1975_v26  ;;  %v8508_v37 = vpop.f32.mrf.mxu0  ;;  %v9548_v26 = vld [vmem:[#allocation45_spill] sm:$0xff]  ;;  %v1981_v14 = vadd.f32 %v9549_v16, %v8337_v32 }
 0x2ae   :  { %v2211_v46 = vadd.f32 %v8063_v5, %v1971_v10  ;;  %v2222_v22 = vadd.f32 %v8032_v52, %v1997_v6  ;;  %v1991_v6 = vadd.f32 %v8067_v30, %v8368_v56  ;;  %v6444_v4 = vld [vmem:[%s9434_s5 + $0x210] ss:$8 sps:$4 sm:$0xff]  }
 0x2af   :  { %v8472_v57 = vpop.f32.mrf.mxu1  ;;  %v2435_v23 = vpack.c.bf16 %v2337_v19, %v2335_v33  ;;  %v2341_v19 = vmax.f32 %v2213_v50, 0.0  ;;  %v1985_v33 = vadd.f32 %v9548_v26, %v8356_v18  ;;  %v8521_v47 = vpop.f32.mrf.mxu0  ;;  %v2215_v25 = vadd.f32 %v8063_v5, %v1981_v14 }
 0x2b0   :  { %v2339_v10 = vmax.f32 %v2211_v46, 0.0 }
 0x2b1   :  { %v8476_v35 = vpop.f32.mrf.mxu1  ;;  %2839 = vmatmul.mubr.bf16.gmra.mxu1 %v2433_v0  ;;  %v2217_v18 = vadd.f32 %v8063_v5, %v1985_v33  ;;  %v8532_v32 = vpop.f32.mrf.mxu0  ;;  %v2007_v33 = vadd.f32 %v8159_v15, %v8418_v31  ;;  %v6446_v15 = vld [vmem:[%s9434_s5 + $0x214] ss:$8 sps:$4 sm:$0xff]   ;;  %v2221_v31 = vadd.f32 %v8063_v5, %v1995_v45 }
 0x2b2   :  { %2848 = vmatprep.mubr.bf16.mxu1 %v2436_v38  ;;  %v1983_v38 = vadd.f32 %v9547_v39, %v8344_v27  ;;  %v2437_v50 = vpack.c.bf16 %v2341_v19, %v2339_v10  ;;  %v2350_v19 = vmax.f32 %v2222_v22, 0.0  ;;  %4190 = vmatprep.subr.bf16.mxu1 %v6446_v15 }
 0x2b3   :  { %v8483_v59 = vpop.f32.mrf.mxu1  ;;  %v2345_v26 = vmax.f32 %v2217_v18, 0.0  ;;  %v8545_v16 = vpop.f32.mrf.mxu0  ;;  %v2226_v56 = vadd.f32 %v8032_v52, %v2007_v33  ;;  %4191 = vmatpush1.bf16.msra.mxu1 %v6444_v4  ;;  %v2349_v22 = vmax.f32 %v2221_v31, 0.0 }
 0x2b4   :  { %v2216_v39 = vadd.f32 %v8032_v52, %v1983_v38 }
 0x2b5   :  { %v8489_v0 = vpop.f32.mrf.mxu1 }
 0x2b6   :  { %v2344_v38 = vmax.f32 %v2216_v39, 0.0  ;;  %v2220_v39 = vadd.f32 %v8032_v52, %v1993_v2 }
 0x2b7   :  { %v8502_v20 = vpop.f32.mrf.mxu1 }
 0x2b8   :  { %v2440_v51 = vpack.c.bf16 %v2346_v21, %v2344_v38  ;;  %v2343_v21 = vmax.f32 %v2215_v25, 0.0  ;;  %v2348_v14 = vmax.f32 %v2220_v39, 0.0  ;;  %v2003_v38 = vadd.f32 %v8135_v54, %v8405_v24  ;;  %v8562_v24 = vpop.f32.mrf.mxu0 }
 0x2b9   :  { %v8506_v27 = vpop.f32.mrf.mxu1  ;;  %2849 = vmatmul.mubr.bf16.gmra.mxu1 %v2435_v23  ;;  %v2354_v39 = vmax.f32 %v2226_v56, 0.0  ;;  %v2027_v56 = vadd.f32 %v8279_v44, %v8472_v57  ;;  %v6449_v44 = vld [vmem:[%s9434_s5 + $0x204] ss:$8 sps:$4 sm:$0xff]  }
 0x2ba   :  { %2858 = vmatprep.mubr.bf16.mxu1 %v2438_v41  ;;  %v2439_v58 = vpack.c.bf16 %v2345_v26, %v2343_v21  ;;  %v2442_v2 = vpack.c.bf16 %v2350_v19, %v2348_v14  ;;  %v2224_v18 = vadd.f32 %v8032_v52, %v2003_v38  ;;  %v2017_v26 = vadd.f32 %v8219_v8, %v8448_v29  ;;  %v8575_v21 = vpop.f32.mrf.mxu0 }
 0x2bb   :  { %v8513_v1 = vpop.f32.mrf.mxu1  ;;  %v2001_v19 = vadd.f32 %v8124_v7, %v8398_v42  ;;  %v2013_v14 = vadd.f32 %v8189_v63, %v8429_v49  ;;  %v2015_v63 = vadd.f32 %v8202_v3, %v8435_v48  ;;  %v6447_v3 = vld [vmem:[%s9434_s5 + $0x200] ss:$8 sps:$4 sm:$0xff]   ;;  %4192 = vmatprep.subr.bf16.mxu1 %v6449_v44 }
 0x2bc   :  { %v2230_v4 = vadd.f32 %v8032_v52, %v2017_v26  ;;  %v8586_v7 = vpop.f32.mrf.mxu0  ;;  %4193 = vmatpush1.bf16.msra.mxu1 %v6447_v3 }
 0x2bd   :  { %v8519_v23 = vpop.f32.mrf.mxu1  ;;  %v2223_v29 = vadd.f32 %v8063_v5, %v2001_v19  ;;  %v2228_v42 = vadd.f32 %v8032_v52, %v2013_v14  ;;  %v2229_v57 = vadd.f32 %v8063_v5, %v2015_v63  ;;  %v2025_v14 = vadd.f32 %v8262_v12, %v8465_v34 }
 0x2be   :  { %v2358_v31 = vmax.f32 %v2230_v4, 0.0  ;;  %v2037_v4 = vadd.f32 %v8339_v55, %v8502_v20 }
 0x2bf   :  { %v8526_v41 = vpop.f32.mrf.mxu1  ;;  %v2233_v12 = vadd.f32 %v8063_v5, %v2025_v14 }
 0x2c0   :  { %v2047_v3 = vadd.f32 %v8400_v28, %v8526_v41  ;;  %v6452_v28 = vld [vmem:[%s9434_s5 + $0x2f4] ss:$8 sps:$4 sm:$0xff]  }
 0x2c1   :  { %v8530_v46 = vpop.f32.mrf.mxu1  ;;  %2859 = vmatmul.mubr.bf16.gmra.mxu1 %v2437_v50  ;;  %v2219_v50 = vadd.f32 %v8063_v5, %v1991_v6  ;;  %v2352_v6 = vmax.f32 %v2224_v18, 0.0  ;;  %4194 = vmatprep.subr.bf16.mxu1 %v6452_v28 }
 0x2c2   :  { %2868 = vmatprep.mubr.bf16.mxu1 %v2440_v51  ;;  %v2005_v51 = vadd.f32 %v8148_v53, %v8411_v43  ;;  %v2242_v14 = vadd.f32 %v8032_v52, %v2047_v3 }
 0x2c3   :  { %v8537_v11 = vpop.f32.mrf.mxu1  ;;  %v2347_v45 = vmax.f32 %v2219_v50, 0.0  ;;  %v2444_v8 = vpack.c.bf16 %v2354_v39, %v2352_v6  ;;  %v2011_v50 = vadd.f32 %v8178_v36, %v8422_v61  ;;  %v2023_v39 = vadd.f32 %v8249_v9, %v8459_v13 }
 0x2c4   :  { %v2225_v53 = vadd.f32 %v8063_v5, %v2005_v51  ;;  %v2356_v51 = vmax.f32 %v2228_v42, 0.0  ;;  %v2234_v61 = vadd.f32 %v8032_v52, %v2027_v56  ;;  %v2357_v6 = vmax.f32 %v2229_v57, 0.0 }
 0x2c5   :  { %v8543_v10 = vpop.f32.mrf.mxu1  ;;  %v2441_v38 = vpack.c.bf16 %v2349_v22, %v2347_v45  ;;  %v8599_v22 = vpop.f32.mrf.mxu0  ;;  %v2227_v45 = vadd.f32 %v8063_v5, %v2011_v50  ;;  %v2232_v19 = vadd.f32 %v8032_v52, %v2023_v39 }
 0x2c6   :  { %v2446_v26 = vpack.c.bf16 %v2358_v31, %v2356_v51  ;;  %v2033_v31 = vadd.f32 %v8309_v60, %v8483_v59  ;;  %v2361_v51 = vmax.f32 %v2233_v12, 0.0  ;;  %v2035_v60 = vadd.f32 %v8322_v40, %v8489_v0  ;;  %v6450_v40 = vld [vmem:[%s9434_s5 + $0x2f0] ss:$8 sps:$4 sm:$0xff]  }
 0x2c7   :  { %v8556_v30 = vpop.f32.mrf.mxu1  ;;  %v8616_v13 = vpop.f32.mrf.mxu0  ;;  %v2360_v63 = vmax.f32 %v2232_v19, 0.0  ;;  %v9551_v19 = vld [vmem:[#allocation3_spill] sm:$0xff]  ;;  %4195 = vmatpush2.bf16.msra.mxu1 %v6450_v40 }
 0x2c8   :  { %v2237_v41 = vadd.f32 %v8063_v5, %v2035_v60 }
 0x2c9   :  { %v8560_v54 = vpop.f32.mrf.mxu1  ;;  %2869 = vmatmul.mubr.bf16.gmra.mxu1 %v2439_v58  ;;  %v2353_v58 = vmax.f32 %v2225_v53, 0.0  ;;  %v2362_v53 = vmax.f32 %v2234_v61, 0.0 }
 0x2ca   :  { %2878 = vmatprep.mubr.bf16.mxu1 %v2442_v2  ;;  %v2351_v2 = vmax.f32 %v2223_v29, 0.0  ;;  %v2021_v29 = vadd.f32 %v8238_v62, %v8452_v17  ;;  %v2236_v17 = vadd.f32 %v8032_v52, %v2033_v31  ;;  %v9552_v31 = vld [vmem:[#allocation6_spill] sm:$0xff] }
 0x2cb   :  { %v8567_v25 = vpop.f32.mrf.mxu1  ;;  %v2448_v55 = vpack.c.bf16 %v2362_v53, %v2360_v63  ;;  %v2365_v63 = vmax.f32 %v2237_v41, 0.0 }
 0x2cc   :  { %v2443_v48 = vpack.c.bf16 %v2353_v58, %v2351_v2  ;;  %v8629_v58 = vpop.f32.mrf.mxu0  ;;  %v2238_v2 = vadd.f32 %v8032_v52, %v2037_v4  ;;  %v2231_v20 = vadd.f32 %v8063_v5, %v2021_v29 }
 0x2cd   :  { %v8573_v33 = vpop.f32.mrf.mxu1 }
 0x2ce   :  { %v8640_v62 = vpop.f32.mrf.mxu0  ;;  %v2366_v39 = vmax.f32 %v2238_v2, 0.0  ;;  %v2359_v44 = vmax.f32 %v2231_v20, 0.0  ;;  %v2370_v2 = vmax.f32 %v2242_v14, 0.0 }
 0x2cf   :  { %v8580_v43 = vpop.f32.mrf.mxu1 }
 0x2d0   :  { %v2447_v0 = vpack.c.bf16 %v2361_v51, %v2359_v44  ;;  %v9554_v51 = vld [vmem:[#allocation8_spill] sm:$0xff] }
 0x2d1   :  { %v8584_v15 = vpop.f32.mrf.mxu1  ;;  %2879 = vmatmul.mubr.bf16.gmra.mxu1 %v2441_v38  ;;  %v2041_v60 = vadd.f32 %v9554_v51, %v8506_v27 }
 0x2d2   :  { %2888 = vmatprep.mubr.bf16.mxu1 %v2444_v8  ;;  %v2355_v8 = vmax.f32 %v2227_v45, 0.0  ;;  %v2364_v45 = vmax.f32 %v2236_v17, 0.0 }
 0x2d3   :  { %v8591_v49 = vpop.f32.mrf.mxu1  ;;  %v2239_v40 = vadd.f32 %v8063_v5, %v2041_v60 }
 0x2d4   :  { %v2445_v56 = vpack.c.bf16 %v2357_v6, %v2355_v8  ;;  %v2043_v6 = vadd.f32 %v9551_v19, %v8513_v1  ;;  %v2450_v53 = vpack.c.bf16 %v2366_v39, %v2364_v45 }
 0x2d5   :  { %v8597_v18 = vpop.f32.mrf.mxu1 }
 0x2d6   :  { %v2240_v29 = vadd.f32 %v8032_v52, %v2043_v6 }
 0x2d7   :  { %v8610_v36 = vpop.f32.mrf.mxu1 }
 0x2d8   :  { %v2368_v44 = vmax.f32 %v2240_v29, 0.0  ;;  %v2067_v29 = vadd.f32 %v8508_v37, %v8580_v43  ;;  %v6455_v37 = vld [vmem:[%s9434_s5 + $0x2e4] ss:$8 sps:$4 sm:$0xff]  }
 0x2d9   :  { %v8614_v9 = vpop.f32.mrf.mxu1  ;;  %2889 = vmatmul.mubr.bf16.gmra.mxu1 %v2443_v48  ;;  %v9550_v48 = vld [vmem:[#allocation4_spill] sm:$0xff]  ;;  %4196 = vmatprep.subr.bf16.mxu1 %v6455_v37 }
 0x2da   :  { %2898 = vmatprep.mubr.bf16.mxu1 %v2446_v26  ;;  %v2031_v57 = vadd.f32 %v9550_v48, %v8476_v35  ;;  %v8653_v26 = vpop.f32.mrf.mxu0  ;;  %v9555_v48 = vld [vmem:[#allocation12_spill] sm:$0xff] }
 0x2db   :  { %v8621_v38 = vpop.f32.mrf.mxu1 }
 0x2dc   :  { %v2235_v4 = vadd.f32 %v8063_v5, %v2031_v57  ;;  %v8668_v1 = vpop.f32.mrf.mxu0  ;;  %v2053_v57 = vadd.f32 %v9555_v48, %v8537_v11  ;;  %v9556_v11 = vld [vmem:[#allocation5_spill] sm:$0xff] }
 0x2dd   :  { %v8627_v42 = vpop.f32.mrf.mxu1  ;;  %v2055_v14 = vadd.f32 %v9556_v11, %v8543_v10  ;;  %v6453_v10 = vld [vmem:[%s9434_s5 + $0x2e0] ss:$8 sps:$4 sm:$0xff]   ;;  %v2077_v11 = vadd.f32 %v8562_v24, %v8610_v36 }
 0x2de   :  { %v2363_v17 = vmax.f32 %v2235_v4, 0.0  ;;  %v8681_v39 = vpop.f32.mrf.mxu0  ;;  %4197 = vmatpush2.bf16.msra.mxu1 %v6453_v10 }
 0x2df   :  { %v8634_v34 = vpop.f32.mrf.mxu1  ;;  %v2245_v60 = vadd.f32 %v8063_v5, %v2055_v14  ;;  %v2254_v10 = vadd.f32 %v8032_v52, %v2077_v11  ;;  %v5898_v11 = vld [vmem:[%s9435_s7 + $0x2] sm:$0x3] }
 0x2e0   :  { %v2449_v45 = vpack.c.bf16 %v2365_v63, %v2363_v17  ;;  %v8692_v28 = vpop.f32.mrf.mxu0  ;;  %v2367_v63 = vmax.f32 %v2239_v40, 0.0  ;;  %v9558_v17 = vld [vmem:[#allocation16_spill] sm:$0xff] }
 0x2e1   :  { %v8638_v50 = vpop.f32.mrf.mxu1  ;;  %2899 = vmatmul.mubr.bf16.gmra.mxu1 %v2445_v56  ;;  %v2045_v56 = vadd.f32 %v9552_v31, %v8519_v23  ;;  %v9557_v31 = vld [vmem:[#allocation7_spill] sm:$0xff]  ;;  %v2063_v51 = vadd.f32 %v9558_v17, %v8567_v25 }
 0x2e2   :  { %2908 = vmatprep.mubr.bf16.mxu1 %v2448_v55  ;;  %v9553_v55 = vld [vmem:[#allocation10_spill] sm:$0xff] }
 0x2e3   :  { %v8645_v59 = vpop.f32.mrf.mxu1  ;;  %v2057_v20 = vadd.f32 %v9553_v55, %v8556_v30  ;;  %v2241_v23 = vadd.f32 %v8063_v5, %v2045_v56  ;;  %v2452_v30 = vpack.c.bf16 %v2370_v2, %v2368_v44  ;;  %v2051_v56 = vadd.f32 %v9557_v31, %v8530_v46  ;;  %v8705_v2 = vpop.f32.mrf.mxu0 }
 0x2e4   :  { %v2250_v44 = vadd.f32 %v8032_v52, %v2067_v29 }
 0x2e5   :  { %v8651_v61 = vpop.f32.mrf.mxu1  ;;  %v2246_v6 = vadd.f32 %v8032_v52, %v2057_v20  ;;  %v2369_v41 = vmax.f32 %v2241_v23, 0.0  ;;  %v8722_v25 = vpop.f32.mrf.mxu0  ;;  %v2248_v23 = vadd.f32 %v8032_v52, %v2063_v51 }
 0x2e7   :  { %v8664_v35 = vpop.f32.mrf.mxu1  ;;  %v2374_v4 = vmax.f32 %v2246_v6, 0.0  ;;  %v2451_v43 = vpack.c.bf16 %v2369_v41, %v2367_v63  ;;  %v2373_v6 = vmax.f32 %v2245_v60, 0.0  ;;  %v2378_v41 = vmax.f32 %v2250_v44, 0.0  ;;  %v8735_v63 = vpop.f32.mrf.mxu0 }
 0x2e8   :  { %v2382_v44 = vmax.f32 %v2254_v10, 0.0  ;;  %v9562_v10 = vld [vmem:[#allocation46_spill] sm:$0xff] }
 0x2e9   :  { %v8670_v8 = vpop.f32.mrf.mxu1  ;;  %2909 = vmatmul.mubr.bf16.gmra.mxu1 %v2447_v0  ;;  %v2244_v0 = vadd.f32 %v8032_v52, %v2053_v57  ;;  %v2243_v57 = vadd.f32 %v8063_v5, %v2051_v56  ;;  %v2376_v56 = vmax.f32 %v2248_v23, 0.0  ;;  %v8746_v37 = vpop.f32.mrf.mxu0  ;;  %v2071_v23 = vadd.f32 %v8521_v47, %v8584_v15 }
 0x2ea   :  { %2918 = vmatprep.mubr.bf16.mxu1 %v2450_v53 }
 0x2eb   :  { %v8675_v12 = vpop.f32.mrf.mxu1  ;;  %v2372_v20 = vmax.f32 %v2244_v0, 0.0  ;;  %v2371_v14 = vmax.f32 %v2243_v57, 0.0  ;;  %v2456_v24 = vpack.c.bf16 %v2378_v41, %v2376_v56  ;;  %v2083_v41 = vadd.f32 %v8586_v7, %v8621_v38  ;;  %v9561_v56 = vld [vmem:[#allocation44_spill] sm:$0xff] }
 0x2ec   :  { %v2251_v38 = vadd.f32 %v8063_v5, %v2071_v23 }
 0x2ed   :  { %v8683_v3 = vpop.f32.mrf.mxu1  ;;  %v2454_v48 = vpack.c.bf16 %v2374_v4, %v2372_v20  ;;  %v9560_v4 = vld [vmem:[#allocation11_spill] sm:$0xff]  ;;  %v2073_v20 = vadd.f32 %v8532_v32, %v8591_v49  ;;  %v2453_v17 = vpack.c.bf16 %v2373_v6, %v2371_v14  ;;  %v2075_v32 = vadd.f32 %v8545_v16, %v8597_v18  ;;  %v8759_v6 = vpop.f32.mrf.mxu0  ;;  %v6456_v16 = vld [vmem:[%s9434_s5 + $0x2d0] ss:$8 sps:$4 sm:$0xff]   ;;  %v6458_v18 = vld [vmem:[%s9434_s5 + $0x2d4] ss:$8 sps:$4 sm:$0xff]  }
 0x2ee   :  { %v2061_v29 = vadd.f32 %v9560_v4, %v8560_v54  ;;  %4198 = vmatprep.subr.bf16.mxu1 %v6458_v18 }
 0x2ef   :  { %v8688_v19 = vpop.f32.mrf.mxu1  ;;  %v8779_v14 = vpop.f32.mrf.mxu0  ;;  %4199 = vmatpush2.bf16.msra.mxu1 %v6456_v16 }
 0x2f0   :  { %v2247_v36 = vadd.f32 %v8063_v5, %v2061_v29  ;;  %v2256_v29 = vadd.f32 %v8032_v52, %v2083_v41 }
 0x2f1   :  { %v8694_v27 = vpop.f32.mrf.mxu1  ;;  %2919 = vmatmul.mubr.bf16.gmra.mxu1 %v2449_v45 }
 0x2f2   :  { %2928 = vmatprep.mubr.bf16.mxu1 %v2452_v30  ;;  %v9559_v30 = vld [vmem:[#allocation9_spill] sm:$0xff]  ;;  %v2375_v57 = vmax.f32 %v2247_v36, 0.0  ;;  %v2384_v23 = vmax.f32 %v2256_v29, 0.0 }
 0x2f3   :  { %v8699_v53 = vpop.f32.mrf.mxu1  ;;  %v2065_v40 = vadd.f32 %v9559_v30, %v8573_v33 }
 0x2f5   :  { %v8707_v55 = vpop.f32.mrf.mxu1  ;;  %v2249_v33 = vadd.f32 %v8063_v5, %v2065_v40 }
 0x2f7   :  { %v8718_v46 = vpop.f32.mrf.mxu1  ;;  %v2377_v60 = vmax.f32 %v2249_v33, 0.0  ;;  %v2085_v33 = vadd.f32 %v8599_v22, %v8627_v42 }
 0x2f9   :  { %v8724_v45 = vpop.f32.mrf.mxu1  ;;  %2929 = vmatmul.mubr.bf16.gmra.mxu1 %v2451_v43  ;;  %v2252_v43 = vadd.f32 %v8032_v52, %v2073_v20  ;;  %v8783_v20 = vrot.slane %v5898_v11, %v9561_v56  ;;  %v2257_v16 = vadd.f32 %v8063_v5, %v2085_v33 }
 0x2fa   :  { %2938 = vmatprep.mubr.bf16.mxu1 %v2454_v48  ;;  %v2087_v48 = vadd.f32 %v8616_v13, %v8634_v34  ;;  %v2455_v13 = vpack.c.bf16 %v2377_v60, %v2375_v57  ;;  %v2253_v34 = vadd.f32 %v8063_v5, %v2075_v32  ;;  %v2097_v60 = vadd.f32 %v8668_v1, %v8664_v35 }
 0x2fb   :  { %v8729_v0 = vpop.f32.mrf.mxu1  ;;  %v2380_v40 = vmax.f32 %v2252_v43, 0.0  ;;  %v2379_v32 = vmax.f32 %v2251_v38, 0.0  ;;  %v2385_v38 = vmax.f32 %v2257_v16, 0.0 }
 0x2fc   :  { %v2258_v15 = vadd.f32 %v8032_v52, %v2087_v48  ;;  %v8794_v48 = vpop.f32.mrf.mxu0  ;;  %v2262_v18 = vadd.f32 %v8032_v52, %v2097_v60 }
 0x2fd   :  { %v8737_v31 = vpop.f32.mrf.mxu1  ;;  %v2458_v7 = vpack.c.bf16 %v2382_v44, %v2380_v40  ;;  %v2081_v44 = vadd.f32 %v8575_v21, %v8614_v9  ;;  %v2093_v40 = vadd.f32 %v8640_v62, %v8645_v59 }
 0x2fe   :  { %v2386_v43 = vmax.f32 %v2258_v15, 0.0  ;;  %v2390_v33 = vmax.f32 %v2262_v18, 0.0 }
 0x2ff   :  { %v8742_v51 = vpop.f32.mrf.mxu1  ;;  %v2260_v15 = vadd.f32 %v8032_v52, %v2093_v40 }
 0x300   :  { %v2460_v9 = vpack.c.bf16 %v2386_v43, %v2384_v23 }
 0x301   :  { %v8748_v54 = vpop.f32.mrf.mxu1  ;;  %2939 = vmatmul.mubr.bf16.gmra.mxu1 %v2453_v17  ;;  %v2381_v17 = vmax.f32 %v2253_v34, 0.0  ;;  %v8805_v34 = vpop.f32.mrf.mxu0  ;;  %v2388_v40 = vmax.f32 %v2260_v15, 0.0  ;;  %v2105_v15 = vadd.f32 %v8705_v2, %v8683_v3 }
 0x302   :  { %2948 = vmatprep.mubr.bf16.mxu1 %v2456_v24  ;;  %v8788_v24 = vrot.slane %v5898_v11, %v9562_v10 }
 0x303   :  { %v8753_v49 = vpop.f32.mrf.mxu1  ;;  %v2457_v41 = vpack.c.bf16 %v2381_v17, %v2379_v32  ;;  %v2091_v32 = vadd.f32 %v8629_v58, %v8638_v50  ;;  %v6461_v58 = vld [vmem:[%s9434_s5 + $0x2c4] ss:$8 sps:$4 sm:$0xff]   ;;  %v2462_v16 = vpack.c.bf16 %v2390_v33, %v2388_v40  ;;  %v2101_v33 = vadd.f32 %v8681_v39, %v8670_v8 }
 0x304   :  { %4200 = vmatprep.subr.bf16.mxu1 %v6461_v58 }
 0x305   :  { %v8761_v30 = vpop.f32.mrf.mxu1 }
 0x307   :  { %v8772_v47 = vpop.f32.mrf.mxu1 }
 0x309   :  { %v2710_v4 = vpop.f32.mrf.mxu1  ;;  %2949 = vmatmul.mubr.bf16.gmra.mxu1 %v2455_v13  ;;  %v2255_v13 = vadd.f32 %v8063_v5, %v2081_v44  ;;  %v8814_v44 = vpop.f32.mrf.mxu0 }
 0x30a   :  { %2958 = vmatprep.mubr.bf16.mxu1 %v2458_v7  ;;  %v2711_v35 = vadd.f32 %v2710_v4, %v8788_v24  ;;  %v2095_v4 = vadd.f32 %v8653_v26, %v8651_v61 }
 0x30b   :  { %v2712_v36 = vpop.f32.mrf.mxu1  ;;  %v2383_v60 = vmax.f32 %v2255_v13, 0.0 }
 0x30c   :  { %v2713_v22 = vadd.f32 %v2712_v36, %v8783_v20  ;;  %v3029_v29 = vmax.f32 %v2711_v35, 0.0  ;;  %v2107_v36 = vadd.f32 %v8722_v25, %v8688_v19  ;;  %v6459_v19 = vld [vmem:[%s9434_s5 + $0x2c0] ss:$8 sps:$4 sm:$0xff]   ;;  %v2261_v25 = vadd.f32 %v8063_v5, %v2095_v4 }
 0x30d   :  { %v2714_v57 = vpop.f32.mrf.mxu1  ;;  %v2459_v50 = vpack.c.bf16 %v2385_v38, %v2383_v60  ;;  %v2259_v35 = vadd.f32 %v8063_v5, %v2091_v32  ;;  %4201 = vmatpush2.bf16.msra.mxu1 %v6459_v19  ;;  %v2117_v4 = vadd.f32 %v8779_v14, %v8718_v46  ;;  %v2265_v46 = vadd.f32 %v8063_v5, %v2105_v15 }
 0x30e   :  { %v2715_v42 = vadd.f32 %v2714_v57, %v8788_v24  ;;  %v3030_v11 = vmax.f32 %v2713_v22, 0.0  ;;  %v2103_v22 = vadd.f32 %v8692_v28, %v8675_v12  ;;  %v2266_v12 = vadd.f32 %v8032_v52, %v2107_v36 }
 0x30f   :  { %v2716_v1 = vpop.f32.mrf.mxu1  ;;  %v2270_v8 = vadd.f32 %v8032_v52, %v2117_v4  ;;  %v2123_v15 = vadd.f32 %v8805_v34, %v8729_v0 }
 0x310   :  { %v2717_v21 = vadd.f32 %v2716_v1, %v8783_v20  ;;  %v3031_v62 = vmax.f32 %v2715_v42, 0.0  ;;  %v2126_v1 = vpop.f32.mrf.mxu0  ;;  %v2394_v38 = vmax.f32 %v2266_v12, 0.0 }
 0x311   :  { %v2720_v59 = vpop.f32.mrf.mxu1  ;;  %2959 = vmatmul.mubr.bf16.gmra.mxu1 %v2457_v41 }
 0x312   :  { %v3032_v7 = vmax.f32 %v2717_v21, 0.0  ;;  %2968 = vmatprep.mubr.bf16.mxu1 %v2460_v9  ;;  %v3157_v57 = vpack.c.bf16 %v3031_v62, %v3029_v29  ;;  %v2721_v42 = vadd.f32 %v2720_v59, %v8788_v24  ;;  %v2264_v9 = vadd.f32 %v8032_v52, %v2103_v22  ;;  %v8838_v36 = vpop.f32.mrf.mxu0 }
 0x313   :  { %v2722_v17 = vpop.f32.mrf.mxu1  ;;  %v2389_v59 = vmax.f32 %v2261_v25, 0.0  ;;  %v2393_v25 = vmax.f32 %v2265_v46, 0.0 }
 0x314   :  { %v3158_v43 = vpack.c.bf16 %v3032_v7, %v3030_v11  ;;  %v2723_v61 = vadd.f32 %v2722_v17, %v8783_v20  ;;  %v3033_v11 = vmax.f32 %v2721_v42, 0.0  ;;  %v2387_v17 = vmax.f32 %v2259_v35, 0.0 }
 0x315   :  { %v2724_v23 = vpop.f32.mrf.mxu1  ;;  %v2392_v32 = vmax.f32 %v2264_v9, 0.0  ;;  %v2115_v42 = vadd.f32 %v8759_v6, %v8707_v55 }
 0x316   :  { %v2725_v26 = vadd.f32 %v2724_v23, %v8788_v24  ;;  %3459 = vmatprep.mubr.bf16.mxu0 %v3158_v43  ;;  %v3034_v13 = vmax.f32 %v2723_v61, 0.0  ;;  %v2461_v23 = vpack.c.bf16 %v2389_v59, %v2387_v17  ;;  %v2263_v61 = vadd.f32 %v8063_v5, %v2101_v33 }
 0x317   :  { %v2726_v41 = vpop.f32.mrf.mxu1  ;;  %3460 = vmatmul.mubr.bf16.vlgmr.msra.gmra.mxu0 %v3157_v57  ;;  %v2113_v57 = vadd.f32 %v8746_v37, %v8699_v53  ;;  %v2464_v22 = vpack.c.bf16 %v2394_v38, %v2392_v32  ;;  %v2132_v53 = vpop.f32.mrf.mxu0  ;;  %v2269_v6 = vadd.f32 %v8063_v5, %v2115_v42 }
 0x318   :  { %v2727_v28 = vadd.f32 %v2726_v41, %v8783_v20  ;;  %v3035_v18 = vmax.f32 %v2725_v26, 0.0 }
 0x319   :  { %v2730_v21 = vpop.f32.mrf.mxu1  ;;  %2969 = vmatmul.mubr.bf16.gmra.mxu1 %v2459_v50  ;;  %v2268_v19 = vadd.f32 %v8032_v52, %v2113_v57  ;;  %v2134_v9 = vpop.f32.mrf.mxu0  ;;  %v2397_v57 = vmax.f32 %v2269_v6, 0.0 }
 0x31a   :  { %v3036_v62 = vmax.f32 %v2727_v28, 0.0  ;;  %2978 = vmatprep.mubr.bf16.mxu1 %v2462_v16  ;;  %v3159_v43 = vpack.c.bf16 %v3035_v18, %v3033_v11  ;;  %v2731_v14 = vadd.f32 %v2730_v21, %v8788_v24  ;;  %v2398_v28 = vmax.f32 %v2270_v8, 0.0 }
 0x31b   :  { %v2732_v7 = vpop.f32.mrf.mxu1  ;;  %v2127_v16 = vadd.f32 %v2126_v1, %v8742_v51  ;;  %v2391_v18 = vmax.f32 %v2263_v61, 0.0  ;;  %v2111_v21 = vadd.f32 %v8735_v63, %v8694_v27  ;;  %v2396_v59 = vmax.f32 %v2268_v19, 0.0  ;;  %v6462_v51 = vld [vmem:[%s9434_s5 + $0x2b0] ss:$8 sps:$4 sm:$0xff]   ;;  %v6464_v27 = vld [vmem:[%s9434_s5 + $0x2b4] ss:$8 sps:$4 sm:$0xff]  }
 0x31c   :  { %v3160_v29 = vpack.c.bf16 %v3036_v62, %v3034_v13  ;;  %v2733_v3 = vadd.f32 %v2732_v7, %v8783_v20  ;;  %v3037_v41 = vmax.f32 %v2731_v14, 0.0  ;;  %4202 = vmatprep.subr.bf16.mxu1 %v6464_v27 }
 0x31d   :  { %v2734_v60 = vpop.f32.mrf.mxu1  ;;  %v2463_v63 = vpack.c.bf16 %v2393_v25, %v2391_v18  ;;  %v2274_v0 = vadd.f32 %v8032_v52, %v2127_v16  ;;  %v2466_v38 = vpack.c.bf16 %v2398_v28, %v2396_v59  ;;  %v2267_v4 = vadd.f32 %v8063_v5, %v2111_v21  ;;  %4203 = vmatpush2.bf16.msra.mxu1 %v6462_v51 }
 0x31e   :  { %v2735_v2 = vadd.f32 %v2734_v60, %v8788_v24  ;;  %3469 = vmatprep.mubr.bf16.mxu0 %v3160_v29  ;;  %v3038_v58 = vmax.f32 %v2733_v3, 0.0  ;;  %v2136_v29 = vpop.f32.mrf.mxu0  ;;  %v2125_v3 = vadd.f32 %v8814_v44, %v8737_v31 }
 0x31f   :  { %v2736_v40 = vpop.f32.mrf.mxu1  ;;  %3470 = vmatmul.mubr.bf16.gmra.mxu0 %v3159_v43  ;;  %v2272_v43 = vadd.f32 %v8032_v52, %v2123_v15  ;;  %v2402_v46 = vmax.f32 %v2274_v0, 0.0  ;;  %v2137_v14 = vadd.f32 %v2136_v29, %v8772_v47  ;;  %v2395_v8 = vmax.f32 %v2267_v4, 0.0  ;;  %v6465_v0 = vld [vmem:[%s9436_s6 + $0x38] sm:$0xff]  }
 0x320   :  { %v2737_v39 = vadd.f32 %v2736_v40, %v8783_v20  ;;  %v3039_v37 = vmax.f32 %v2735_v2, 0.0  ;;  %v2273_v44 = vadd.f32 %v8063_v5, %v2125_v3  ;;  %v2135_v47 = vadd.f32 %v2134_v9, %v8761_v30  ;;  %4859 = vmatpush1.bf16.msra.mxu0 %v6465_v0 }
 0x321   :  { %v2740_v26 = vpop.f32.mrf.mxu1  ;;  %2979 = vmatmul.mubr.bf16.gmra.mxu1 %v2461_v23  ;;  %v2465_v31 = vpack.c.bf16 %v2397_v57, %v2395_v8 }
 0x322   :  { %v3040_v50 = vmax.f32 %v2737_v39, 0.0  ;;  %2988 = vmatprep.mubr.bf16.mxu1 %v2464_v22  ;;  %v3161_v13 = vpack.c.bf16 %v3039_v37, %v3037_v41  ;;  %v2741_v1 = vadd.f32 %v2740_v26, %v8788_v24  ;;  %v2121_v39 = vadd.f32 %v8794_v48, %v8724_v45 }
 0x323   :  { %v2742_v12 = vpop.f32.mrf.mxu1  ;;  %v2400_v37 = vmax.f32 %v2272_v43, 0.0  ;;  %v2133_v26 = vadd.f32 %v2132_v53, %v8753_v49  ;;  %v2278_v45 = vadd.f32 %v8032_v52, %v2137_v14  ;;  %v2401_v30 = vmax.f32 %v2273_v44, 0.0 }
 0x324   :  { %v3162_v35 = vpack.c.bf16 %v3040_v50, %v3038_v58  ;;  %v2743_v11 = vadd.f32 %v2742_v12, %v8783_v20  ;;  %v3041_v2 = vmax.f32 %v2741_v1, 0.0  ;;  %v2271_v49 = vadd.f32 %v8063_v5, %v2121_v39 }
 0x325   :  { %v2744_v62 = vpop.f32.mrf.mxu1  ;;  %v2468_v42 = vpack.c.bf16 %v2402_v46, %v2400_v37  ;;  %v2276_v12 = vadd.f32 %v8032_v52, %v2133_v26  ;;  %v2277_v18 = vadd.f32 %v8063_v5, %v2135_v47 }
 0x326   :  { %v2745_v55 = vadd.f32 %v2744_v62, %v8788_v24  ;;  %3479 = vmatprep.mubr.bf16.mxu0 %v3162_v35  ;;  %v3042_v60 = vmax.f32 %v2743_v11, 0.0  ;;  %v2131_v35 = vadd.f32 %v8838_v36, %v8748_v54  ;;  %v2399_v15 = vmax.f32 %v2271_v49, 0.0  ;;  %v6466_v54 = vld [vmem:[%s9434_s5 + $0x2a0] ss:$8 sps:$4 sm:$0xff]   ;;  %v6468_v36 = vld [vmem:[%s9434_s5 + $0x2a4] ss:$8 sps:$4 sm:$0xff]  }
 0x327   :  { %v2746_v7 = vpop.f32.mrf.mxu1  ;;  %3480 = vmatmul.mubr.bf16.gmra.mxu0 %v3161_v13  ;;  %v2406_v13 = vmax.f32 %v2278_v45, 0.0  ;;  %v2404_v51 = vmax.f32 %v2276_v12, 0.0  ;;  %v2405_v1 = vmax.f32 %v2277_v18, 0.0  ;;  %4204 = vmatprep.subr.bf16.mxu1 %v6468_v36  ;;  %v6469_v45 = vld [vmem:[%s9436_s6 + $0x30] sm:$0xff]  }
 0x328   :  { %v2747_v34 = vadd.f32 %v2746_v7, %v8783_v20  ;;  %v3043_v17 = vmax.f32 %v2745_v55, 0.0  ;;  %v2275_v6 = vadd.f32 %v8063_v5, %v2131_v35  ;;  %4205 = vmatpush2.bf16.msra.mxu1 %v6466_v54 }
 0x329   :  { %v2750_v33 = vpop.f32.mrf.mxu1  ;;  %2989 = vmatmul.mubr.bf16.gmra.mxu1 %v2463_v63  ;;  %v2467_v63 = vpack.c.bf16 %v2401_v30, %v2399_v15  ;;  %v2470_v29 = vpack.c.bf16 %v2406_v13, %v2404_v51 }
 0x32a   :  { %v3044_v32 = vmax.f32 %v2747_v34, 0.0  ;;  %2998 = vmatprep.mubr.bf16.mxu1 %v2466_v38  ;;  %v3163_v22 = vpack.c.bf16 %v3043_v17, %v3041_v2  ;;  %v2751_v50 = vadd.f32 %v2750_v33, %v8788_v24 }
 0x32b   :  { %v2752_v23 = vpop.f32.mrf.mxu1 }
 0x32c   :  { %v3164_v40 = vpack.c.bf16 %v3044_v32, %v3042_v60  ;;  %v2753_v19 = vadd.f32 %v2752_v23, %v8783_v20  ;;  %v3045_v21 = vmax.f32 %v2751_v50, 0.0  ;;  %v9563_v60 = vmov 0  }
 0x32d   :  { %v2754_v61 = vpop.f32.mrf.mxu1  ;;  %4860 = vmatprep.subr.bf16.mxu0 %v9563_v60  ;;  %v2403_v32 = vmax.f32 %v2275_v6, 0.0 }
 0x32e   :  { %v2755_v58 = vadd.f32 %v2754_v61, %v8788_v24  ;;  %3489 = vmatprep.mubr.bf16.mxu0 %v3164_v40  ;;  %v3046_v28 = vmax.f32 %v2753_v19, 0.0  ;;  %4861 = vmatpush1.bf16.msra.mxu0 %v6469_v45 }
 0x32f   :  { %v2756_v25 = vpop.f32.mrf.mxu1  ;;  %3490 = vmatmul.mubr.bf16.gmra.mxu0 %v3163_v22  ;;  %v2469_v40 = vpack.c.bf16 %v2405_v1, %v2403_v32  ;;  %4862 = vmatprep.subr.bf16.mxu0 %v9563_v60 }
 0x330   :  { %v2757_v48 = vadd.f32 %v2756_v25, %v8783_v20  ;;  %v3047_v53 = vmax.f32 %v2755_v58, 0.0 }
 0x331   :  { %v2760_v41 = vpop.f32.mrf.mxu1  ;;  %2999 = vmatmul.mubr.bf16.gmra.mxu1 %v2465_v31 }
 0x332   :  { %v3048_v16 = vmax.f32 %v2757_v48, 0.0  ;;  %3008 = vmatprep.mubr.bf16.mxu1 %v2468_v42  ;;  %v2761_v62 = vadd.f32 %v2760_v41, %v8788_v24  ;;  %v3165_v11 = vpack.c.bf16 %v3047_v53, %v3045_v21  ;;  %v6470_v48 = vld [vmem:[%s9434_s5 + $0x290] ss:$8 sps:$4 sm:$0xff]   ;;  %v6472_v42 = vld [vmem:[%s9434_s5 + $0x294] ss:$8 sps:$4 sm:$0xff]  }
 0x333   :  { %v2762_v9 = vpop.f32.mrf.mxu1  ;;  %4206 = vmatprep.subr.bf16.mxu1 %v6472_v42 }
 0x334   :  { %v3166_v59 = vpack.c.bf16 %v3048_v16, %v3046_v28  ;;  %v2763_v52 = vadd.f32 %v2762_v9, %v8783_v20  ;;  %v3049_v34 = vmax.f32 %v2761_v62, 0.0  ;;  %4207 = vmatpush2.bf16.msra.mxu1 %v6470_v48 }
 0x335   :  { %v2764_v55 = vpop.f32.mrf.mxu1 }
 0x336   :  { %v2765_v27 = vadd.f32 %v2764_v55, %v8788_v24  ;;  %3499 = vmatprep.mubr.bf16.mxu0 %v3166_v59  ;;  %v3050_v33 = vmax.f32 %v2763_v52, 0.0 }
 0x337   :  { %v2766_v7 = vpop.f32.mrf.mxu1  ;;  %3500 = vmatmul.mubr.bf16.gmra.mxu0 %v3165_v11 }
 0x338   :  { %v3051_v38 = vmax.f32 %v2765_v27, 0.0  ;;  %v2767_v4 = vadd.f32 %v2766_v7, %v8783_v20 }
 0x339   :  { %v2770_v17 = vpop.f32.mrf.mxu1  ;;  %3009 = vmatmul.mubr.bf16.gmra.mxu1 %v2467_v63 }
 0x33a   :  { %v3052_v43 = vmax.f32 %v2767_v4, 0.0  ;;  %3018 = vmatprep.mubr.bf16.mxu1 %v2470_v29  ;;  %v2771_v57 = vadd.f32 %v2770_v17, %v8788_v24  ;;  %v3167_v2 = vpack.c.bf16 %v3051_v38, %v3049_v34  ;;  %v6473_v38 = vld [vmem:[%s9436_s6 + $0x28] sm:$0xff]  }
 0x33b   :  { %v2772_v5 = vpop.f32.mrf.mxu1  ;;  %v6474_v4 = vld [vmem:[%s9434_s5 + $0x280] ss:$8 sps:$4 sm:$0xff]   ;;  %v6476_v29 = vld [vmem:[%s9434_s5 + $0x284] ss:$8 sps:$4 sm:$0xff]   ;;  %4863 = vmatpush1.bf16.msra.mxu0 %v6473_v38 }
 0x33c   :  { %v3168_v3 = vpack.c.bf16 %v3052_v43, %v3050_v33  ;;  %v2773_v46 = vadd.f32 %v2772_v5, %v8783_v20  ;;  %v3053_v39 = vmax.f32 %v2771_v57, 0.0  ;;  %4208 = vmatprep.subr.bf16.mxu1 %v6476_v29  ;;  %4864 = vmatprep.subr.bf16.mxu0 %v9563_v60 }
 0x33d   :  { %v2774_v23 = vpop.f32.mrf.mxu1  ;;  %4209 = vmatpush2.bf16.msra.mxu1 %v6474_v4 }
 0x33e   :  { %v2775_v14 = vadd.f32 %v2774_v23, %v8788_v24  ;;  %3509 = vmatprep.mubr.bf16.mxu0 %v3168_v3  ;;  %v3054_v26 = vmax.f32 %v2773_v46, 0.0 }
 0x33f   :  { %v2776_v8 = vpop.f32.mrf.mxu1  ;;  %3510 = vmatmul.mubr.bf16.gmra.mxu0 %v3167_v2 }
 0x340   :  { %v3055_v22 = vmax.f32 %v2775_v14, 0.0  ;;  %v2777_v61 = vadd.f32 %v2776_v8, %v8783_v20 }
 0x341   :  { %v2780_v37 = vpop.f32.mrf.mxu1  ;;  %3019 = vmatmul.mubr.bf16.gmra.mxu1 %v2469_v40 }
 0x342   :  { %v3056_v19 = vmax.f32 %v2777_v61, 0.0  ;;  %v3169_v44 = vpack.c.bf16 %v3055_v22, %v3053_v39  ;;  %v2781_v49 = vadd.f32 %v2780_v37, %v8788_v24 }
 0x343   :  { %v2782_v58 = vpop.f32.mrf.mxu1 }
 0x344   :  { %v3170_v31 = vpack.c.bf16 %v3056_v19, %v3054_v26  ;;  %v2783_v50 = vadd.f32 %v2782_v58, %v8783_v20  ;;  %v3057_v35 = vmax.f32 %v2781_v49, 0.0 }
 0x345   :  { %v2784_v47 = vpop.f32.mrf.mxu1 }
 0x346   :  { %v2785_v25 = vadd.f32 %v2784_v47, %v8788_v24  ;;  %3519 = vmatprep.mubr.bf16.mxu0 %v3170_v31  ;;  %v3058_v16 = vmax.f32 %v2783_v50, 0.0 }
 0x347   :  { %v2786_v53 = vpop.f32.mrf.mxu1  ;;  %3520 = vmatmul.mubr.bf16.gmra.mxu0 %v3169_v44 }
 0x348   :  { %v2787_v41 = vadd.f32 %v2786_v53, %v8783_v20  ;;  %v3059_v12 = vmax.f32 %v2785_v25, 0.0 }
 0x349   :  { %v2790_v28 = vpop.f32.mrf.mxu1 }
 0x34a   :  { %v3060_v30 = vmax.f32 %v2787_v41, 0.0  ;;  %v3171_v9 = vpack.c.bf16 %v3059_v12, %v3057_v35  ;;  %v2791_v15 = vadd.f32 %v2790_v28, %v8788_v24  ;;  %v6477_v12 = vld [vmem:[%s9436_s6 + $0x20] sm:$0xff]  }
 0x34b   :  { %v2792_v18 = vpop.f32.mrf.mxu1  ;;  %4865 = vmatpush1.bf16.msra.mxu0 %v6477_v12 }
 0x34c   :  { %v3172_v21 = vpack.c.bf16 %v3060_v30, %v3058_v16  ;;  %v2793_v62 = vadd.f32 %v2792_v18, %v8783_v20  ;;  %v3061_v36 = vmax.f32 %v2791_v15, 0.0  ;;  %4866 = vmatprep.subr.bf16.mxu0 %v9563_v60 }
 0x34d   :  { %v2794_v13 = vpop.f32.mrf.mxu1 }
 0x34e   :  { %v2795_v59 = vadd.f32 %v2794_v13, %v8788_v24  ;;  %3529 = vmatprep.mubr.bf16.mxu0 %v3172_v21  ;;  %v3062_v27 = vmax.f32 %v2793_v62, 0.0 }
 0x34f   :  { %v2796_v11 = vpop.f32.mrf.mxu1  ;;  %3530 = vmatmul.mubr.bf16.gmra.mxu0 %v3171_v9 }
 0x350   :  { %v2797_v55 = vadd.f32 %v2796_v11, %v8783_v20  ;;  %v3063_v51 = vmax.f32 %v2795_v59, 0.0 }
 0x351   :  { %v2800_v52 = vpop.f32.mrf.mxu1 }
 0x352   :  { %v3064_v54 = vmax.f32 %v2797_v55, 0.0  ;;  %v3173_v1 = vpack.c.bf16 %v3063_v51, %v3061_v36  ;;  %v2801_v17 = vadd.f32 %v2800_v52, %v8788_v24 }
 0x353   :  { %v2802_v63 = vpop.f32.mrf.mxu1 }
 0x354   :  { %v3174_v6 = vpack.c.bf16 %v3064_v54, %v3062_v27  ;;  %v2803_v0 = vadd.f32 %v2802_v63, %v8783_v20  ;;  %v3065_v2 = vmax.f32 %v2801_v17, 0.0 }
 0x355   :  { %v2804_v7 = vpop.f32.mrf.mxu1 }
 0x356   :  { %v2805_v34 = vadd.f32 %v2804_v7, %v8788_v24  ;;  %3539 = vmatprep.mubr.bf16.mxu0 %v3174_v6  ;;  %v3066_v57 = vmax.f32 %v2803_v0, 0.0 }
 0x357   :  { %v2806_v33 = vpop.f32.mrf.mxu1  ;;  %3540 = vmatmul.mubr.bf16.gmra.mxu0 %v3173_v1 }
 0x358   :  { %v2807_v43 = vadd.f32 %v2806_v33, %v8783_v20  ;;  %v3067_v5 = vmax.f32 %v2805_v34, 0.0  ;;  %v6478_v33 = vld [vmem:[%s9436_s6 + $0x18] sm:$0xff]  }
 0x359   :  { %v2810_v32 = vpop.f32.mrf.mxu1  ;;  %4867 = vmatpush1.bf16.msra.mxu0 %v6478_v33 }
 0x35a   :  { %v3068_v3 = vmax.f32 %v2807_v43, 0.0  ;;  %v3175_v14 = vpack.c.bf16 %v3067_v5, %v3065_v2  ;;  %v2811_v22 = vadd.f32 %v2810_v32, %v8788_v24  ;;  %4868 = vmatprep.subr.bf16.mxu0 %v9563_v60 }
 0x35b   :  { %v2812_v23 = vpop.f32.mrf.mxu1 }
 0x35c   :  { %v3176_v46 = vpack.c.bf16 %v3068_v3, %v3066_v57  ;;  %v2813_v8 = vadd.f32 %v2812_v23, %v8783_v20  ;;  %v3069_v44 = vmax.f32 %v2811_v22, 0.0 }
 0x35d   :  { %v2814_v40 = vpop.f32.mrf.mxu1 }
 0x35e   :  { %v2815_v39 = vadd.f32 %v2814_v40, %v8788_v24  ;;  %3549 = vmatprep.mubr.bf16.mxu0 %v3176_v46  ;;  %v3070_v58 = vmax.f32 %v2813_v8, 0.0 }
 0x35f   :  { %v2816_v61 = vpop.f32.mrf.mxu1  ;;  %3550 = vmatmul.mubr.bf16.gmra.mxu0 %v3175_v14 }
 0x360   :  { %v2817_v37 = vadd.f32 %v2816_v61, %v8783_v20  ;;  %v3071_v26 = vmax.f32 %v2815_v39, 0.0 }
 0x361   :  { %v2820_v19 = vpop.f32.mrf.mxu1 }
 0x362   :  { %v3072_v31 = vmax.f32 %v2817_v37, 0.0  ;;  %v3177_v25 = vpack.c.bf16 %v3071_v26, %v3069_v44  ;;  %v2821_v49 = vadd.f32 %v2820_v19, %v8788_v24 }
 0x363   :  { %v2822_v47 = vpop.f32.mrf.mxu1 }
 0x364   :  { %v3178_v50 = vpack.c.bf16 %v3072_v31, %v3070_v58  ;;  %v2823_v48 = vadd.f32 %v2822_v47, %v8783_v20  ;;  %v3073_v18 = vmax.f32 %v2821_v49, 0.0 }
 0x365   :  { %v2824_v45 = vpop.f32.mrf.mxu1 }
 0x366   :  { %v2825_v42 = vadd.f32 %v2824_v45, %v8788_v24  ;;  %3559 = vmatprep.mubr.bf16.mxu0 %v3178_v50  ;;  %v3074_v30 = vmax.f32 %v2823_v48, 0.0 }
 0x367   :  { %v2826_v53 = vpop.f32.mrf.mxu1  ;;  %3560 = vmatmul.mubr.bf16.gmra.mxu0 %v3177_v25 }
 0x368   :  { %v2827_v41 = vadd.f32 %v2826_v53, %v8783_v20  ;;  %v3075_v28 = vmax.f32 %v2825_v42, 0.0 }
 0x369   :  { %v2830_v16 = vpop.f32.mrf.mxu1 }
 0x36a   :  { %v3076_v35 = vmax.f32 %v2827_v41, 0.0  ;;  %v3179_v13 = vpack.c.bf16 %v3075_v28, %v3073_v18  ;;  %v2831_v11 = vadd.f32 %v2830_v16, %v8788_v24  ;;  %v6479_v41 = vld [vmem:[%s9436_s6 + $0x10] sm:$0xff]  }
 0x36b   :  { %v2832_v21 = vpop.f32.mrf.mxu1  ;;  %4869 = vmatpush1.bf16.msra.mxu0 %v6479_v41 }
 0x36c   :  { %v3180_v9 = vpack.c.bf16 %v3076_v35, %v3074_v30  ;;  %v2833_v59 = vadd.f32 %v2832_v21, %v8783_v20  ;;  %v3077_v63 = vmax.f32 %v2831_v11, 0.0  ;;  %4870 = vmatprep.subr.bf16.mxu0 %v9563_v60 }
 0x36d   :  { %v2834_v62 = vpop.f32.mrf.mxu1 }
 0x36e   :  { %v2835_v15 = vadd.f32 %v2834_v62, %v8788_v24  ;;  %3569 = vmatprep.mubr.bf16.mxu0 %v3180_v9  ;;  %v3078_v54 = vmax.f32 %v2833_v59, 0.0 }
 0x36f   :  { %v2836_v55 = vpop.f32.mrf.mxu1  ;;  %3570 = vmatmul.mubr.bf16.gmra.mxu0 %v3179_v13 }
 0x370   :  { %v2837_v51 = vadd.f32 %v2836_v55, %v8783_v20  ;;  %v3079_v52 = vmax.f32 %v2835_v15, 0.0 }
 0x371   :  { %v2840_v27 = vpop.f32.mrf.mxu1 }
 0x372   :  { %v3080_v36 = vmax.f32 %v2837_v51, 0.0  ;;  %v3181_v7 = vpack.c.bf16 %v3079_v52, %v3077_v63  ;;  %v2841_v4 = vadd.f32 %v2840_v27, %v8788_v24 }
 0x373   :  { %v2842_v6 = vpop.f32.mrf.mxu1 }
 0x374   :  { %v3182_v1 = vpack.c.bf16 %v3080_v36, %v3078_v54  ;;  %v2843_v34 = vadd.f32 %v2842_v6, %v8783_v20  ;;  %v3081_v3 = vmax.f32 %v2841_v4, 0.0 }
 0x375   :  { %v2844_v0 = vpop.f32.mrf.mxu1 }
 0x376   :  { %v2845_v38 = vadd.f32 %v2844_v0, %v8788_v24  ;;  %3579 = vmatprep.mubr.bf16.mxu0 %v3182_v1  ;;  %v3082_v32 = vmax.f32 %v2843_v34, 0.0 }
 0x377   :  { %v2846_v29 = vpop.f32.mrf.mxu1  ;;  %3580 = vmatmul.mubr.bf16.gmra.mxu0 %v3181_v7 }
 0x378   :  { %v2847_v17 = vadd.f32 %v2846_v29, %v8783_v20  ;;  %v3083_v43 = vmax.f32 %v2845_v38, 0.0 }
 0x379   :  { %v2850_v5 = vpop.f32.mrf.mxu1 }
 0x37a   :  { %v3084_v57 = vmax.f32 %v2847_v17, 0.0  ;;  %v3183_v46 = vpack.c.bf16 %v3083_v43, %v3081_v3  ;;  %v2851_v39 = vadd.f32 %v2850_v5, %v8788_v24  ;;  %v6480_v17 = vld [vmem:[%s9436_s6 + $0x8] sm:$0xff]  }
 0x37b   :  { %v2852_v2 = vpop.f32.mrf.mxu1  ;;  %4871 = vmatpush1.bf16.msra.mxu0 %v6480_v17 }
 0x37c   :  { %v3184_v23 = vpack.c.bf16 %v3084_v57, %v3082_v32  ;;  %v2853_v40 = vadd.f32 %v2852_v2, %v8783_v20  ;;  %v3085_v31 = vmax.f32 %v2851_v39, 0.0  ;;  %4872 = vmatprep.subr.bf16.mxu0 %v9563_v60 }
 0x37d   :  { %v2854_v14 = vpop.f32.mrf.mxu1 }
 0x37e   :  { %v2855_v8 = vadd.f32 %v2854_v14, %v8788_v24  ;;  %3589 = vmatprep.mubr.bf16.mxu0 %v3184_v23  ;;  %v3086_v19 = vmax.f32 %v2853_v40, 0.0 }
 0x37f   :  { %v2856_v22 = vpop.f32.mrf.mxu1  ;;  %3590 = vmatmul.mubr.bf16.gmra.mxu0 %v3183_v46 }
 0x380   :  { %v2857_v61 = vadd.f32 %v2856_v22, %v8783_v20  ;;  %v3087_v37 = vmax.f32 %v2855_v8, 0.0 }
 0x381   :  { %v2860_v26 = vpop.f32.mrf.mxu1 }
 0x382   :  { %v3088_v58 = vmax.f32 %v2857_v61, 0.0  ;;  %v3185_v50 = vpack.c.bf16 %v3087_v37, %v3085_v31  ;;  %v2861_v42 = vadd.f32 %v2860_v26, %v8788_v24 }
 0x383   :  { %v2862_v44 = vpop.f32.mrf.mxu1 }
 0x384   :  { %v3186_v47 = vpack.c.bf16 %v3088_v58, %v3086_v19  ;;  %v2863_v45 = vadd.f32 %v2862_v44, %v8783_v20  ;;  %v3089_v35 = vmax.f32 %v2861_v42, 0.0 }
 0x385   :  { %v2864_v25 = vpop.f32.mrf.mxu1 }
 0x386   :  { %v2865_v48 = vadd.f32 %v2864_v25, %v8788_v24  ;;  %3599 = vmatprep.mubr.bf16.mxu0 %v3186_v47  ;;  %v3090_v16 = vmax.f32 %v2863_v45, 0.0 }
 0x387   :  { %v2866_v49 = vpop.f32.mrf.mxu1  ;;  %3600 = vmatmul.mubr.bf16.gmra.mxu0 %v3185_v50 }
 0x388   :  { %v2867_v53 = vadd.f32 %v2866_v49, %v8783_v20  ;;  %v3091_v12 = vmax.f32 %v2865_v48, 0.0 }
 0x389   :  { %v2870_v28 = vpop.f32.mrf.mxu1 }
 0x38a   :  { %v3092_v30 = vmax.f32 %v2867_v53, 0.0  ;;  %v3187_v9 = vpack.c.bf16 %v3091_v12, %v3089_v35  ;;  %v2871_v15 = vadd.f32 %v2870_v28, %v8788_v24  ;;  %v6481_v53 = vld [vmem:[%s9436_s6] sm:$0xff]  }
 0x38b   :  { %v2872_v18 = vpop.f32.mrf.mxu1  ;;  %4873 = vmatpush1.bf16.msra.mxu0 %v6481_v53 }
 0x38c   :  { %v3188_v21 = vpack.c.bf16 %v3092_v30, %v3090_v16  ;;  %v2873_v62 = vadd.f32 %v2872_v18, %v8783_v20  ;;  %v3093_v36 = vmax.f32 %v2871_v15, 0.0  ;;  %4874 = vmatprep.subr.bf16.mxu0 %v9563_v60 }
 0x38d   :  { %v2874_v13 = vpop.f32.mrf.mxu1 }
 0x38e   :  { %v2875_v59 = vadd.f32 %v2874_v13, %v8788_v24  ;;  %3609 = vmatprep.mubr.bf16.mxu0 %v3188_v21  ;;  %v3094_v27 = vmax.f32 %v2873_v62, 0.0 }
 0x38f   :  { %v2876_v11 = vpop.f32.mrf.mxu1  ;;  %3610 = vmatmul.mubr.bf16.gmra.mxu0 %v3187_v9 }
 0x390   :  { %v2877_v55 = vadd.f32 %v2876_v11, %v8783_v20  ;;  %v3095_v51 = vmax.f32 %v2875_v59, 0.0 }
 0x391   :  { %v2880_v52 = vpop.f32.mrf.mxu1 }
 0x392   :  { %v3096_v54 = vmax.f32 %v2877_v55, 0.0  ;;  %v3189_v1 = vpack.c.bf16 %v3095_v51, %v3093_v36  ;;  %v2881_v38 = vadd.f32 %v2880_v52, %v8788_v24 }
 0x393   :  { %v2882_v63 = vpop.f32.mrf.mxu1 }
 0x394   :  { %v3190_v6 = vpack.c.bf16 %v3096_v54, %v3094_v27  ;;  %v2883_v0 = vadd.f32 %v2882_v63, %v8783_v20  ;;  %v3097_v57 = vmax.f32 %v2881_v38, 0.0 }
 0x395   :  { %v2884_v7 = vpop.f32.mrf.mxu1 }
 0x396   :  { %v2885_v34 = vadd.f32 %v2884_v7, %v8788_v24  ;;  %3619 = vmatprep.mubr.bf16.mxu0 %v3190_v6  ;;  %v3098_v5 = vmax.f32 %v2883_v0, 0.0 }
 0x397   :  { %v2886_v4 = vpop.f32.mrf.mxu1  ;;  %3620 = vmatmul.mubr.bf16.gmra.mxu0 %v3189_v1 }
 0x398   :  { %v2887_v29 = vadd.f32 %v2886_v4, %v8783_v20  ;;  %v3099_v33 = vmax.f32 %v2885_v34, 0.0 }
 0x399   :  { %v2890_v43 = vpop.f32.mrf.mxu1 }
 0x39a   :  { %v3100_v32 = vmax.f32 %v2887_v29, 0.0  ;;  %v3191_v23 = vpack.c.bf16 %v3099_v33, %v3097_v57  ;;  %v2891_v8 = vadd.f32 %v2890_v43, %v8788_v24  ;;  %v6482_v29 = vld [vmem:[%s9436_s6 + $0x78] sm:$0xff]  }
 0x39b   :  { %v2892_v3 = vpop.f32.mrf.mxu1  ;;  %4875 = vmatpush2.bf16.msra.mxu0 %v6482_v29 }
 0x39c   :  { %v3192_v2 = vpack.c.bf16 %v3100_v32, %v3098_v5  ;;  %v2893_v14 = vadd.f32 %v2892_v3, %v8783_v20  ;;  %v3101_v58 = vmax.f32 %v2891_v8, 0.0  ;;  %4876 = vmatprep.subr.bf16.mxu0 %v9563_v60 }
 0x39d   :  { %v2894_v46 = vpop.f32.mrf.mxu1 }
 0x39e   :  { %v2895_v40 = vadd.f32 %v2894_v46, %v8788_v24  ;;  %3629 = vmatprep.mubr.bf16.mxu0 %v3192_v2  ;;  %v3102_v26 = vmax.f32 %v2893_v14, 0.0 }
 0x39f   :  { %v2896_v39 = vpop.f32.mrf.mxu1  ;;  %3630 = vmatmul.mubr.bf16.gmra.mxu0 %v3191_v23 }
 0x3a0   :  { %v2897_v22 = vadd.f32 %v2896_v39, %v8783_v20  ;;  %v3103_v61 = vmax.f32 %v2895_v40, 0.0 }
 0x3a1   :  { %v2900_v37 = vpop.f32.mrf.mxu1 }
 0x3a2   :  { %v3104_v19 = vmax.f32 %v2897_v22, 0.0  ;;  %v3193_v47 = vpack.c.bf16 %v3103_v61, %v3101_v58  ;;  %v2901_v48 = vadd.f32 %v2900_v37, %v8788_v24 }
 0x3a3   :  { %v2902_v31 = vpop.f32.mrf.mxu1 }
 0x3a4   :  { %v3194_v44 = vpack.c.bf16 %v3104_v19, %v3102_v26  ;;  %v2903_v25 = vadd.f32 %v2902_v31, %v8783_v20  ;;  %v3105_v30 = vmax.f32 %v2901_v48, 0.0 }
 0x3a5   :  { %v2904_v50 = vpop.f32.mrf.mxu1 }
 0x3a6   :  { %v2905_v45 = vadd.f32 %v2904_v50, %v8788_v24  ;;  %3639 = vmatprep.mubr.bf16.mxu0 %v3194_v44  ;;  %v3106_v28 = vmax.f32 %v2903_v25, 0.0 }
 0x3a7   :  { %v2906_v42 = vpop.f32.mrf.mxu1  ;;  %3640 = vmatmul.mubr.bf16.gmra.mxu0 %v3193_v47 }
 0x3a8   :  { %v2907_v49 = vadd.f32 %v2906_v42, %v8783_v20  ;;  %v3107_v41 = vmax.f32 %v2905_v45, 0.0 }
 0x3a9   :  { %v2910_v12 = vpop.f32.mrf.mxu1 }
 0x3aa   :  { %v3108_v16 = vmax.f32 %v2907_v49, 0.0  ;;  %v3195_v21 = vpack.c.bf16 %v3107_v41, %v3105_v30  ;;  %v2911_v59 = vadd.f32 %v2910_v12, %v8788_v24  ;;  %v6483_v49 = vld [vmem:[%s9436_s6 + $0x70] sm:$0xff]  }
 0x3ab   :  { %v2912_v35 = vpop.f32.mrf.mxu1  ;;  %4877 = vmatpush2.bf16.msra.mxu0 %v6483_v49 }
 0x3ac   :  { %v3196_v18 = vpack.c.bf16 %v3108_v16, %v3106_v28  ;;  %v2913_v13 = vadd.f32 %v2912_v35, %v8783_v20  ;;  %v3109_v54 = vmax.f32 %v2911_v59, 0.0  ;;  %4878 = vmatprep.subr.bf16.mxu0 %v9563_v60 }
 0x3ad   :  { %v2914_v9 = vpop.f32.mrf.mxu1 }
 0x3ae   :  { %v2915_v62 = vadd.f32 %v2914_v9, %v8788_v24  ;;  %3649 = vmatprep.mubr.bf16.mxu0 %v3196_v18  ;;  %v3110_v52 = vmax.f32 %v2913_v13, 0.0 }
 0x3af   :  { %v2916_v15 = vpop.f32.mrf.mxu1  ;;  %3650 = vmatmul.mubr.bf16.gmra.mxu0 %v3195_v21 }
 0x3b0   :  { %v2917_v11 = vadd.f32 %v2916_v15, %v8783_v20  ;;  %v3111_v55 = vmax.f32 %v2915_v62, 0.0 }
 0x3b1   :  { %v2920_v51 = vpop.f32.mrf.mxu1 }
 0x3b2   :  { %v3112_v27 = vmax.f32 %v2917_v11, 0.0  ;;  %v3197_v6 = vpack.c.bf16 %v3111_v55, %v3109_v54  ;;  %v2921_v34 = vadd.f32 %v2920_v51, %v8788_v24 }
 0x3b3   :  { %v2922_v36 = vpop.f32.mrf.mxu1 }
 0x3b4   :  { %v3198_v63 = vpack.c.bf16 %v3112_v27, %v3110_v52  ;;  %v2923_v7 = vadd.f32 %v2922_v36, %v8783_v20  ;;  %v3113_v32 = vmax.f32 %v2921_v34, 0.0 }
 0x3b5   :  { %v2924_v1 = vpop.f32.mrf.mxu1 }
 0x3b6   :  { %v2925_v0 = vadd.f32 %v2924_v1, %v8788_v24  ;;  %3659 = vmatprep.mubr.bf16.mxu0 %v3198_v63  ;;  %v3114_v43 = vmax.f32 %v2923_v7, 0.0 }
 0x3b7   :  { %v2926_v38 = vpop.f32.mrf.mxu1  ;;  %3660 = vmatmul.mubr.bf16.gmra.mxu0 %v3197_v6 }
 0x3b8   :  { %v2927_v4 = vadd.f32 %v2926_v38, %v8783_v20  ;;  %v3115_v17 = vmax.f32 %v2925_v0, 0.0  ;;  %v5963_v38 = vld [vmem:[%s9435_s7 + $0x4] sm:$0x3] }
 0x3b9   :  { %v2930_v33 = vpop.f32.mrf.mxu1 }
 0x3ba   :  { %v3116_v5 = vmax.f32 %v2927_v4, 0.0  ;;  %v3199_v2 = vpack.c.bf16 %v3115_v17, %v3113_v32  ;;  %v2931_v40 = vadd.f32 %v2930_v33, %v8788_v24  ;;  %v6484_v17 = vld [vmem:[%s9436_s6 + $0x68] sm:$0xff]  }
 0x3bb   :  { %v2932_v57 = vpop.f32.mrf.mxu1  ;;  %4879 = vmatpush2.bf16.msra.mxu0 %v6484_v17 }
 0x3bc   :  { %v3200_v3 = vpack.c.bf16 %v3116_v5, %v3114_v43  ;;  %v2933_v46 = vadd.f32 %v2932_v57, %v8783_v20  ;;  %v3117_v19 = vmax.f32 %v2931_v40, 0.0  ;;  %v9039_v5 = vrot.slane %v5963_v38, %v9561_v56  ;;  %4880 = vmatprep.subr.bf16.mxu0 %v9563_v60 }
 0x3bd   :  { %v2934_v23 = vpop.f32.mrf.mxu1 }
 0x3be   :  { %v2935_v14 = vadd.f32 %v2934_v23, %v8788_v24  ;;  %3669 = vmatprep.mubr.bf16.mxu0 %v3200_v3  ;;  %v3118_v37 = vmax.f32 %v2933_v46, 0.0 }
 0x3bf   :  { %v2936_v8 = vpop.f32.mrf.mxu1  ;;  %3670 = vmatmul.mubr.bf16.gmra.mxu0 %v3199_v2  ;;  %v9042_v2 = vrot.slane %v5963_v38, %v9562_v10 }
 0x3c0   :  { %v2937_v39 = vadd.f32 %v2936_v8, %v8783_v20  ;;  %v3119_v22 = vmax.f32 %v2935_v14, 0.0 }
 0x3c1   :  { %v2940_v61 = vpop.f32.mrf.mxu1 }
 0x3c2   :  { %v3120_v26 = vmax.f32 %v2937_v39, 0.0  ;;  %v3201_v44 = vpack.c.bf16 %v3119_v22, %v3117_v19  ;;  %v2941_v45 = vadd.f32 %v2940_v61, %v8788_v24 }
 0x3c3   :  { %v2942_v58 = vpop.f32.mrf.mxu1 }
 0x3c4   :  { %v3202_v31 = vpack.c.bf16 %v3120_v26, %v3118_v37  ;;  %v2943_v50 = vadd.f32 %v2942_v58, %v8783_v20  ;;  %v3121_v16 = vmax.f32 %v2941_v45, 0.0 }
 0x3c5   :  { %v2944_v47 = vpop.f32.mrf.mxu1 }
 0x3c6   :  { %v2945_v25 = vadd.f32 %v2944_v47, %v8788_v24  ;;  %3679 = vmatprep.mubr.bf16.mxu0 %v3202_v31  ;;  %v3122_v12 = vmax.f32 %v2943_v50, 0.0 }
 0x3c7   :  { %v2946_v48 = vpop.f32.mrf.mxu1  ;;  %3680 = vmatmul.mubr.bf16.gmra.mxu0 %v3201_v44 }
 0x3c8   :  { %v2947_v42 = vadd.f32 %v2946_v48, %v8783_v20  ;;  %v3123_v53 = vmax.f32 %v2945_v25, 0.0 }
 0x3c9   :  { %v2950_v41 = vpop.f32.mrf.mxu1 }
 0x3ca   :  { %v3124_v28 = vmax.f32 %v2947_v42, 0.0  ;;  %v3203_v18 = vpack.c.bf16 %v3123_v53, %v3121_v16  ;;  %v2951_v62 = vadd.f32 %v2950_v41, %v8788_v24 }
 0x3cb   :  { %v2952_v30 = vpop.f32.mrf.mxu1 }
 0x3cc   :  { %v3204_v35 = vpack.c.bf16 %v3124_v28, %v3122_v12  ;;  %v2953_v9 = vadd.f32 %v2952_v30, %v8783_v20  ;;  %v3125_v27 = vmax.f32 %v2951_v62, 0.0 }
 0x3cd   :  { %v2954_v21 = vpop.f32.mrf.mxu1 }
 0x3ce   :  { %v2955_v13 = vadd.f32 %v2954_v21, %v8788_v24  ;;  %3689 = vmatprep.mubr.bf16.mxu0 %v3204_v35  ;;  %v3126_v51 = vmax.f32 %v2953_v9, 0.0 }
 0x3cf   :  { %v2956_v59 = vpop.f32.mrf.mxu1  ;;  %3690 = vmatmul.mubr.bf16.gmra.mxu0 %v3203_v18 }
 0x3d0   :  { %v2957_v15 = vadd.f32 %v2956_v59, %v8783_v20  ;;  %v3127_v11 = vmax.f32 %v2955_v13, 0.0 }
 0x3d1   :  { %v2960_v55 = vpop.f32.mrf.mxu1 }
 0x3d2   :  { %v3128_v52 = vmax.f32 %v2957_v15, 0.0  ;;  %v3205_v63 = vpack.c.bf16 %v3127_v11, %v3125_v27  ;;  %v2961_v0 = vadd.f32 %v2960_v55, %v8788_v24 }
 0x3d3   :  { %v2962_v54 = vpop.f32.mrf.mxu1 }
 0x3d4   :  { %v3206_v36 = vpack.c.bf16 %v3128_v52, %v3126_v51  ;;  %v2963_v1 = vadd.f32 %v2962_v54, %v8783_v20  ;;  %v3129_v23 = vmax.f32 %v2961_v0, 0.0 }
 0x3d5   :  { %v2964_v6 = vpop.f32.mrf.mxu1 }
 0x3d6   :  { %v2965_v7 = vadd.f32 %v2964_v6, %v8788_v24  ;;  %3699 = vmatprep.mubr.bf16.mxu0 %v3206_v36  ;;  %v3130_v57 = vmax.f32 %v2963_v1, 0.0 }
 0x3d7   :  { %v2966_v34 = vpop.f32.mrf.mxu1  ;;  %v3461_v4 = vpop.f32.mrf.mxu0  ;;  %3700 = vmatmul.mubr.bf16.gmra.mxu0 %v3205_v63 }
 0x3d8   :  { %v2967_v29 = vadd.f32 %v2966_v34, %v8783_v20  ;;  %v3131_v33 = vmax.f32 %v2965_v7, 0.0  ;;  %v3462_v26 = vadd.f32 %v3461_v4, %v9042_v2  ;;  %v6485_v34 = vld [vmem:[%s9436_s6 + $0x60] sm:$0xff]  }
 0x3d9   :  { %v2970_v43 = vpop.f32.mrf.mxu1  ;;  %v3463_v32 = vpop.f32.mrf.mxu0  ;;  %4881 = vmatpush2.bf16.msra.mxu0 %v6485_v34  ;;  %v6486_v34 = vld [vmem:[%s9436_s6 + $0x58] sm:$0xff]  }
 0x3da   :  { %v3132_v3 = vmax.f32 %v2967_v29, 0.0  ;;  %v3207_v39 = vpack.c.bf16 %v3131_v33, %v3129_v23  ;;  %v3464_v22 = vadd.f32 %v3463_v32, %v9039_v5  ;;  %v2971_v50 = vadd.f32 %v2970_v43, %v8788_v24  ;;  %4882 = vmatprep.subr.bf16.mxu0 %v9563_v60 }
 0x3db   :  { %v2972_v46 = vpop.f32.mrf.mxu1  ;;  %v3465_v14 = vpop.f32.mrf.mxu0  ;;  %v3780_v41 = vmax.f32 %v3462_v26, 0.0 }
 0x3dc   :  { %v3466_v40 = vadd.f32 %v3465_v14, %v9042_v2  ;;  %v3208_v8 = vpack.c.bf16 %v3132_v3, %v3130_v57  ;;  %v2973_v31 = vadd.f32 %v2972_v46, %v8783_v20  ;;  %v3781_v42 = vmax.f32 %v3464_v22, 0.0 }
 0x3dd   :  { %v2974_v61 = vpop.f32.mrf.mxu1  ;;  %v3467_v37 = vpop.f32.mrf.mxu0  ;;  %v3133_v21 = vmax.f32 %v2971_v50, 0.0  ;;  %4883 = vmatpush2.bf16.msra.mxu0 %v6486_v34 }
 0x3de   :  { %v2975_v19 = vadd.f32 %v2974_v61, %v8788_v24  ;;  %v3468_v58 = vadd.f32 %v3467_v37, %v9039_v5  ;;  %3709 = vmatprep.mubr.bf16.mxu0 %v3208_v8  ;;  %v3782_v25 = vmax.f32 %v3466_v40, 0.0  ;;  %v3134_v16 = vmax.f32 %v2973_v31, 0.0  ;;  %4884 = vmatprep.subr.bf16.mxu0 %v9563_v60 }
 0x3df   :  { %v2976_v44 = vpop.f32.mrf.mxu1  ;;  %v3471_v47 = vpop.f32.mrf.mxu0  ;;  %3710 = vmatmul.mubr.bf16.gmra.mxu0 %v3207_v39 }
 0x3e0   :  { %v3783_v45 = vmax.f32 %v3468_v58, 0.0  ;;  %v2977_v48 = vadd.f32 %v2976_v44, %v8783_v20  ;;  %v3135_v12 = vmax.f32 %v2975_v19, 0.0  ;;  %v3908_v9 = vpack.c.bf16 %v3782_v25, %v3780_v41 }
 0x3e1   :  { %v2980_v49 = vpop.f32.mrf.mxu1  ;;  %v3473_v53 = vpop.f32.mrf.mxu0  ;;  %v3472_v51 = vadd.f32 %v3471_v47, %v9042_v2 }
 0x3e2   :  { %v3136_v28 = vmax.f32 %v2977_v48, 0.0  ;;  %v3909_v18 = vpack.c.bf16 %v3783_v45, %v3781_v42  ;;  %v3474_v62 = vadd.f32 %v3473_v53, %v9039_v5  ;;  %v3209_v55 = vpack.c.bf16 %v3135_v12, %v3133_v21 }
 0x3e3   :  { %v2982_v30 = vpop.f32.mrf.mxu1  ;;  %v3475_v35 = vpop.f32.mrf.mxu0  ;;  %v2981_v6 = vadd.f32 %v2980_v49, %v8788_v24  ;;  %v3784_v17 = vmax.f32 %v3472_v51, 0.0 }
 0x3e4   :  { %v3476_v13 = vadd.f32 %v3475_v35, %v9042_v2  ;;  %4210 = vmatprep.mubr.bf16.mxu1 %v3909_v18  ;;  %v3210_v11 = vpack.c.bf16 %v3136_v28, %v3134_v16  ;;  %v2983_v54 = vadd.f32 %v2982_v30, %v8783_v20  ;;  %v3785_v38 = vmax.f32 %v3474_v62, 0.0 }
 0x3e5   :  { %v2984_v59 = vpop.f32.mrf.mxu1  ;;  %v3477_v15 = vpop.f32.mrf.mxu0  ;;  %4211 = vmatmul.mubr.bf16.vlgmr.msra.gmra.mxu1 %v3908_v9  ;;  %v3137_v46 = vmax.f32 %v2981_v6, 0.0 }
 0x3e6   :  { %v2985_v52 = vadd.f32 %v2984_v59, %v8788_v24  ;;  %v3478_v27 = vadd.f32 %v3477_v15, %v9039_v5  ;;  %3719 = vmatprep.mubr.bf16.mxu0 %v3210_v11  ;;  %v3786_v1 = vmax.f32 %v3476_v13, 0.0  ;;  %v3138_v32 = vmax.f32 %v2983_v54, 0.0 }
 0x3e7   :  { %v2986_v36 = vpop.f32.mrf.mxu1  ;;  %v3481_v63 = vpop.f32.mrf.mxu0  ;;  %3720 = vmatmul.mubr.bf16.gmra.mxu0 %v3209_v55 }
 0x3e8   :  { %v3787_v7 = vmax.f32 %v3478_v27, 0.0  ;;  %v2987_v0 = vadd.f32 %v2986_v36, %v8783_v20  ;;  %v3139_v33 = vmax.f32 %v2985_v52, 0.0  ;;  %v3910_v14 = vpack.c.bf16 %v3786_v1, %v3784_v17 }
 0x3e9   :  { %v2990_v4 = vpop.f32.mrf.mxu1  ;;  %v3483_v29 = vpop.f32.mrf.mxu0  ;;  %v3482_v26 = vadd.f32 %v3481_v63, %v9042_v2 }
 0x3ea   :  { %v3140_v43 = vmax.f32 %v2987_v0, 0.0  ;;  %v3911_v23 = vpack.c.bf16 %v3787_v7, %v3785_v38  ;;  %v3484_v8 = vadd.f32 %v3483_v29, %v9039_v5  ;;  %v3211_v37 = vpack.c.bf16 %v3139_v33, %v3137_v46 }
 0x3eb   :  { %v2992_v57 = vpop.f32.mrf.mxu1  ;;  %v3485_v3 = vpop.f32.mrf.mxu0  ;;  %v2991_v50 = vadd.f32 %v2990_v4, %v8788_v24  ;;  %v3788_v41 = vmax.f32 %v3482_v26, 0.0 }
 0x3ec   :  { %v3486_v40 = vadd.f32 %v3485_v3, %v9042_v2  ;;  %4220 = vmatprep.mubr.bf16.mxu1 %v3911_v23  ;;  %v3212_v61 = vpack.c.bf16 %v3140_v43, %v3138_v32  ;;  %v2993_v31 = vadd.f32 %v2992_v57, %v8783_v20  ;;  %v3789_v42 = vmax.f32 %v3484_v8, 0.0 }
 0x3ed   :  { %v2994_v39 = vpop.f32.mrf.mxu1  ;;  %v3487_v22 = vpop.f32.mrf.mxu0  ;;  %4221 = vmatmul.mubr.bf16.gmra.mxu1 %v3910_v14  ;;  %v3141_v21 = vmax.f32 %v2991_v50, 0.0 }
 0x3ee   :  { %v2995_v19 = vadd.f32 %v2994_v39, %v8788_v24  ;;  %v3488_v58 = vadd.f32 %v3487_v22, %v9039_v5  ;;  %3729 = vmatprep.mubr.bf16.mxu0 %v3212_v61  ;;  %v3790_v25 = vmax.f32 %v3486_v40, 0.0  ;;  %v3142_v16 = vmax.f32 %v2993_v31, 0.0 }
 0x3ef   :  { %v2996_v44 = vpop.f32.mrf.mxu1  ;;  %v3491_v47 = vpop.f32.mrf.mxu0  ;;  %3730 = vmatmul.mubr.bf16.gmra.mxu0 %v3211_v37 }
 0x3f0   :  { %v3791_v45 = vmax.f32 %v3488_v58, 0.0  ;;  %v2997_v48 = vadd.f32 %v2996_v44, %v8783_v20  ;;  %v3143_v12 = vmax.f32 %v2995_v19, 0.0  ;;  %v3912_v9 = vpack.c.bf16 %v3790_v25, %v3788_v41 }
 0x3f1   :  { %v3000_v49 = vpop.f32.mrf.mxu1  ;;  %v3493_v53 = vpop.f32.mrf.mxu0  ;;  %v3492_v51 = vadd.f32 %v3491_v47, %v9042_v2 }
 0x3f2   :  { %v3144_v28 = vmax.f32 %v2997_v48, 0.0  ;;  %v3913_v18 = vpack.c.bf16 %v3791_v45, %v3789_v42  ;;  %v3494_v62 = vadd.f32 %v3493_v53, %v9039_v5  ;;  %v3213_v55 = vpack.c.bf16 %v3143_v12, %v3141_v21 }
 0x3f3   :  { %v3002_v30 = vpop.f32.mrf.mxu1  ;;  %v3495_v35 = vpop.f32.mrf.mxu0  ;;  %v3001_v6 = vadd.f32 %v3000_v49, %v8788_v24  ;;  %v3792_v17 = vmax.f32 %v3492_v51, 0.0 }
 0x3f4   :  { %v3496_v13 = vadd.f32 %v3495_v35, %v9042_v2  ;;  %4230 = vmatprep.mubr.bf16.mxu1 %v3913_v18  ;;  %v3214_v11 = vpack.c.bf16 %v3144_v28, %v3142_v16  ;;  %v3003_v54 = vadd.f32 %v3002_v30, %v8783_v20  ;;  %v3793_v38 = vmax.f32 %v3494_v62, 0.0 }
 0x3f5   :  { %v3004_v59 = vpop.f32.mrf.mxu1  ;;  %v3497_v15 = vpop.f32.mrf.mxu0  ;;  %4231 = vmatmul.mubr.bf16.gmra.mxu1 %v3912_v9  ;;  %v3145_v46 = vmax.f32 %v3001_v6, 0.0 }
 0x3f6   :  { %v3005_v52 = vadd.f32 %v3004_v59, %v8788_v24  ;;  %v3498_v27 = vadd.f32 %v3497_v15, %v9039_v5  ;;  %3739 = vmatprep.mubr.bf16.mxu0 %v3214_v11  ;;  %v3794_v1 = vmax.f32 %v3496_v13, 0.0  ;;  %v3146_v32 = vmax.f32 %v3003_v54, 0.0 }
 0x3f7   :  { %v3006_v36 = vpop.f32.mrf.mxu1  ;;  %v3501_v63 = vpop.f32.mrf.mxu0  ;;  %3740 = vmatmul.mubr.bf16.gmra.mxu0 %v3213_v55 }
 0x3f8   :  { %v3795_v7 = vmax.f32 %v3498_v27, 0.0  ;;  %v3007_v0 = vadd.f32 %v3006_v36, %v8783_v20  ;;  %v3147_v33 = vmax.f32 %v3005_v52, 0.0  ;;  %v3914_v14 = vpack.c.bf16 %v3794_v1, %v3792_v17 }
 0x3f9   :  { %v3010_v4 = vpop.f32.mrf.mxu1  ;;  %v3503_v29 = vpop.f32.mrf.mxu0  ;;  %v3502_v26 = vadd.f32 %v3501_v63, %v9042_v2 }
 0x3fa   :  { %v3148_v43 = vmax.f32 %v3007_v0, 0.0  ;;  %v3915_v23 = vpack.c.bf16 %v3795_v7, %v3793_v38  ;;  %v3504_v8 = vadd.f32 %v3503_v29, %v9039_v5  ;;  %v3215_v37 = vpack.c.bf16 %v3147_v33, %v3145_v46  ;;  %v6487_v38 = vld [vmem:[%s9436_s6 + $0x50] sm:$0xff]  }
 0x3fb   :  { %v3012_v57 = vpop.f32.mrf.mxu1  ;;  %v3505_v3 = vpop.f32.mrf.mxu0  ;;  %v3011_v50 = vadd.f32 %v3010_v4, %v8788_v24  ;;  %v3796_v41 = vmax.f32 %v3502_v26, 0.0  ;;  %4885 = vmatpush2.bf16.msra.mxu0 %v6487_v38 }
 0x3fc   :  { %v3506_v40 = vadd.f32 %v3505_v3, %v9042_v2  ;;  %4240 = vmatprep.mubr.bf16.mxu1 %v3915_v23  ;;  %v3216_v61 = vpack.c.bf16 %v3148_v43, %v3146_v32  ;;  %v3013_v31 = vadd.f32 %v3012_v57, %v8783_v20  ;;  %v3797_v42 = vmax.f32 %v3504_v8, 0.0  ;;  %4886 = vmatprep.subr.bf16.mxu0 %v9563_v60 }
 0x3fd   :  { %v3014_v39 = vpop.f32.mrf.mxu1  ;;  %v3507_v22 = vpop.f32.mrf.mxu0  ;;  %4241 = vmatmul.mubr.bf16.gmra.mxu1 %v3914_v14  ;;  %v3149_v21 = vmax.f32 %v3011_v50, 0.0 }
 0x3fe   :  { %v3015_v19 = vadd.f32 %v3014_v39, %v8788_v24  ;;  %v3508_v58 = vadd.f32 %v3507_v22, %v9039_v5  ;;  %3749 = vmatprep.mubr.bf16.mxu0 %v3216_v61  ;;  %v3798_v25 = vmax.f32 %v3506_v40, 0.0  ;;  %v3150_v16 = vmax.f32 %v3013_v31, 0.0 }
 0x3ff   :  { %v3016_v44 = vpop.f32.mrf.mxu1  ;;  %v3511_v47 = vpop.f32.mrf.mxu0  ;;  %3750 = vmatmul.mubr.bf16.gmra.mxu0 %v3215_v37 }
 0x400   :  { %v3799_v45 = vmax.f32 %v3508_v58, 0.0  ;;  %v3017_v48 = vadd.f32 %v3016_v44, %v8783_v20  ;;  %v3151_v12 = vmax.f32 %v3015_v19, 0.0  ;;  %v3916_v9 = vpack.c.bf16 %v3798_v25, %v3796_v41 }
 0x401   :  { %v3020_v49 = vpop.f32.mrf.mxu1  ;;  %v3513_v53 = vpop.f32.mrf.mxu0  ;;  %v3512_v59 = vadd.f32 %v3511_v47, %v9042_v2 }
 0x402   :  { %v3152_v28 = vmax.f32 %v3017_v48, 0.0  ;;  %v3917_v18 = vpack.c.bf16 %v3799_v45, %v3797_v42  ;;  %v3514_v13 = vadd.f32 %v3513_v53, %v9039_v5  ;;  %v3217_v51 = vpack.c.bf16 %v3151_v12, %v3149_v21 }
 0x403   :  { %v3022_v30 = vpop.f32.mrf.mxu1  ;;  %v3515_v35 = vpop.f32.mrf.mxu0  ;;  %v3021_v36 = vadd.f32 %v3020_v49, %v8788_v24  ;;  %v3800_v4 = vmax.f32 %v3512_v59, 0.0 }
 0x404   :  { %v3516_v62 = vadd.f32 %v3515_v35, %v9042_v2  ;;  %4250 = vmatprep.mubr.bf16.mxu1 %v3917_v18  ;;  %v3218_v55 = vpack.c.bf16 %v3152_v28, %v3150_v16  ;;  %v3023_v52 = vadd.f32 %v3022_v30, %v8783_v20  ;;  %v3801_v1 = vmax.f32 %v3514_v13, 0.0  ;;  %v6488_v28 = vld [vmem:[%s9436_s6 + $0x48] sm:$0xff]  }
 0x405   :  { %v3024_v15 = vpop.f32.mrf.mxu1  ;;  %v3517_v11 = vpop.f32.mrf.mxu0  ;;  %4251 = vmatmul.mubr.bf16.gmra.mxu1 %v3916_v9  ;;  %4887 = vmatpush2.bf16.msra.mxu0 %v6488_v28 }
 0x406   :  { %v3025_v27 = vadd.f32 %v3024_v15, %v8788_v24  ;;  %v3518_v54 = vadd.f32 %v3517_v11, %v9039_v5  ;;  %3759 = vmatprep.mubr.bf16.mxu0 %v3218_v55  ;;  %v3802_v7 = vmax.f32 %v3516_v62, 0.0  ;;  %v3154_v17 = vmax.f32 %v3023_v52, 0.0  ;;  %4888 = vmatprep.subr.bf16.mxu0 %v9563_v60 }
 0x407   :  { %v3026_v63 = vpop.f32.mrf.mxu1  ;;  %v3521_v6 = vpop.f32.mrf.mxu0  ;;  %3760 = vmatmul.mubr.bf16.gmra.mxu0 %v3217_v51  ;;  %v3153_v24 = vmax.f32 %v3021_v36, 0.0 }
 0x408   :  { %v3803_v0 = vmax.f32 %v3518_v54, 0.0  ;;  %v3027_v34 = vadd.f32 %v3026_v63, %v8783_v20  ;;  %v3155_v33 = vmax.f32 %v3025_v27, 0.0  ;;  %v3918_v3 = vpack.c.bf16 %v3802_v7, %v3800_v4 }
 0x409   :  { %v3523_v29 = vpop.f32.mrf.mxu0  ;;  %v3522_v8 = vadd.f32 %v3521_v6, %v9042_v2 }
 0x40a   :  { %v3156_v43 = vmax.f32 %v3027_v34, 0.0  ;;  %v3919_v32 = vpack.c.bf16 %v3803_v0, %v3801_v1  ;;  %v3524_v23 = vadd.f32 %v3523_v29, %v9039_v5  ;;  %v3219_v40 = vpack.c.bf16 %v3155_v33, %v3153_v24  ;;  %v6489_v33 = vld [vmem:[%s9436_s6 + $0x40] sm:$0xff]  }
 0x40b   :  { %v3525_v57 = vpop.f32.mrf.mxu0  ;;  %v3804_v58 = vmax.f32 %v3522_v8, 0.0  ;;  %4889 = vmatpush2.bf16.msra.mxu0 %v6489_v33 }
 0x40c   :  { %v3526_v20 = vadd.f32 %v3525_v57, %v9042_v2  ;;  %4260 = vmatprep.mubr.bf16.mxu1 %v3919_v32  ;;  %v3220_v46 = vpack.c.bf16 %v3156_v43, %v3154_v17  ;;  %v3805_v61 = vmax.f32 %v3524_v23, 0.0 }
 0x40d   :  { %v3527_v14 = vpop.f32.mrf.mxu0  ;;  %4261 = vmatmul.mubr.bf16.gmra.mxu1 %v3918_v3 }
 0x40e   :  { %v3528_v39 = vadd.f32 %v3527_v14, %v9039_v5  ;;  %3769 = vmatprep.mubr.bf16.mxu0 %v3220_v46  ;;  %v3806_v37 = vmax.f32 %v3526_v20, 0.0 }
 0x40f   :  { %v3531_v22 = vpop.f32.mrf.mxu0  ;;  %3770 = vmatmul.mubr.bf16.gmra.mxu0 %v3219_v40 }
 0x410   :  { %v3807_v26 = vmax.f32 %v3528_v39, 0.0  ;;  %v3920_v47 = vpack.c.bf16 %v3806_v37, %v3804_v58  ;;  %v3532_v48 = vadd.f32 %v3531_v22, %v9042_v2 }
 0x411   :  { %v3533_v19 = vpop.f32.mrf.mxu0 }
 0x412   :  { %v3921_v31 = vpack.c.bf16 %v3807_v26, %v3805_v61  ;;  %v3534_v50 = vadd.f32 %v3533_v19, %v9039_v5  ;;  %v3808_v30 = vmax.f32 %v3532_v48, 0.0 }
 0x413   :  { %v3535_v44 = vpop.f32.mrf.mxu0 }
 0x414   :  { %v3536_v25 = vadd.f32 %v3535_v44, %v9042_v2  ;;  %4270 = vmatprep.mubr.bf16.mxu1 %v3921_v31  ;;  %v3809_v53 = vmax.f32 %v3534_v50, 0.0 }
 0x415   :  { %v3537_v45 = vpop.f32.mrf.mxu0  ;;  %4271 = vmatmul.mubr.bf16.gmra.mxu1 %v3920_v47 }
 0x416   :  { %v3538_v42 = vadd.f32 %v3537_v45, %v9039_v5  ;;  %v3810_v41 = vmax.f32 %v3536_v25, 0.0 }
 0x417   :  { %v3541_v49 = vpop.f32.mrf.mxu0 }
 0x418   :  { %v3811_v12 = vmax.f32 %v3538_v42, 0.0  ;;  %v3922_v21 = vpack.c.bf16 %v3810_v41, %v3808_v30  ;;  %v3542_v59 = vadd.f32 %v3541_v49, %v9042_v2 }
 0x419   :  { %v3543_v16 = vpop.f32.mrf.mxu0 }
 0x41a   :  { %v3923_v35 = vpack.c.bf16 %v3811_v12, %v3809_v53  ;;  %v3544_v9 = vadd.f32 %v3543_v16, %v9039_v5  ;;  %v3812_v54 = vmax.f32 %v3542_v59, 0.0 }
 0x41b   :  { %v3545_v18 = vpop.f32.mrf.mxu0 }
 0x41c   :  { %v3546_v13 = vadd.f32 %v3545_v18, %v9042_v2  ;;  %4280 = vmatprep.mubr.bf16.mxu1 %v3923_v35  ;;  %v3813_v55 = vmax.f32 %v3544_v9, 0.0 }
 0x41d   :  { %v3547_v62 = vpop.f32.mrf.mxu0  ;;  %4281 = vmatmul.mubr.bf16.gmra.mxu1 %v3922_v21 }
 0x41e   :  { %v3548_v15 = vadd.f32 %v3547_v62, %v9039_v5  ;;  %v3814_v51 = vmax.f32 %v3546_v13, 0.0 }
 0x41f   :  { %v3551_v11 = vpop.f32.mrf.mxu0 }
 0x420   :  { %v3815_v52 = vmax.f32 %v3548_v15, 0.0  ;;  %v3924_v63 = vpack.c.bf16 %v3814_v51, %v3812_v54  ;;  %v3552_v0 = vadd.f32 %v3551_v11, %v9042_v2 }
 0x421   :  { %v3553_v27 = vpop.f32.mrf.mxu0 }
 0x422   :  { %v3925_v36 = vpack.c.bf16 %v3815_v52, %v3813_v55  ;;  %v3554_v6 = vadd.f32 %v3553_v27, %v9039_v5  ;;  %v3816_v32 = vmax.f32 %v3552_v0, 0.0 }
 0x423   :  { %v3555_v60 = vpop.f32.mrf.mxu0 }
 0x424   :  { %v3556_v1 = vadd.f32 %v3555_v60, %v9042_v2  ;;  %4290 = vmatprep.mubr.bf16.mxu1 %v3925_v36  ;;  %v3817_v4 = vmax.f32 %v3554_v6, 0.0 }
 0x425   :  { %v3557_v7 = vpop.f32.mrf.mxu0  ;;  %4291 = vmatmul.mubr.bf16.gmra.mxu1 %v3924_v63 }
 0x426   :  { %v3558_v34 = vadd.f32 %v3557_v7, %v9039_v5  ;;  %v3818_v29 = vmax.f32 %v3556_v1, 0.0 }
 0x427   :  { %v3561_v38 = vpop.f32.mrf.mxu0 }
 0x428   :  { %v3819_v17 = vmax.f32 %v3558_v34, 0.0  ;;  %v3926_v3 = vpack.c.bf16 %v3818_v29, %v3816_v32  ;;  %v3562_v14 = vadd.f32 %v3561_v38, %v9042_v2 }
 0x429   :  { %v3563_v43 = vpop.f32.mrf.mxu0 }
 0x42a   :  { %v3927_v24 = vpack.c.bf16 %v3819_v17, %v3817_v4  ;;  %v3564_v23 = vadd.f32 %v3563_v43, %v9039_v5  ;;  %v3820_v26 = vmax.f32 %v3562_v14, 0.0 }
 0x42b   :  { %v3565_v57 = vpop.f32.mrf.mxu0 }
 0x42c   :  { %v3566_v20 = vadd.f32 %v3565_v57, %v9042_v2  ;;  %4300 = vmatprep.mubr.bf16.mxu1 %v3927_v24  ;;  %v3821_v39 = vmax.f32 %v3564_v23, 0.0 }
 0x42d   :  { %v3567_v46 = vpop.f32.mrf.mxu0  ;;  %4301 = vmatmul.mubr.bf16.gmra.mxu1 %v3926_v3 }
 0x42e   :  { %v3568_v40 = vadd.f32 %v3567_v46, %v9039_v5  ;;  %v3822_v22 = vmax.f32 %v3566_v20, 0.0 }
 0x42f   :  { %v3571_v8 = vpop.f32.mrf.mxu0 }
 0x430   :  { %v3823_v61 = vmax.f32 %v3568_v40, 0.0  ;;  %v3928_v31 = vpack.c.bf16 %v3822_v22, %v3820_v26  ;;  %v3572_v25 = vadd.f32 %v3571_v8, %v9042_v2 }
 0x431   :  { %v3573_v37 = vpop.f32.mrf.mxu0 }
 0x432   :  { %v3929_v19 = vpack.c.bf16 %v3823_v61, %v3821_v39  ;;  %v3574_v44 = vadd.f32 %v3573_v37, %v9039_v5  ;;  %v3824_v12 = vmax.f32 %v3572_v25, 0.0 }
 0x433   :  { %v3575_v58 = vpop.f32.mrf.mxu0 }
 0x434   :  { %v3576_v47 = vadd.f32 %v3575_v58, %v9042_v2  ;;  %4310 = vmatprep.mubr.bf16.mxu1 %v3929_v19  ;;  %v3825_v42 = vmax.f32 %v3574_v44, 0.0 }
 0x435   :  { %v3577_v50 = vpop.f32.mrf.mxu0  ;;  %4311 = vmatmul.mubr.bf16.gmra.mxu1 %v3928_v31 }
 0x436   :  { %v3578_v45 = vadd.f32 %v3577_v50, %v9039_v5  ;;  %v3826_v49 = vmax.f32 %v3576_v47, 0.0 }
 0x437   :  { %v3581_v48 = vpop.f32.mrf.mxu0 }
 0x438   :  { %v3827_v53 = vmax.f32 %v3578_v45, 0.0  ;;  %v3930_v30 = vpack.c.bf16 %v3826_v49, %v3824_v12  ;;  %v3582_v9 = vadd.f32 %v3581_v48, %v9042_v2 }
 0x439   :  { %v3583_v41 = vpop.f32.mrf.mxu0 }
 0x43a   :  { %v3931_v28 = vpack.c.bf16 %v3827_v53, %v3825_v42  ;;  %v3584_v35 = vadd.f32 %v3583_v41, %v9039_v5  ;;  %v3828_v51 = vmax.f32 %v3582_v9, 0.0 }
 0x43b   :  { %v3585_v16 = vpop.f32.mrf.mxu0 }
 0x43c   :  { %v3586_v18 = vadd.f32 %v3585_v16, %v9042_v2  ;;  %4320 = vmatprep.mubr.bf16.mxu1 %v3931_v28  ;;  %v3829_v59 = vmax.f32 %v3584_v35, 0.0 }
 0x43d   :  { %v3587_v21 = vpop.f32.mrf.mxu0  ;;  %4321 = vmatmul.mubr.bf16.gmra.mxu1 %v3930_v30 }
 0x43e   :  { %v3588_v13 = vadd.f32 %v3587_v21, %v9039_v5  ;;  %v3830_v15 = vmax.f32 %v3586_v18, 0.0 }
 0x43f   :  { %v3591_v62 = vpop.f32.mrf.mxu0 }
 0x440   :  { %v3831_v11 = vmax.f32 %v3588_v13, 0.0  ;;  %v3932_v54 = vpack.c.bf16 %v3830_v15, %v3828_v51  ;;  %v3592_v6 = vadd.f32 %v3591_v62, %v9042_v2 }
 0x441   :  { %v3593_v55 = vpop.f32.mrf.mxu0 }
 0x442   :  { %v3933_v52 = vpack.c.bf16 %v3831_v11, %v3829_v59  ;;  %v3594_v36 = vadd.f32 %v3593_v55, %v9039_v5  ;;  %v3832_v29 = vmax.f32 %v3592_v6, 0.0 }
 0x443   :  { %v3595_v27 = vpop.f32.mrf.mxu0 }
 0x444   :  { %v3596_v60 = vadd.f32 %v3595_v27, %v9042_v2  ;;  %4330 = vmatprep.mubr.bf16.mxu1 %v3933_v52  ;;  %v3833_v0 = vmax.f32 %v3594_v36, 0.0 }
 0x445   :  { %v3597_v63 = vpop.f32.mrf.mxu0  ;;  %4331 = vmatmul.mubr.bf16.gmra.mxu1 %v3932_v54 }
 0x446   :  { %v3598_v1 = vadd.f32 %v3597_v63, %v9039_v5  ;;  %v3834_v34 = vmax.f32 %v3596_v60, 0.0 }
 0x447   :  { %v3601_v7 = vpop.f32.mrf.mxu0 }
 0x448   :  { %v3835_v38 = vmax.f32 %v3598_v1, 0.0  ;;  %v3934_v43 = vpack.c.bf16 %v3834_v34, %v3832_v29  ;;  %v3602_v3 = vadd.f32 %v3601_v7, %v9042_v2 }
 0x449   :  { %v3603_v4 = vpop.f32.mrf.mxu0 }
 0x44a   :  { %v3935_v17 = vpack.c.bf16 %v3835_v38, %v3833_v0  ;;  %v3604_v32 = vadd.f32 %v3603_v4, %v9039_v5  ;;  %v3836_v39 = vmax.f32 %v3602_v3, 0.0 }
 0x44b   :  { %v3605_v33 = vpop.f32.mrf.mxu0 }
 0x44c   :  { %v3606_v24 = vadd.f32 %v3605_v33, %v9042_v2  ;;  %4340 = vmatprep.mubr.bf16.mxu1 %v3935_v17  ;;  %v3837_v46 = vmax.f32 %v3604_v32, 0.0 }
 0x44d   :  { %v3607_v57 = vpop.f32.mrf.mxu0  ;;  %4341 = vmatmul.mubr.bf16.gmra.mxu1 %v3934_v43 }
 0x44e   :  { %v3608_v23 = vadd.f32 %v3607_v57, %v9039_v5  ;;  %v3838_v14 = vmax.f32 %v3606_v24, 0.0 }
 0x44f   :  { %v3611_v20 = vpop.f32.mrf.mxu0 }
 0x450   :  { %v3839_v40 = vmax.f32 %v3608_v23, 0.0  ;;  %v3936_v37 = vpack.c.bf16 %v3838_v14, %v3836_v39  ;;  %v3612_v31 = vadd.f32 %v3611_v20, %v9042_v2 }
 0x451   :  { %v3613_v8 = vpop.f32.mrf.mxu0 }
 0x452   :  { %v3937_v22 = vpack.c.bf16 %v3839_v40, %v3837_v46  ;;  %v3614_v26 = vadd.f32 %v3613_v8, %v9039_v5  ;;  %v3840_v42 = vmax.f32 %v3612_v31, 0.0 }
 0x453   :  { %v3615_v61 = vpop.f32.mrf.mxu0 }
 0x454   :  { %v3616_v19 = vadd.f32 %v3615_v61, %v9042_v2  ;;  %4350 = vmatprep.mubr.bf16.mxu1 %v3937_v22  ;;  %v3841_v50 = vmax.f32 %v3614_v26, 0.0 }
 0x455   :  { %v3617_v58 = vpop.f32.mrf.mxu0  ;;  %4351 = vmatmul.mubr.bf16.gmra.mxu1 %v3936_v37 }
 0x456   :  { %v3618_v44 = vadd.f32 %v3617_v58, %v9039_v5  ;;  %v3842_v25 = vmax.f32 %v3616_v19, 0.0 }
 0x457   :  { %v3621_v47 = vpop.f32.mrf.mxu0 }
 0x458   :  { %v3843_v45 = vmax.f32 %v3618_v44, 0.0  ;;  %v3938_v41 = vpack.c.bf16 %v3842_v25, %v3840_v42  ;;  %v3622_v30 = vadd.f32 %v3621_v47, %v9042_v2 }
 0x459   :  { %v3623_v48 = vpop.f32.mrf.mxu0 }
 0x45a   :  { %v3939_v49 = vpack.c.bf16 %v3843_v45, %v3841_v50  ;;  %v3624_v12 = vadd.f32 %v3623_v48, %v9039_v5  ;;  %v3844_v59 = vmax.f32 %v3622_v30, 0.0 }
 0x45b   :  { %v3625_v53 = vpop.f32.mrf.mxu0 }
 0x45c   :  { %v3626_v28 = vadd.f32 %v3625_v53, %v9042_v2  ;;  %4360 = vmatprep.mubr.bf16.mxu1 %v3939_v49  ;;  %v3845_v21 = vmax.f32 %v3624_v12, 0.0 }
 0x45d   :  { %v3627_v16 = vpop.f32.mrf.mxu0  ;;  %4361 = vmatmul.mubr.bf16.gmra.mxu1 %v3938_v41 }
 0x45e   :  { %v3628_v35 = vadd.f32 %v3627_v16, %v9039_v5  ;;  %v3846_v9 = vmax.f32 %v3626_v28, 0.0 }
 0x45f   :  { %v3631_v18 = vpop.f32.mrf.mxu0 }
 0x460   :  { %v3847_v13 = vmax.f32 %v3628_v35, 0.0  ;;  %v3940_v55 = vpack.c.bf16 %v3846_v9, %v3844_v59  ;;  %v3632_v54 = vadd.f32 %v3631_v18, %v9042_v2 }
 0x461   :  { %v3633_v62 = vpop.f32.mrf.mxu0 }
 0x462   :  { %v3941_v15 = vpack.c.bf16 %v3847_v13, %v3845_v21  ;;  %v3634_v51 = vadd.f32 %v3633_v62, %v9039_v5  ;;  %v3848_v0 = vmax.f32 %v3632_v54, 0.0 }
 0x463   :  { %v3635_v11 = vpop.f32.mrf.mxu0 }
 0x464   :  { %v3636_v52 = vadd.f32 %v3635_v11, %v9042_v2  ;;  %4370 = vmatprep.mubr.bf16.mxu1 %v3941_v15  ;;  %v3849_v63 = vmax.f32 %v3634_v51, 0.0 }
 0x465   :  { %v3637_v27 = vpop.f32.mrf.mxu0  ;;  %4371 = vmatmul.mubr.bf16.gmra.mxu1 %v3940_v55 }
 0x466   :  { %v3638_v36 = vadd.f32 %v3637_v27, %v9039_v5  ;;  %v3850_v6 = vmax.f32 %v3636_v52, 0.0 }
 0x467   :  { %v3641_v60 = vpop.f32.mrf.mxu0 }
 0x468   :  { %v3851_v1 = vmax.f32 %v3638_v36, 0.0  ;;  %v3942_v4 = vpack.c.bf16 %v3850_v6, %v3848_v0  ;;  %v3642_v43 = vadd.f32 %v3641_v60, %v9042_v2 }
 0x469   :  { %v3643_v7 = vpop.f32.mrf.mxu0 }
 0x46a   :  { %v3943_v34 = vpack.c.bf16 %v3851_v1, %v3849_v63  ;;  %v3644_v29 = vadd.f32 %v3643_v7, %v9039_v5  ;;  %v3852_v46 = vmax.f32 %v3642_v43, 0.0 }
 0x46b   :  { %v3645_v38 = vpop.f32.mrf.mxu0 }
 0x46c   :  { %v3646_v17 = vadd.f32 %v3645_v38, %v9042_v2  ;;  %4380 = vmatprep.mubr.bf16.mxu1 %v3943_v34  ;;  %v3853_v57 = vmax.f32 %v3644_v29, 0.0 }
 0x46d   :  { %v3647_v33 = vpop.f32.mrf.mxu0  ;;  %4381 = vmatmul.mubr.bf16.gmra.mxu1 %v3942_v4 }
 0x46e   :  { %v3648_v32 = vadd.f32 %v3647_v33, %v9039_v5  ;;  %v3854_v3 = vmax.f32 %v3646_v17, 0.0 }
 0x46f   :  { %v3651_v24 = vpop.f32.mrf.mxu0 }
 0x470   :  { %v3855_v23 = vmax.f32 %v3648_v32, 0.0  ;;  %v3944_v8 = vpack.c.bf16 %v3854_v3, %v3852_v46  ;;  %v3652_v37 = vadd.f32 %v3651_v24, %v9042_v2 }
 0x471   :  { %v3653_v20 = vpop.f32.mrf.mxu0 }
 0x472   :  { %v3945_v14 = vpack.c.bf16 %v3855_v23, %v3853_v57  ;;  %v3654_v39 = vadd.f32 %v3653_v20, %v9039_v5  ;;  %v3856_v50 = vmax.f32 %v3652_v37, 0.0 }
 0x473   :  { %v3655_v40 = vpop.f32.mrf.mxu0 }
 0x474   :  { %v3656_v22 = vadd.f32 %v3655_v40, %v9042_v2  ;;  %4390 = vmatprep.mubr.bf16.mxu1 %v3945_v14  ;;  %v3857_v58 = vmax.f32 %v3654_v39, 0.0 }
 0x475   :  { %v3657_v61 = vpop.f32.mrf.mxu0  ;;  %4391 = vmatmul.mubr.bf16.gmra.mxu1 %v3944_v8 }
 0x476   :  { %v3658_v26 = vadd.f32 %v3657_v61, %v9039_v5  ;;  %v3858_v31 = vmax.f32 %v3656_v22, 0.0 }
 0x477   :  { %v3661_v19 = vpop.f32.mrf.mxu0 }
 0x478   :  { %v3859_v44 = vmax.f32 %v3658_v26, 0.0  ;;  %v3946_v48 = vpack.c.bf16 %v3858_v31, %v3856_v50  ;;  %v3662_v41 = vadd.f32 %v3661_v19, %v9042_v2 }
 0x479   :  { %v3663_v47 = vpop.f32.mrf.mxu0 }
 0x47a   :  { %v3947_v25 = vpack.c.bf16 %v3859_v44, %v3857_v58  ;;  %v3664_v42 = vadd.f32 %v3663_v47, %v9039_v5  ;;  %v3860_v21 = vmax.f32 %v3662_v41, 0.0 }
 0x47b   :  { %v3665_v45 = vpop.f32.mrf.mxu0 }
 0x47c   :  { %v3666_v49 = vadd.f32 %v3665_v45, %v9042_v2  ;;  %4400 = vmatprep.mubr.bf16.mxu1 %v3947_v25  ;;  %v3861_v16 = vmax.f32 %v3664_v42, 0.0 }
 0x47d   :  { %v3667_v53 = vpop.f32.mrf.mxu0  ;;  %4401 = vmatmul.mubr.bf16.gmra.mxu1 %v3946_v48 }
 0x47e   :  { %v3668_v12 = vadd.f32 %v3667_v53, %v9039_v5  ;;  %v3862_v30 = vmax.f32 %v3666_v49, 0.0 }
 0x47f   :  { %v3671_v28 = vpop.f32.mrf.mxu0 }
 0x480   :  { %v3863_v35 = vmax.f32 %v3668_v12, 0.0  ;;  %v3948_v62 = vpack.c.bf16 %v3862_v30, %v3860_v21  ;;  %v3672_v55 = vadd.f32 %v3671_v28, %v9042_v2 }
 0x481   :  { %v3673_v18 = vpop.f32.mrf.mxu0 }
 0x482   :  { %v3949_v9 = vpack.c.bf16 %v3863_v35, %v3861_v16  ;;  %v3674_v59 = vadd.f32 %v3673_v18, %v9039_v5  ;;  %v3864_v63 = vmax.f32 %v3672_v55, 0.0 }
 0x483   :  { %v3675_v13 = vpop.f32.mrf.mxu0 }
 0x484   :  { %v3676_v15 = vadd.f32 %v3675_v13, %v9042_v2  ;;  %4410 = vmatprep.mubr.bf16.mxu1 %v3949_v9  ;;  %v3865_v27 = vmax.f32 %v3674_v59, 0.0 }
 0x485   :  { %v3677_v11 = vpop.f32.mrf.mxu0  ;;  %4411 = vmatmul.mubr.bf16.gmra.mxu1 %v3948_v62 }
 0x486   :  { %v3678_v51 = vadd.f32 %v3677_v11, %v9039_v5  ;;  %v3866_v54 = vmax.f32 %v3676_v15, 0.0  ;;  %v6028_v15 = vld [vmem:[%s9435_s7 + $0x6] sm:$0x3] }
 0x487   :  { %v3681_v52 = vpop.f32.mrf.mxu0 }
 0x488   :  { %v3867_v36 = vmax.f32 %v3678_v51, 0.0  ;;  %v3950_v7 = vpack.c.bf16 %v3866_v54, %v3864_v63  ;;  %v3682_v4 = vadd.f32 %v3681_v52, %v9042_v2  ;;  %v9196_v54 = vrot.slane %v6028_v15, %v9561_v56 }
 0x489   :  { %v3683_v60 = vpop.f32.mrf.mxu0 }
 0x48a   :  { %v3951_v6 = vpack.c.bf16 %v3867_v36, %v3865_v27  ;;  %v3684_v0 = vadd.f32 %v3683_v60, %v9039_v5  ;;  %v3868_v57 = vmax.f32 %v3682_v4, 0.0  ;;  %v9199_v60 = vrot.slane %v6028_v15, %v9562_v10 }
 0x48b   :  { %v3685_v1 = vpop.f32.mrf.mxu0 }
 0x48c   :  { %v3686_v34 = vadd.f32 %v3685_v1, %v9042_v2  ;;  %4420 = vmatprep.mubr.bf16.mxu1 %v3951_v6  ;;  %v3869_v33 = vmax.f32 %v3684_v0, 0.0 }
 0x48d   :  { %v3687_v38 = vpop.f32.mrf.mxu0  ;;  %4421 = vmatmul.mubr.bf16.gmra.mxu1 %v3950_v7 }
 0x48e   :  { %v3688_v29 = vadd.f32 %v3687_v38, %v9039_v5  ;;  %v3870_v43 = vmax.f32 %v3686_v34, 0.0 }
 0x48f   :  { %v3691_v17 = vpop.f32.mrf.mxu0 }
 0x490   :  { %v3871_v32 = vmax.f32 %v3688_v29, 0.0  ;;  %v3952_v20 = vpack.c.bf16 %v3870_v43, %v3868_v57  ;;  %v3692_v8 = vadd.f32 %v3691_v17, %v9042_v2 }
 0x491   :  { %v3693_v24 = vpop.f32.mrf.mxu0 }
 0x492   :  { %v3953_v3 = vpack.c.bf16 %v3871_v32, %v3869_v33  ;;  %v3694_v46 = vadd.f32 %v3693_v24, %v9039_v5  ;;  %v3872_v58 = vmax.f32 %v3692_v8, 0.0 }
 0x493   :  { %v3695_v23 = vpop.f32.mrf.mxu0 }
 0x494   :  { %v3696_v14 = vadd.f32 %v3695_v23, %v9042_v2  ;;  %4430 = vmatprep.mubr.bf16.mxu1 %v3953_v3  ;;  %v3873_v61 = vmax.f32 %v3694_v46, 0.0 }
 0x495   :  { %v3697_v40 = vpop.f32.mrf.mxu0  ;;  %4431 = vmatmul.mubr.bf16.gmra.mxu1 %v3952_v20 }
 0x496   :  { %v3698_v39 = vadd.f32 %v3697_v40, %v9039_v5  ;;  %v3874_v37 = vmax.f32 %v3696_v14, 0.0 }
 0x497   :  { %v3701_v22 = vpop.f32.mrf.mxu0 }
 0x498   :  { %v3875_v26 = vmax.f32 %v3698_v39, 0.0  ;;  %v3954_v47 = vpack.c.bf16 %v3874_v37, %v3872_v58  ;;  %v3702_v48 = vadd.f32 %v3701_v22, %v9042_v2 }
 0x499   :  { %v3703_v19 = vpop.f32.mrf.mxu0 }
 0x49a   :  { %v3955_v31 = vpack.c.bf16 %v3875_v26, %v3873_v61  ;;  %v3704_v50 = vadd.f32 %v3703_v19, %v9039_v5  ;;  %v3876_v16 = vmax.f32 %v3702_v48, 0.0 }
 0x49b   :  { %v3705_v44 = vpop.f32.mrf.mxu0 }
 0x49c   :  { %v3706_v25 = vadd.f32 %v3705_v44, %v9042_v2  ;;  %4440 = vmatprep.mubr.bf16.mxu1 %v3955_v31  ;;  %v3877_v53 = vmax.f32 %v3704_v50, 0.0 }
 0x49d   :  { %v3707_v45 = vpop.f32.mrf.mxu0  ;;  %4441 = vmatmul.mubr.bf16.gmra.mxu1 %v3954_v47 }
 0x49e   :  { %v3708_v42 = vadd.f32 %v3707_v45, %v9039_v5  ;;  %v3878_v41 = vmax.f32 %v3706_v25, 0.0 }
 0x49f   :  { %v3711_v49 = vpop.f32.mrf.mxu0 }
 0x4a0   :  { %v3879_v12 = vmax.f32 %v3708_v42, 0.0  ;;  %v3956_v18 = vpack.c.bf16 %v3878_v41, %v3876_v16  ;;  %v3712_v62 = vadd.f32 %v3711_v49, %v9042_v2 }
 0x4a1   :  { %v3713_v28 = vpop.f32.mrf.mxu0 }
 0x4a2   :  { %v3957_v30 = vpack.c.bf16 %v3879_v12, %v3877_v53  ;;  %v3714_v21 = vadd.f32 %v3713_v28, %v9039_v5  ;;  %v3880_v63 = vmax.f32 %v3712_v62, 0.0 }
 0x4a3   :  { %v3715_v35 = vpop.f32.mrf.mxu0 }
 0x4a4   :  { %v3716_v9 = vadd.f32 %v3715_v35, %v9042_v2  ;;  %4450 = vmatprep.mubr.bf16.mxu1 %v3957_v30  ;;  %v3881_v55 = vmax.f32 %v3714_v21, 0.0 }
 0x4a5   :  { %v3717_v13 = vpop.f32.mrf.mxu0  ;;  %v4212_v11 = vpop.f32.mrf.mxu1  ;;  %4451 = vmatmul.mubr.bf16.gmra.mxu1 %v3956_v18 }
 0x4a6   :  { %v3718_v59 = vadd.f32 %v3717_v13, %v9039_v5  ;;  %v3882_v51 = vmax.f32 %v3716_v9, 0.0  ;;  %v4213_v17 = vadd.f32 %v4212_v11, %v9199_v60 }
 0x4a7   :  { %v3721_v27 = vpop.f32.mrf.mxu0  ;;  %v4214_v36 = vpop.f32.mrf.mxu1 }
 0x4a8   :  { %v3883_v52 = vmax.f32 %v3718_v59, 0.0  ;;  %v3958_v34 = vpack.c.bf16 %v3882_v51, %v3880_v63  ;;  %v4215_v38 = vadd.f32 %v4214_v36, %v9196_v54  ;;  %v3722_v24 = vadd.f32 %v3721_v27, %v9042_v2 }
 0x4a9   :  { %v3723_v6 = vpop.f32.mrf.mxu0  ;;  %v4216_v1 = vpop.f32.mrf.mxu1  ;;  %v4531_v40 = vmax.f32 %v4213_v17, 0.0 }
 0x4aa   :  { %v3959_v7 = vpack.c.bf16 %v3883_v52, %v3881_v55  ;;  %v4217_v0 = vadd.f32 %v4216_v1, %v9199_v60  ;;  %v3724_v10 = vadd.f32 %v3723_v6, %v9039_v5  ;;  %v4532_v20 = vmax.f32 %v4215_v38, 0.0 }
 0x4ab   :  { %v3725_v4 = vpop.f32.mrf.mxu0  ;;  %v4218_v29 = vpop.f32.mrf.mxu1  ;;  %v3884_v19 = vmax.f32 %v3722_v24, 0.0 }
 0x4ac   :  { %4460 = vmatprep.mubr.bf16.mxu1 %v3959_v7  ;;  %v3726_v56 = vadd.f32 %v3725_v4, %v9042_v2  ;;  %v4219_v33 = vadd.f32 %v4218_v29, %v9196_v54  ;;  %v4533_v57 = vmax.f32 %v4217_v0, 0.0  ;;  %v3885_v22 = vmax.f32 %v3724_v10, 0.0 }
 0x4ad   :  { %v3727_v43 = vpop.f32.mrf.mxu0  ;;  %v4222_v32 = vpop.f32.mrf.mxu1  ;;  %4461 = vmatmul.mubr.bf16.gmra.mxu1 %v3958_v34 }
 0x4ae   :  { %v4534_v3 = vmax.f32 %v4219_v33, 0.0  ;;  %v3728_v23 = vadd.f32 %v3727_v43, %v9039_v5  ;;  %v3886_v8 = vmax.f32 %v3726_v56, 0.0  ;;  %v4659_v58 = vpack.c.bf16 %v4533_v57, %v4531_v40 }
 0x4af   :  { %v3731_v46 = vpop.f32.mrf.mxu0  ;;  %v4224_v14 = vpop.f32.mrf.mxu1  ;;  %v4223_v48 = vadd.f32 %v4222_v32, %v9199_v60 }
 0x4b0   :  { %v3887_v39 = vmax.f32 %v3728_v23, 0.0  ;;  %v4660_v26 = vpack.c.bf16 %v4534_v3, %v4532_v20  ;;  %v4225_v44 = vadd.f32 %v4224_v14, %v9196_v54  ;;  %v3960_v45 = vpack.c.bf16 %v3886_v8, %v3884_v19 }
 0x4b1   :  { %v3733_v61 = vpop.f32.mrf.mxu0  ;;  %v4226_v37 = vpop.f32.mrf.mxu1  ;;  %v3732_v28 = vadd.f32 %v3731_v46, %v9042_v2  ;;  %v4535_v13 = vmax.f32 %v4223_v48, 0.0 }
 0x4b2   :  { %v4227_v31 = vadd.f32 %v4226_v37, %v9199_v60  ;;  %4890 = vmatprep.mubr.bf16.mxu0 %v4660_v26  ;;  %v3961_v25 = vpack.c.bf16 %v3887_v39, %v3885_v22  ;;  %v3734_v53 = vadd.f32 %v3733_v61, %v9039_v5  ;;  %v4536_v18 = vmax.f32 %v4225_v44, 0.0 }
 0x4b3   :  { %v3735_v47 = vpop.f32.mrf.mxu0  ;;  %v4228_v50 = vpop.f32.mrf.mxu1  ;;  %4891 = vmatmul.mubr.bf16.vlgmr.msra.gmra.mxu0 %v4659_v58  ;;  %v3888_v52 = vmax.f32 %v3732_v28, 0.0 }
 0x4b4   :  { %v3736_v42 = vadd.f32 %v3735_v47, %v9042_v2  ;;  %v4229_v49 = vadd.f32 %v4228_v50, %v9196_v54  ;;  %4470 = vmatprep.mubr.bf16.mxu1 %v3961_v25  ;;  %v4537_v16 = vmax.f32 %v4227_v31, 0.0  ;;  %v3889_v15 = vmax.f32 %v3734_v53, 0.0 }
 0x4b5   :  { %v3737_v41 = vpop.f32.mrf.mxu0  ;;  %v4232_v12 = vpop.f32.mrf.mxu1  ;;  %4471 = vmatmul.mubr.bf16.gmra.mxu1 %v3960_v45 }
 0x4b6   :  { %v4538_v30 = vmax.f32 %v4229_v49, 0.0  ;;  %v3738_v35 = vadd.f32 %v3737_v41, %v9039_v5  ;;  %v3890_v62 = vmax.f32 %v3736_v42, 0.0  ;;  %v4661_v27 = vpack.c.bf16 %v4537_v16, %v4535_v13 }
 0x4b7   :  { %v3741_v21 = vpop.f32.mrf.mxu0  ;;  %v4234_v9 = vpop.f32.mrf.mxu1  ;;  %v4233_v34 = vadd.f32 %v4232_v12, %v9199_v60 }
 0x4b8   :  { %v3891_v59 = vmax.f32 %v3738_v35, 0.0  ;;  %v4662_v51 = vpack.c.bf16 %v4538_v30, %v4536_v18  ;;  %v4235_v63 = vadd.f32 %v4234_v9, %v9196_v54  ;;  %v3962_v0 = vpack.c.bf16 %v3890_v62, %v3888_v52 }
 0x4b9   :  { %v3743_v11 = vpop.f32.mrf.mxu0  ;;  %v4236_v55 = vpop.f32.mrf.mxu1  ;;  %v3742_v33 = vadd.f32 %v3741_v21, %v9042_v2  ;;  %v4539_v23 = vmax.f32 %v4233_v34, 0.0 }
 0x4ba   :  { %v4237_v36 = vadd.f32 %v4236_v55, %v9199_v60  ;;  %4898 = vmatprep.mubr.bf16.mxu0 %v4662_v51  ;;  %v3963_v7 = vpack.c.bf16 %v3891_v59, %v3889_v15  ;;  %v3744_v29 = vadd.f32 %v3743_v11, %v9039_v5  ;;  %v4540_v24 = vmax.f32 %v4235_v63, 0.0 }
 0x4bb   :  { %v3745_v6 = vpop.f32.mrf.mxu0  ;;  %v4238_v1 = vpop.f32.mrf.mxu1  ;;  %4899 = vmatmul.mubr.bf16.gmra.mxu0 %v4661_v27  ;;  %v3892_v22 = vmax.f32 %v3742_v33, 0.0 }
 0x4bc   :  { %v3746_v38 = vadd.f32 %v3745_v6, %v9042_v2  ;;  %v4239_v4 = vadd.f32 %v4238_v1, %v9196_v54  ;;  %4480 = vmatprep.mubr.bf16.mxu1 %v3963_v7  ;;  %v4541_v10 = vmax.f32 %v4237_v36, 0.0  ;;  %v3893_v14 = vmax.f32 %v3744_v29, 0.0 }
 0x4bd   :  { %v3747_v17 = vpop.f32.mrf.mxu0  ;;  %v4242_v56 = vpop.f32.mrf.mxu1  ;;  %4481 = vmatmul.mubr.bf16.gmra.mxu1 %v3962_v0 }
 0x4be   :  { %v4542_v43 = vmax.f32 %v4239_v4, 0.0  ;;  %v3748_v32 = vadd.f32 %v3747_v17, %v9039_v5  ;;  %v3894_v20 = vmax.f32 %v3746_v38, 0.0  ;;  %v4663_v61 = vpack.c.bf16 %v4541_v10, %v4539_v23 }
 0x4bf   :  { %v3751_v57 = vpop.f32.mrf.mxu0  ;;  %v4244_v3 = vpop.f32.mrf.mxu1  ;;  %v4243_v47 = vadd.f32 %v4242_v56, %v9199_v60 }
 0x4c0   :  { %v3895_v46 = vmax.f32 %v3748_v32, 0.0  ;;  %v4664_v39 = vpack.c.bf16 %v4542_v43, %v4540_v24  ;;  %v4245_v26 = vadd.f32 %v4244_v3, %v9196_v54  ;;  %v3964_v44 = vpack.c.bf16 %v3894_v20, %v3892_v22 }
 0x4c1   :  { %v3753_v40 = vpop.f32.mrf.mxu0  ;;  %v4246_v8 = vpop.f32.mrf.mxu1  ;;  %v3752_v49 = vadd.f32 %v3751_v57, %v9042_v2  ;;  %v4543_v35 = vmax.f32 %v4243_v47, 0.0 }
 0x4c2   :  { %v4247_v37 = vadd.f32 %v4246_v8, %v9199_v60  ;;  %4906 = vmatprep.mubr.bf16.mxu0 %v4664_v39  ;;  %v3965_v31 = vpack.c.bf16 %v3895_v46, %v3893_v14  ;;  %v3754_v45 = vadd.f32 %v3753_v40, %v9039_v5  ;;  %v4544_v28 = vmax.f32 %v4245_v26, 0.0 }
 0x4c3   :  { %v3755_v19 = vpop.f32.mrf.mxu0  ;;  %v4248_v58 = vpop.f32.mrf.mxu1  ;;  %4907 = vmatmul.mubr.bf16.gmra.mxu0 %v4663_v61  ;;  %v3896_v15 = vmax.f32 %v3752_v49, 0.0 }
 0x4c4   :  { %v3756_v50 = vadd.f32 %v3755_v19, %v9042_v2  ;;  %v4249_v25 = vadd.f32 %v4248_v58, %v9196_v54  ;;  %4490 = vmatprep.mubr.bf16.mxu1 %v3965_v31  ;;  %v4545_v53 = vmax.f32 %v4247_v37, 0.0  ;;  %v3897_v9 = vmax.f32 %v3754_v45, 0.0 }
 0x4c5   :  { %v3757_v48 = vpop.f32.mrf.mxu0  ;;  %v4252_v42 = vpop.f32.mrf.mxu1  ;;  %4491 = vmatmul.mubr.bf16.gmra.mxu1 %v3964_v44 }
 0x4c6   :  { %v4546_v41 = vmax.f32 %v4249_v25, 0.0  ;;  %v3758_v12 = vadd.f32 %v3757_v48, %v9039_v5  ;;  %v3898_v18 = vmax.f32 %v3756_v50, 0.0  ;;  %v4665_v11 = vpack.c.bf16 %v4545_v53, %v4543_v35 }
 0x4c7   :  { %v3761_v16 = vpop.f32.mrf.mxu0  ;;  %v4254_v30 = vpop.f32.mrf.mxu1  ;;  %v4253_v52 = vadd.f32 %v4252_v42, %v9199_v60 }
 0x4c8   :  { %v3899_v21 = vmax.f32 %v3758_v12, 0.0  ;;  %v4666_v59 = vpack.c.bf16 %v4546_v41, %v4544_v28  ;;  %v4255_v55 = vadd.f32 %v4254_v30, %v9196_v54  ;;  %v3966_v6 = vpack.c.bf16 %v3898_v18, %v3896_v15 }
 0x4c9   :  { %v3763_v13 = vpop.f32.mrf.mxu0  ;;  %v4256_v62 = vpop.f32.mrf.mxu1  ;;  %v3762_v34 = vadd.f32 %v3761_v16, %v9042_v2  ;;  %v4547_v24 = vmax.f32 %v4253_v52, 0.0 }
 0x4ca   :  { %v4257_v51 = vadd.f32 %v4256_v62, %v9199_v60  ;;  %4914 = vmatprep.mubr.bf16.mxu0 %v4666_v59  ;;  %v3967_v63 = vpack.c.bf16 %v3899_v21, %v3897_v9  ;;  %v3764_v1 = vadd.f32 %v3763_v13, %v9039_v5  ;;  %v4548_v29 = vmax.f32 %v4255_v55, 0.0 }
 0x4cb   :  { %v3765_v27 = vpop.f32.mrf.mxu0  ;;  %v4258_v36 = vpop.f32.mrf.mxu1  ;;  %4915 = vmatmul.mubr.bf16.gmra.mxu0 %v4665_v11  ;;  %v3900_v20 = vmax.f32 %v3762_v34, 0.0 }
 0x4cc   :  { %v3766_v7 = vadd.f32 %v3765_v27, %v9042_v2  ;;  %v4259_v0 = vadd.f32 %v4258_v36, %v9196_v54  ;;  %4500 = vmatprep.mubr.bf16.mxu1 %v3967_v63  ;;  %v4549_v17 = vmax.f32 %v4257_v51, 0.0  ;;  %v3901_v57 = vmax.f32 %v3764_v1, 0.0 }
 0x4cd   :  { %v3767_v38 = vpop.f32.mrf.mxu0  ;;  %v4262_v4 = vpop.f32.mrf.mxu1  ;;  %4501 = vmatmul.mubr.bf16.gmra.mxu1 %v3966_v6 }
 0x4ce   :  { %v4550_v56 = vmax.f32 %v4259_v0, 0.0  ;;  %v3768_v33 = vadd.f32 %v3767_v38, %v9039_v5  ;;  %v3902_v10 = vmax.f32 %v3766_v7, 0.0  ;;  %v4667_v40 = vpack.c.bf16 %v4549_v17, %v4547_v24 }
 0x4cf   :  { %v3771_v43 = vpop.f32.mrf.mxu0  ;;  %v4264_v32 = vpop.f32.mrf.mxu1  ;;  %v4263_v37 = vadd.f32 %v4262_v4, %v9199_v60 }
 0x4d0   :  { %v4668_v3 = vpack.c.bf16 %v4550_v56, %v4548_v29  ;;  %v3903_v23 = vmax.f32 %v3768_v33, 0.0  ;;  %v4265_v8 = vadd.f32 %v4264_v32, %v9196_v54  ;;  %v3968_v61 = vpack.c.bf16 %v3902_v10, %v3900_v20 }
 0x4d1   :  { %v3773_v46 = vpop.f32.mrf.mxu0  ;;  %v4266_v14 = vpop.f32.mrf.mxu1  ;;  %v3772_v47 = vadd.f32 %v3771_v43, %v9042_v2  ;;  %v4551_v53 = vmax.f32 %v4263_v37, 0.0 }
 0x4d2   :  { %v4267_v39 = vadd.f32 %v4266_v14, %v9199_v60  ;;  %4922 = vmatprep.mubr.bf16.mxu0 %v4668_v3  ;;  %v3969_v22 = vpack.c.bf16 %v3903_v23, %v3901_v57  ;;  %v3774_v58 = vadd.f32 %v3773_v46, %v9039_v5  ;;  %v4552_v45 = vmax.f32 %v4265_v8, 0.0 }
 0x4d3   :  { %v3775_v26 = vpop.f32.mrf.mxu0  ;;  %v4268_v19 = vpop.f32.mrf.mxu1  ;;  %4923 = vmatmul.mubr.bf16.gmra.mxu0 %v4667_v40  ;;  %v3904_v35 = vmax.f32 %v3772_v47, 0.0  ;;  %v14_v40 = vstv %s9437_s8 }
 0x4d4   :  { %v3776_v31 = vadd.f32 %v3775_v26, %v9042_v2  ;;  %v4269_v44 = vadd.f32 %v4268_v19, %v9196_v54  ;;  %4510 = vmatprep.mubr.bf16.mxu1 %v3969_v22  ;;  %v4553_v48 = vmax.f32 %v4267_v39, 0.0  ;;  %v3905_v12 = vmax.f32 %v3774_v58, 0.0  ;;  %15 = vst [vmem:[#allocation2] sm:$0x1] %v14_v40 }
 0x4d5   :  { %v3777_v50 = vpop.f32.mrf.mxu0  ;;  %v4272_v25 = vpop.f32.mrf.mxu1  ;;  %4511 = vmatmul.mubr.bf16.gmra.mxu1 %v3968_v61 }
 0x4d6   :  { %v4554_v42 = vmax.f32 %v4269_v44, 0.0  ;;  %v3778_v49 = vadd.f32 %v3777_v50, %v9039_v5  ;;  %v3906_v28 = vmax.f32 %v3776_v31, 0.0  ;;  %v4669_v21 = vpack.c.bf16 %v4553_v48, %v4551_v53 }
 0x4d7   :  { %v4274_v41 = vpop.f32.mrf.mxu1  ;;  %v4273_v5 = vadd.f32 %v4272_v25, %v9199_v60 }
 0x4d8   :  { %v4670_v16 = vpack.c.bf16 %v4554_v42, %v4552_v45  ;;  %v3907_v30 = vmax.f32 %v3778_v49, 0.0  ;;  %v4275_v9 = vadd.f32 %v4274_v41, %v9196_v54  ;;  %v3970_v59 = vpack.c.bf16 %v3906_v28, %v3904_v35 }
 0x4d9   :  { %v4276_v18 = vpop.f32.mrf.mxu1  ;;  %v4555_v36 = vmax.f32 %v4273_v5, 0.0 }
 0x4da   :  { %v4277_v2 = vadd.f32 %v4276_v18, %v9199_v60  ;;  %4930 = vmatprep.mubr.bf16.mxu0 %v4670_v16  ;;  %v3971_v13 = vpack.c.bf16 %v3907_v30, %v3905_v12  ;;  %v4556_v55 = vmax.f32 %v4275_v9, 0.0 }
 0x4db   :  { %v4278_v62 = vpop.f32.mrf.mxu1  ;;  %4931 = vmatmul.mubr.bf16.gmra.mxu0 %v4669_v21 }
 0x4dc   :  { %v4279_v15 = vadd.f32 %v4278_v62, %v9196_v54  ;;  %4520 = vmatprep.mubr.bf16.mxu1 %v3971_v13  ;;  %v4557_v51 = vmax.f32 %v4277_v2, 0.0 }
 0x4dd   :  { %v4282_v11 = vpop.f32.mrf.mxu1  ;;  %4521 = vmatmul.mubr.bf16.gmra.mxu1 %v3970_v59 }
 0x4de   :  { %v4558_v52 = vmax.f32 %v4279_v15, 0.0  ;;  %v4671_v1 = vpack.c.bf16 %v4557_v51, %v4555_v36  ;;  %v4283_v38 = vadd.f32 %v4282_v11, %v9199_v60 }
 0x4df   :  { %v4284_v27 = vpop.f32.mrf.mxu1 }
 0x4e0   :  { %v4672_v63 = vpack.c.bf16 %v4558_v52, %v4556_v55  ;;  %v4285_v7 = vadd.f32 %v4284_v27, %v9196_v54  ;;  %v4559_v43 = vmax.f32 %v4283_v38, 0.0 }
 0x4e1   :  { %v4286_v6 = vpop.f32.mrf.mxu1 }
 0x4e2   :  { %v4287_v0 = vadd.f32 %v4286_v6, %v9199_v60  ;;  %4938 = vmatprep.mubr.bf16.mxu0 %v4672_v63  ;;  %v4560_v17 = vmax.f32 %v4285_v7, 0.0 }
 0x4e3   :  { %v4288_v34 = vpop.f32.mrf.mxu1  ;;  %4939 = vmatmul.mubr.bf16.gmra.mxu0 %v4671_v1 }
 0x4e4   :  { %v4289_v4 = vadd.f32 %v4288_v34, %v9196_v54  ;;  %v4561_v56 = vmax.f32 %v4287_v0, 0.0 }
 0x4e5   :  { %v4292_v29 = vpop.f32.mrf.mxu1 }
 0x4e6   :  { %v4562_v33 = vmax.f32 %v4289_v4, 0.0  ;;  %v4673_v57 = vpack.c.bf16 %v4561_v56, %v4559_v43  ;;  %v4293_v46 = vadd.f32 %v4292_v29, %v9199_v60 }
 0x4e7   :  { %v4294_v10 = vpop.f32.mrf.mxu1 }
 0x4e8   :  { %v4674_v32 = vpack.c.bf16 %v4562_v33, %v4560_v17  ;;  %v4295_v3 = vadd.f32 %v4294_v10, %v9196_v54  ;;  %v4563_v26 = vmax.f32 %v4293_v46, 0.0 }
 0x4e9   :  { %v4296_v24 = vpop.f32.mrf.mxu1 }
 0x4ea   :  { %v4297_v23 = vadd.f32 %v4296_v24, %v9199_v60  ;;  %4946 = vmatprep.mubr.bf16.mxu0 %v4674_v32  ;;  %v4564_v39 = vmax.f32 %v4295_v3, 0.0 }
 0x4eb   :  { %v4298_v20 = vpop.f32.mrf.mxu1  ;;  %4947 = vmatmul.mubr.bf16.gmra.mxu0 %v4673_v57 }
 0x4ec   :  { %v4299_v14 = vadd.f32 %v4298_v20, %v9196_v54  ;;  %v4565_v22 = vmax.f32 %v4297_v23, 0.0 }
 0x4ed   :  { %v4302_v8 = vpop.f32.mrf.mxu1 }
 0x4ee   :  { %v4566_v61 = vmax.f32 %v4299_v14, 0.0  ;;  %v4675_v31 = vpack.c.bf16 %v4565_v22, %v4563_v26  ;;  %v4303_v25 = vadd.f32 %v4302_v8, %v9199_v60 }
 0x4ef   :  { %v4304_v37 = vpop.f32.mrf.mxu1 }
 0x4f0   :  { %v4676_v19 = vpack.c.bf16 %v4566_v61, %v4564_v39  ;;  %v4305_v44 = vadd.f32 %v4304_v37, %v9196_v54  ;;  %v4567_v12 = vmax.f32 %v4303_v25, 0.0 }
 0x4f1   :  { %v4306_v58 = vpop.f32.mrf.mxu1 }
 0x4f2   :  { %v4307_v47 = vadd.f32 %v4306_v58, %v9199_v60  ;;  %4954 = vmatprep.mubr.bf16.mxu0 %v4676_v19  ;;  %v4568_v42 = vmax.f32 %v4305_v44, 0.0 }
 0x4f3   :  { %v4308_v50 = vpop.f32.mrf.mxu1  ;;  %4955 = vmatmul.mubr.bf16.gmra.mxu0 %v4675_v31 }
 0x4f4   :  { %v4309_v45 = vadd.f32 %v4308_v50, %v9196_v54  ;;  %v4569_v49 = vmax.f32 %v4307_v47, 0.0 }
 0x4f5   :  { %v4312_v48 = vpop.f32.mrf.mxu1 }
 0x4f6   :  { %v4570_v53 = vmax.f32 %v4309_v45, 0.0  ;;  %v4677_v30 = vpack.c.bf16 %v4569_v49, %v4567_v12  ;;  %v4313_v9 = vadd.f32 %v4312_v48, %v9199_v60 }
 0x4f7   :  { %v4314_v41 = vpop.f32.mrf.mxu1 }
 0x4f8   :  { %v4678_v28 = vpack.c.bf16 %v4570_v53, %v4568_v42  ;;  %v4315_v35 = vadd.f32 %v4314_v41, %v9196_v54  ;;  %v4571_v11 = vmax.f32 %v4313_v9, 0.0 }
 0x4f9   :  { %v4316_v16 = vpop.f32.mrf.mxu1 }
 0x4fa   :  { %v4317_v18 = vadd.f32 %v4316_v16, %v9199_v60  ;;  %4962 = vmatprep.mubr.bf16.mxu0 %v4678_v28  ;;  %v4572_v62 = vmax.f32 %v4315_v35, 0.0 }
 0x4fb   :  { %v4318_v21 = vpop.f32.mrf.mxu1  ;;  %4963 = vmatmul.mubr.bf16.gmra.mxu0 %v4677_v30 }
 0x4fc   :  { %v4319_v2 = vadd.f32 %v4318_v21, %v9196_v54  ;;  %v4573_v59 = vmax.f32 %v4317_v18, 0.0 }
 0x4fd   :  { %v4322_v13 = vpop.f32.mrf.mxu1 }
 0x4fe   :  { %v4574_v5 = vmax.f32 %v4319_v2, 0.0  ;;  %v4679_v52 = vpack.c.bf16 %v4573_v59, %v4571_v11  ;;  %v4323_v6 = vadd.f32 %v4322_v13, %v9199_v60 }
 0x4ff   :  { %v4324_v15 = vpop.f32.mrf.mxu1 }
 0x500   :  { %v4680_v55 = vpack.c.bf16 %v4574_v5, %v4572_v62  ;;  %v4325_v27 = vadd.f32 %v4324_v15, %v9196_v54  ;;  %v4575_v29 = vmax.f32 %v4323_v6, 0.0 }
 0x501   :  { %v4326_v51 = vpop.f32.mrf.mxu1 }
 0x502   :  { %v4327_v36 = vadd.f32 %v4326_v51, %v9199_v60  ;;  %4970 = vmatprep.mubr.bf16.mxu0 %v4680_v55  ;;  %v4576_v0 = vmax.f32 %v4325_v27, 0.0 }
 0x503   :  { %v4328_v63 = vpop.f32.mrf.mxu1  ;;  %4971 = vmatmul.mubr.bf16.gmra.mxu0 %v4679_v52 }
 0x504   :  { %v4329_v1 = vadd.f32 %v4328_v63, %v9196_v54  ;;  %v4577_v34 = vmax.f32 %v4327_v36, 0.0 }
 0x505   :  { %v4332_v7 = vpop.f32.mrf.mxu1 }
 0x506   :  { %v4578_v38 = vmax.f32 %v4329_v1, 0.0  ;;  %v4681_v33 = vpack.c.bf16 %v4577_v34, %v4575_v29  ;;  %v4333_v24 = vadd.f32 %v4332_v7, %v9199_v60 }
 0x507   :  { %v4334_v4 = vpop.f32.mrf.mxu1 }
 0x508   :  { %v4682_v17 = vpack.c.bf16 %v4578_v38, %v4576_v0  ;;  %v4335_v10 = vadd.f32 %v4334_v4, %v9196_v54  ;;  %v4579_v40 = vmax.f32 %v4333_v24, 0.0 }
 0x509   :  { %v4336_v56 = vpop.f32.mrf.mxu1 }
 0x50a   :  { %v4337_v43 = vadd.f32 %v4336_v56, %v9199_v60  ;;  %4978 = vmatprep.mubr.bf16.mxu0 %v4682_v17  ;;  %v4580_v23 = vmax.f32 %v4335_v10, 0.0 }
 0x50b   :  { %v4338_v32 = vpop.f32.mrf.mxu1  ;;  %4979 = vmatmul.mubr.bf16.gmra.mxu0 %v4681_v33 }
 0x50c   :  { %v4339_v57 = vadd.f32 %v4338_v32, %v9196_v54  ;;  %v4581_v20 = vmax.f32 %v4337_v43, 0.0 }
 0x50d   :  { %v4342_v3 = vpop.f32.mrf.mxu1 }
 0x50e   :  { %v4582_v46 = vmax.f32 %v4339_v57, 0.0  ;;  %v4683_v22 = vpack.c.bf16 %v4581_v20, %v4579_v40  ;;  %v4343_v19 = vadd.f32 %v4342_v3, %v9199_v60 }
 0x50f   :  { %v4344_v14 = vpop.f32.mrf.mxu1 }
 0x510   :  { %v4684_v8 = vpack.c.bf16 %v4582_v46, %v4580_v23  ;;  %v4345_v61 = vadd.f32 %v4344_v14, %v9196_v54  ;;  %v4583_v45 = vmax.f32 %v4343_v19, 0.0 }
 0x511   :  { %v4346_v39 = vpop.f32.mrf.mxu1 }
 0x512   :  { %v4347_v37 = vadd.f32 %v4346_v39, %v9199_v60  ;;  %4986 = vmatprep.mubr.bf16.mxu0 %v4684_v8  ;;  %v4584_v44 = vmax.f32 %v4345_v61, 0.0 }
 0x513   :  { %v4348_v26 = vpop.f32.mrf.mxu1  ;;  %4987 = vmatmul.mubr.bf16.gmra.mxu0 %v4683_v22 }
 0x514   :  { %v4349_v58 = vadd.f32 %v4348_v26, %v9196_v54  ;;  %v4585_v47 = vmax.f32 %v4347_v37, 0.0 }
 0x515   :  { %v4352_v31 = vpop.f32.mrf.mxu1 }
 0x516   :  { %v4586_v50 = vmax.f32 %v4349_v58, 0.0  ;;  %v4685_v49 = vpack.c.bf16 %v4585_v47, %v4583_v45  ;;  %v4353_v28 = vadd.f32 %v4352_v31, %v9199_v60 }
 0x517   :  { %v4354_v25 = vpop.f32.mrf.mxu1 }
 0x518   :  { %v4686_v48 = vpack.c.bf16 %v4586_v50, %v4584_v44  ;;  %v4355_v53 = vadd.f32 %v4354_v25, %v9196_v54  ;;  %v4587_v2 = vmax.f32 %v4353_v28, 0.0 }
 0x519   :  { %v4356_v42 = vpop.f32.mrf.mxu1 }
 0x51a   :  { %v4357_v41 = vadd.f32 %v4356_v42, %v9199_v60  ;;  %4994 = vmatprep.mubr.bf16.mxu0 %v4686_v48  ;;  %v4588_v35 = vmax.f32 %v4355_v53, 0.0 }
 0x51b   :  { %v4358_v12 = vpop.f32.mrf.mxu1  ;;  %4995 = vmatmul.mubr.bf16.gmra.mxu0 %v4685_v49 }
 0x51c   :  { %v4359_v16 = vadd.f32 %v4358_v12, %v9196_v54  ;;  %v4589_v18 = vmax.f32 %v4357_v41, 0.0 }
 0x51d   :  { %v4362_v30 = vpop.f32.mrf.mxu1 }
 0x51e   :  { %v4590_v21 = vmax.f32 %v4359_v16, 0.0  ;;  %v4687_v59 = vpack.c.bf16 %v4589_v18, %v4587_v2  ;;  %v4363_v55 = vadd.f32 %v4362_v30, %v9199_v60 }
 0x51f   :  { %v4364_v9 = vpop.f32.mrf.mxu1 }
 0x520   :  { %v4688_v13 = vpack.c.bf16 %v4590_v21, %v4588_v35  ;;  %v4365_v5 = vadd.f32 %v4364_v9, %v9196_v54  ;;  %v4591_v1 = vmax.f32 %v4363_v55, 0.0 }
 0x521   :  { %v4366_v62 = vpop.f32.mrf.mxu1 }
 0x522   :  { %v4367_v15 = vadd.f32 %v4366_v62, %v9199_v60  ;;  %5002 = vmatprep.mubr.bf16.mxu0 %v4688_v13  ;;  %v4592_v27 = vmax.f32 %v4365_v5, 0.0 }
 0x523   :  { %v4368_v11 = vpop.f32.mrf.mxu1  ;;  %5003 = vmatmul.mubr.bf16.gmra.mxu0 %v4687_v59 }
 0x524   :  { %v4369_v51 = vadd.f32 %v4368_v11, %v9196_v54  ;;  %v4593_v36 = vmax.f32 %v4367_v15, 0.0 }
 0x525   :  { %v4372_v52 = vpop.f32.mrf.mxu1 }
 0x526   :  { %v4594_v63 = vmax.f32 %v4369_v51, 0.0  ;;  %v4689_v34 = vpack.c.bf16 %v4593_v36, %v4591_v1  ;;  %v4373_v17 = vadd.f32 %v4372_v52, %v9199_v60 }
 0x527   :  { %v4374_v6 = vpop.f32.mrf.mxu1 }
 0x528   :  { %v4690_v7 = vpack.c.bf16 %v4594_v63, %v4592_v27  ;;  %v4375_v38 = vadd.f32 %v4374_v6, %v9196_v54  ;;  %v4595_v57 = vmax.f32 %v4373_v17, 0.0 }
 0x529   :  { %v4376_v0 = vpop.f32.mrf.mxu1 }
 0x52a   :  { %v4377_v4 = vadd.f32 %v4376_v0, %v9199_v60  ;;  %5010 = vmatprep.mubr.bf16.mxu0 %v4690_v7  ;;  %v4596_v10 = vmax.f32 %v4375_v38, 0.0 }
 0x52b   :  { %v4378_v29 = vpop.f32.mrf.mxu1  ;;  %5011 = vmatmul.mubr.bf16.gmra.mxu0 %v4689_v34 }
 0x52c   :  { %v4379_v56 = vadd.f32 %v4378_v29, %v9196_v54  ;;  %v4597_v43 = vmax.f32 %v4377_v4, 0.0 }
 0x52d   :  { %v4382_v33 = vpop.f32.mrf.mxu1 }
 0x52e   :  { %v4598_v32 = vmax.f32 %v4379_v56, 0.0  ;;  %v4691_v20 = vpack.c.bf16 %v4597_v43, %v4595_v57  ;;  %v4383_v8 = vadd.f32 %v4382_v33, %v9199_v60 }
 0x52f   :  { %v4384_v24 = vpop.f32.mrf.mxu1 }
 0x530   :  { %v4692_v3 = vpack.c.bf16 %v4598_v32, %v4596_v10  ;;  %v4385_v46 = vadd.f32 %v4384_v24, %v9196_v54  ;;  %v4599_v58 = vmax.f32 %v4383_v8, 0.0 }
 0x531   :  { %v4386_v23 = vpop.f32.mrf.mxu1 }
 0x532   :  { %v4387_v14 = vadd.f32 %v4386_v23, %v9199_v60  ;;  %5018 = vmatprep.mubr.bf16.mxu0 %v4692_v3  ;;  %v4600_v61 = vmax.f32 %v4385_v46, 0.0 }
 0x533   :  { %v4388_v40 = vpop.f32.mrf.mxu1  ;;  %5019 = vmatmul.mubr.bf16.gmra.mxu0 %v4691_v20 }
 0x534   :  { %v4389_v39 = vadd.f32 %v4388_v40, %v9196_v54  ;;  %v4601_v37 = vmax.f32 %v4387_v14, 0.0 }
 0x535   :  { %v4392_v22 = vpop.f32.mrf.mxu1 }
 0x536   :  { %v4602_v26 = vmax.f32 %v4389_v39, 0.0  ;;  %v4693_v47 = vpack.c.bf16 %v4601_v37, %v4599_v58  ;;  %v4393_v48 = vadd.f32 %v4392_v22, %v9199_v60 }
 0x537   :  { %v4394_v19 = vpop.f32.mrf.mxu1 }
 0x538   :  { %v4694_v31 = vpack.c.bf16 %v4602_v26, %v4600_v61  ;;  %v4395_v50 = vadd.f32 %v4394_v19, %v9196_v54  ;;  %v4603_v16 = vmax.f32 %v4393_v48, 0.0 }
 0x539   :  { %v4396_v44 = vpop.f32.mrf.mxu1 }
 0x53a   :  { %v4397_v25 = vadd.f32 %v4396_v44, %v9199_v60  ;;  %5026 = vmatprep.mubr.bf16.mxu0 %v4694_v31  ;;  %v4604_v53 = vmax.f32 %v4395_v50, 0.0 }
 0x53b   :  { %v4398_v45 = vpop.f32.mrf.mxu1  ;;  %5027 = vmatmul.mubr.bf16.gmra.mxu0 %v4693_v47 }
 0x53c   :  { %v4399_v42 = vadd.f32 %v4398_v45, %v9196_v54  ;;  %v4605_v41 = vmax.f32 %v4397_v25, 0.0 }
 0x53d   :  { %v4402_v49 = vpop.f32.mrf.mxu1 }
 0x53e   :  { %v4606_v12 = vmax.f32 %v4399_v42, 0.0  ;;  %v4695_v18 = vpack.c.bf16 %v4605_v41, %v4603_v16  ;;  %v4403_v13 = vadd.f32 %v4402_v49, %v9199_v60 }
 0x53f   :  { %v4404_v28 = vpop.f32.mrf.mxu1 }
 0x540   :  { %v4696_v30 = vpack.c.bf16 %v4606_v12, %v4604_v53  ;;  %v4405_v21 = vadd.f32 %v4404_v28, %v9196_v54  ;;  %v4607_v51 = vmax.f32 %v4403_v13, 0.0 }
 0x541   :  { %v4406_v35 = vpop.f32.mrf.mxu1 }
 0x542   :  { %v4407_v9 = vadd.f32 %v4406_v35, %v9199_v60  ;;  %5034 = vmatprep.mubr.bf16.mxu0 %v4696_v30  ;;  %v4608_v5 = vmax.f32 %v4405_v21, 0.0 }
 0x543   :  { %v4408_v2 = vpop.f32.mrf.mxu1  ;;  %5035 = vmatmul.mubr.bf16.gmra.mxu0 %v4695_v18 }
 0x544   :  { %v4409_v62 = vadd.f32 %v4408_v2, %v9196_v54  ;;  %v4609_v15 = vmax.f32 %v4407_v9, 0.0 }
 0x545   :  { %v4412_v59 = vpop.f32.mrf.mxu1 }
 0x546   :  { %v4610_v11 = vmax.f32 %v4409_v62, 0.0  ;;  %v4697_v36 = vpack.c.bf16 %v4609_v15, %v4607_v51  ;;  %v4413_v7 = vadd.f32 %v4412_v59, %v9199_v60 }
 0x547   :  { %v4414_v55 = vpop.f32.mrf.mxu1 }
 0x548   :  { %v4698_v52 = vpack.c.bf16 %v4610_v11, %v4608_v5  ;;  %v4415_v63 = vadd.f32 %v4414_v55, %v9196_v54  ;;  %v4611_v56 = vmax.f32 %v4413_v7, 0.0 }
 0x549   :  { %v4416_v27 = vpop.f32.mrf.mxu1 }
 0x54a   :  { %v4417_v6 = vadd.f32 %v4416_v27, %v9199_v60  ;;  %5042 = vmatprep.mubr.bf16.mxu0 %v4698_v52  ;;  %v4612_v38 = vmax.f32 %v4415_v63, 0.0 }
 0x54b   :  { %v4418_v1 = vpop.f32.mrf.mxu1  ;;  %5043 = vmatmul.mubr.bf16.gmra.mxu0 %v4697_v36 }
 0x54c   :  { %v4419_v0 = vadd.f32 %v4418_v1, %v9196_v54  ;;  %v4613_v4 = vmax.f32 %v4417_v6, 0.0 }
 0x54d   :  { %v4422_v34 = vpop.f32.mrf.mxu1 }
 0x54e   :  { %v4614_v29 = vmax.f32 %v4419_v0, 0.0  ;;  %v4699_v43 = vpack.c.bf16 %v4613_v4, %v4611_v56  ;;  %v4423_v3 = vadd.f32 %v4422_v34, %v9199_v60  ;;  %v9330_v56 = vld [vmem:[#allocation2] ss:$0 sm:$0xff] }
 0x54f   :  { %v4424_v17 = vpop.f32.mrf.mxu1 }
 0x550   :  { %v4700_v33 = vpack.c.bf16 %v4614_v29, %v4612_v38  ;;  %v4425_v32 = vadd.f32 %v4424_v17, %v9196_v54  ;;  %v4615_v39 = vmax.f32 %v4423_v3, 0.0 }
 0x551   :  { %v4426_v10 = vpop.f32.mrf.mxu1 }
 0x552   :  { %v4427_v24 = vadd.f32 %v4426_v10, %v9199_v60  ;;  %5050 = vmatprep.mubr.bf16.mxu0 %v4700_v33  ;;  %v4616_v46 = vmax.f32 %v4425_v32, 0.0 }
 0x553   :  { %v4428_v57 = vpop.f32.mrf.mxu1  ;;  %5051 = vmatmul.mubr.bf16.gmra.mxu0 %v4699_v43 }
 0x554   :  { %v4429_v23 = vadd.f32 %v4428_v57, %v9196_v54  ;;  %v4617_v14 = vmax.f32 %v4427_v24, 0.0 }
 0x555   :  { %v4432_v20 = vpop.f32.mrf.mxu1 }
 0x556   :  { %v4618_v40 = vmax.f32 %v4429_v23, 0.0  ;;  %v4701_v37 = vpack.c.bf16 %v4617_v14, %v4615_v39  ;;  %v4433_v31 = vadd.f32 %v4432_v20, %v9199_v60 }
 0x557   :  { %v4434_v8 = vpop.f32.mrf.mxu1 }
 0x558   :  { %v4702_v22 = vpack.c.bf16 %v4618_v40, %v4616_v46  ;;  %v4435_v26 = vadd.f32 %v4434_v8, %v9196_v54  ;;  %v4619_v42 = vmax.f32 %v4433_v31, 0.0 }
 0x559   :  { %v4436_v61 = vpop.f32.mrf.mxu1 }
 0x55a   :  { %v4437_v19 = vadd.f32 %v4436_v61, %v9199_v60  ;;  %5058 = vmatprep.mubr.bf16.mxu0 %v4702_v22  ;;  %v4620_v50 = vmax.f32 %v4435_v26, 0.0 }
 0x55b   :  { %v4438_v58 = vpop.f32.mrf.mxu1  ;;  %5059 = vmatmul.mubr.bf16.gmra.mxu0 %v4701_v37 }
 0x55c   :  { %v4439_v44 = vadd.f32 %v4438_v58, %v9196_v54  ;;  %v4621_v25 = vmax.f32 %v4437_v19, 0.0 }
 0x55d   :  { %v4442_v47 = vpop.f32.mrf.mxu1 }
 0x55e   :  { %v4622_v45 = vmax.f32 %v4439_v44, 0.0  ;;  %v4703_v41 = vpack.c.bf16 %v4621_v25, %v4619_v42  ;;  %v4443_v30 = vadd.f32 %v4442_v47, %v9199_v60 }
 0x55f   :  { %v4444_v48 = vpop.f32.mrf.mxu1 }
 0x560   :  { %v4704_v49 = vpack.c.bf16 %v4622_v45, %v4620_v50  ;;  %v4445_v12 = vadd.f32 %v4444_v48, %v9196_v54  ;;  %v4623_v62 = vmax.f32 %v4443_v30, 0.0 }
 0x561   :  { %v4446_v53 = vpop.f32.mrf.mxu1 }
 0x562   :  { %v4447_v28 = vadd.f32 %v4446_v53, %v9199_v60  ;;  %5066 = vmatprep.mubr.bf16.mxu0 %v4704_v49  ;;  %v4624_v21 = vmax.f32 %v4445_v12, 0.0 }
 0x563   :  { %v4448_v16 = vpop.f32.mrf.mxu1  ;;  %5067 = vmatmul.mubr.bf16.gmra.mxu0 %v4703_v41 }
 0x564   :  { %v4449_v35 = vadd.f32 %v4448_v16, %v9196_v54  ;;  %v4625_v9 = vmax.f32 %v4447_v28, 0.0 }
 0x565   :  { %v4452_v18 = vpop.f32.mrf.mxu1 }
 0x566   :  { %v4626_v2 = vmax.f32 %v4449_v35, 0.0  ;;  %v4705_v15 = vpack.c.bf16 %v4625_v9, %v4623_v62  ;;  %v4453_v52 = vadd.f32 %v4452_v18, %v9199_v60 }
 0x567   :  { %v4454_v13 = vpop.f32.mrf.mxu1 }
 0x568   :  { %v4706_v59 = vpack.c.bf16 %v4626_v2, %v4624_v21  ;;  %v4455_v11 = vadd.f32 %v4454_v13, %v9196_v54  ;;  %v4627_v0 = vmax.f32 %v4453_v52, 0.0 }
 0x569   :  { %v4456_v5 = vpop.f32.mrf.mxu1 }
 0x56a   :  { %v4457_v55 = vadd.f32 %v4456_v5, %v9199_v60  ;;  %5074 = vmatprep.mubr.bf16.mxu0 %v4706_v59  ;;  %v4628_v63 = vmax.f32 %v4455_v11, 0.0 }
 0x56b   :  { %v4458_v51 = vpop.f32.mrf.mxu1  ;;  %5075 = vmatmul.mubr.bf16.gmra.mxu0 %v4705_v15 }
 0x56c   :  { %v4459_v27 = vadd.f32 %v4458_v51, %v9196_v54  ;;  %v4629_v6 = vmax.f32 %v4457_v55, 0.0 }
 0x56d   :  { %v4462_v36 = vpop.f32.mrf.mxu1 }
 0x56e   :  { %v4630_v1 = vmax.f32 %v4459_v27, 0.0  ;;  %v4707_v4 = vpack.c.bf16 %v4629_v6, %v4627_v0  ;;  %v4463_v10 = vadd.f32 %v4462_v36, %v9199_v60 }
 0x56f   :  { %v4464_v7 = vpop.f32.mrf.mxu1 }
 0x570   :  { %v4708_v34 = vpack.c.bf16 %v4630_v1, %v4628_v63  ;;  %v4465_v29 = vadd.f32 %v4464_v7, %v9196_v54  ;;  %v4631_v40 = vmax.f32 %v4463_v10, 0.0 }
 0x571   :  { %v4466_v38 = vpop.f32.mrf.mxu1 }
 0x572   :  { %v4467_v17 = vadd.f32 %v4466_v38, %v9199_v60  ;;  %5082 = vmatprep.mubr.bf16.mxu0 %v4708_v34  ;;  %v4632_v57 = vmax.f32 %v4465_v29, 0.0 }
 0x573   :  { %v4468_v33 = vpop.f32.mrf.mxu1  ;;  %v4892_v32 = vpop.f32.mrf.mxu0  ;;  %5083 = vmatmul.mubr.bf16.gmra.mxu0 %v4707_v4 }
 0x574   :  { %v4469_v43 = vadd.f32 %v4468_v33, %v9196_v54  ;;  %v4893_v24 = vadd.f32 %v9330_v56, %v4892_v32  ;;  %v4633_v3 = vmax.f32 %v4467_v17, 0.0 }
 0x575   :  { %v4472_v20 = vpop.f32.mrf.mxu1  ;;  %v4894_v46 = vpop.f32.mrf.mxu0 }
 0x576   :  { %v4634_v23 = vmax.f32 %v4469_v43, 0.0  ;;  %v6078_v14 = vmul.f32 -1.442695, %v4893_v24  ;;  %v4709_v37 = vpack.c.bf16 %v4633_v3, %v4631_v40  ;;  %v4473_v47 = vadd.f32 %v4472_v20, %v9199_v60 }
 0x577   :  { %v4474_v39 = vpop.f32.mrf.mxu1  ;;  %v4895_v22 = vpop.f32.mrf.mxu0 }
 0x578   :  { %v4710_v8 = vpack.c.bf16 %v4634_v23, %v4632_v57  ;;  %6490 = vpow2.f32 %v6078_v14  ;;  %v4896_v61 = vadd.f32 %v9330_v56, %v4895_v22  ;;  %v4475_v58 = vadd.f32 %v4474_v39, %v9196_v54 }
 0x579   :  { %v4476_v26 = vpop.f32.mrf.mxu1  ;;  %v4897_v19 = vpop.f32.mrf.mxu0  ;;  %v4635_v16 = vmax.f32 %v4473_v47, 0.0 }
 0x57a   :  { %5090 = vmatprep.mubr.bf16.mxu0 %v4710_v8  ;;  %v6079_v31 = vmul.f32 -1.442695, %v4896_v61  ;;  %v4477_v44 = vadd.f32 %v4476_v26, %v9199_v60  ;;  %v4636_v41 = vmax.f32 %v4475_v58, 0.0 }
 0x57b   :  { %v4478_v50 = vpop.f32.mrf.mxu1  ;;  %v4900_v25 = vpop.f32.mrf.mxu0  ;;  %5091 = vmatmul.mubr.bf16.gmra.mxu0 %v4709_v37 }
 0x57c   :  { %6492 = vpow2.f32 %v6079_v31  ;;  %v4479_v45 = vadd.f32 %v4478_v50, %v9196_v54  ;;  %v4901_v48 = vadd.f32 %v9330_v56, %v4900_v25  ;;  %v4637_v42 = vmax.f32 %v4477_v44, 0.0 }
 0x57d   :  { %v4482_v49 = vpop.f32.mrf.mxu1  ;;  %v4902_v53 = vpop.f32.mrf.mxu0 }
 0x57e   :  { %v4638_v12 = vmax.f32 %v4479_v45, 0.0  ;;  %v6080_v28 = vmul.f32 -1.442695, %v4901_v48  ;;  %v4711_v21 = vpack.c.bf16 %v4637_v42, %v4635_v16  ;;  %v4483_v5 = vadd.f32 %v4482_v49, %v9199_v60 }
 0x57f   :  { %v4484_v30 = vpop.f32.mrf.mxu1  ;;  %v4903_v35 = vpop.f32.mrf.mxu0 }
 0x580   :  { %v4712_v18 = vpack.c.bf16 %v4638_v12, %v4636_v41  ;;  %6494 = vpow2.f32 %v6080_v28  ;;  %v4904_v9 = vadd.f32 %v9330_v56, %v4903_v35  ;;  %v4485_v62 = vadd.f32 %v4484_v30, %v9196_v54 }
 0x581   :  { %v4486_v2 = vpop.f32.mrf.mxu1  ;;  %v4905_v13 = vpop.f32.mrf.mxu0  ;;  %v4639_v38 = vmax.f32 %v4483_v5, 0.0 }
 0x582   :  { %v4487_v59 = vadd.f32 %v4486_v2, %v9199_v60  ;;  %5098 = vmatprep.mubr.bf16.mxu0 %v4712_v18  ;;  %v6081_v15 = vmul.f32 -1.442695, %v4904_v9  ;;  %v4640_v7 = vmax.f32 %v4485_v62, 0.0 }
 0x583   :  { %v4488_v11 = vpop.f32.mrf.mxu1  ;;  %v4908_v55 = vpop.f32.mrf.mxu0  ;;  %5099 = vmatmul.mubr.bf16.gmra.mxu0 %v4711_v21 }
 0x584   :  { %v4489_v51 = vadd.f32 %v4488_v11, %v9196_v54  ;;  %v4909_v52 = vadd.f32 %v9330_v56, %v4908_v55  ;;  %6496 = vpow2.f32 %v6081_v15  ;;  %v4641_v36 = vmax.f32 %v4487_v59, 0.0 }
 0x585   :  { %v6491_v27 = vpop.eup %6490  ;;  %v4492_v63 = vpop.f32.mrf.mxu1 }
 0x586   :  { %v4910_v6 = vpop.f32.mrf.mxu0  ;;  %v5339_v1 = vadd.f32 1.0, %v6491_v27  ;;  %v4642_v0 = vmax.f32 %v4489_v51, 0.0  ;;  %v6082_v34 = vmul.f32 -1.442695, %v4909_v52  ;;  %v4713_v43 = vpack.c.bf16 %v4641_v36, %v4639_v38 }
 0x587   :  { %v4494_v4 = vpop.f32.mrf.mxu1  ;;  %v4493_v46 = vadd.f32 %v4492_v63, %v9199_v60 }
 0x588   :  { %v4911_v29 = vpop.f32.mrf.mxu0  ;;  %6498 = vrcp.f32 %v5339_v1  ;;  %v4714_v17 = vpack.c.bf16 %v4642_v0, %v4640_v7  ;;  %v4495_v3 = vadd.f32 %v4494_v4, %v9196_v54 }
 0x589   :  { %v4912_v33 = vadd.f32 %v9330_v56, %v4911_v29  ;;  %v6493_v10 = vpop.eup %6492  ;;  %6500 = vpow2.f32 %v6082_v34  ;;  %v4496_v32 = vpop.f32.mrf.mxu1  ;;  %v4643_v47 = vmax.f32 %v4493_v46, 0.0 }
 0x58a   :  { %v4913_v24 = vpop.f32.mrf.mxu0  ;;  %v5340_v57 = vadd.f32 1.0, %v6493_v10  ;;  %v4497_v20 = vadd.f32 %v4496_v32, %v9199_v60  ;;  %5106 = vmatprep.mubr.bf16.mxu0 %v4714_v17  ;;  %v4644_v58 = vmax.f32 %v4495_v3, 0.0 }
 0x58b   :  { %v6083_v23 = vmul.f32 -1.442695, %v4912_v33  ;;  %v4498_v14 = vpop.f32.mrf.mxu1  ;;  %5107 = vmatmul.mubr.bf16.gmra.mxu0 %v4713_v43 }
 0x58c   :  { %v4916_v40 = vpop.f32.mrf.mxu0  ;;  %6502 = vrcp.f32 %v5340_v57  ;;  %v4499_v8 = vadd.f32 %v4498_v14, %v9196_v54  ;;  %v4645_v61 = vmax.f32 %v4497_v20, 0.0 }
 0x58d   :  { %v4917_v39 = vadd.f32 %v9330_v56, %v4916_v40  ;;  %v6495_v22 = vpop.eup %6494  ;;  %6504 = vpow2.f32 %v6083_v23  ;;  %v4502_v37 = vpop.f32.mrf.mxu1 }
 0x58e   :  { %v4918_v26 = vpop.f32.mrf.mxu0  ;;  %v5341_v19 = vadd.f32 1.0, %v6495_v22  ;;  %v4646_v31 = vmax.f32 %v4499_v8, 0.0  ;;  %v4715_v42 = vpack.c.bf16 %v4645_v61, %v4643_v47  ;;  %v4503_v35 = vadd.f32 %v4502_v37, %v9199_v60 }
 0x58f   :  { %v6084_v44 = vmul.f32 -1.442695, %v4917_v39  ;;  %v4504_v50 = vpop.f32.mrf.mxu1 }
 0x590   :  { %v4919_v25 = vpop.f32.mrf.mxu0  ;;  %6506 = vrcp.f32 %v5341_v19  ;;  %v4716_v45 = vpack.c.bf16 %v4646_v31, %v4644_v58  ;;  %v4505_v12 = vadd.f32 %v4504_v50, %v9196_v54  ;;  %v4647_v27 = vmax.f32 %v4503_v35, 0.0 }
 0x591   :  { %v4920_v48 = vadd.f32 %v9330_v56, %v4919_v25  ;;  %6508 = vpow2.f32 %v6084_v44  ;;  %v4506_v49 = vpop.f32.mrf.mxu1  ;;  %v6497_v41 = vpop.eup %6496 }
 0x592   :  { %v4921_v53 = vpop.f32.mrf.mxu0  ;;  %v4507_v16 = vadd.f32 %v4506_v49, %v9199_v60  ;;  %5114 = vmatprep.mubr.bf16.mxu0 %v4716_v45  ;;  %v5342_v30 = vadd.f32 1.0, %v6497_v41  ;;  %v4648_v11 = vmax.f32 %v4505_v12, 0.0 }
 0x593   :  { %v6085_v28 = vmul.f32 -1.442695, %v4920_v48  ;;  %v4508_v18 = vpop.f32.mrf.mxu1  ;;  %5115 = vmatmul.mubr.bf16.gmra.mxu0 %v4715_v42 }
 0x594   :  { %v4924_v21 = vpop.f32.mrf.mxu0  ;;  %v4509_v9 = vadd.f32 %v4508_v18, %v9196_v54  ;;  %v4649_v62 = vmax.f32 %v4507_v16, 0.0 }
 0x595   :  { %6510 = vpow2.f32 %v6085_v28  ;;  %v4925_v2 = vadd.f32 %v9330_v56, %v4924_v21  ;;  %v6499_v13 = vpop.eup %6498  ;;  %v4512_v59 = vpop.f32.mrf.mxu1 }
 0x596   :  { %6512 = vrcp.f32 %v5342_v30  ;;  %v4926_v5 = vpop.f32.mrf.mxu0  ;;  %v6501_v15 = vpop.eup %6500  ;;  %v4650_v55 = vmax.f32 %v4509_v9, 0.0  ;;  %5531 = vxpose.xlu0.b32.start [1/16] (narrow) %v6499_v13, 8  ;;  %v4717_v7 = vpack.c.bf16 %v4649_v62, %v4647_v27  ;;  %v4513_v10 = vadd.f32 %v4512_v59, %v9199_v60 }
 0x597   :  { %v6086_v51 = vmul.f32 -1.442695, %v4925_v2  ;;  %v5343_v52 = vadd.f32 1.0, %v6501_v15  ;;  %v4514_v36 = vpop.f32.mrf.mxu1 }
 0x598   :  { %v4927_v63 = vpop.f32.mrf.mxu0  ;;  %v4718_v6 = vpack.c.bf16 %v4650_v55, %v4648_v11  ;;  %v4515_v29 = vadd.f32 %v4514_v36, %v9196_v54  ;;  %v4651_v37 = vmax.f32 %v4513_v10, 0.0 }
 0x599   :  { %6514 = vpow2.f32 %v6086_v51  ;;  %v6503_v1 = vpop.eup %6502  ;;  %v4928_v0 = vadd.f32 %v9330_v56, %v4927_v63  ;;  %v4516_v34 = vpop.f32.mrf.mxu1 }
 0x59a   :  { %6516 = vrcp.f32 %v5343_v52  ;;  %v4929_v38 = vpop.f32.mrf.mxu0  ;;  %v6505_v4 = vpop.eup %6504  ;;  %v4517_v17 = vadd.f32 %v4516_v34, %v9199_v60  ;;  %5122 = vmatprep.mubr.bf16.mxu0 %v4718_v6  ;;  %5532 = vxpose.xlu0.b32.cont [2/16] (narrow) %v6503_v1, 8  ;;  %v4652_v8 = vmax.f32 %v4515_v29, 0.0 }
 0x59b   :  { %v5344_v33 = vadd.f32 1.0, %v6505_v4  ;;  %v6087_v43 = vmul.f32 -1.442695, %v4928_v0  ;;  %v4518_v32 = vpop.f32.mrf.mxu1  ;;  %5123 = vmatmul.mubr.bf16.gmra.mxu0 %v4717_v7 }
 0x59c   :  { %v4932_v24 = vpop.f32.mrf.mxu0  ;;  %v4519_v57 = vadd.f32 %v4518_v32, %v9196_v54  ;;  %v4653_v20 = vmax.f32 %v4517_v17, 0.0 }
 0x59d   :  { %v4933_v3 = vadd.f32 %v9330_v56, %v4932_v24  ;;  %v6507_v23 = vpop.eup %6506  ;;  %6518 = vrcp.f32 %v5344_v33  ;;  %v4522_v46 = vpop.f32.mrf.mxu1 }
 0x59e   :  { %v4934_v14 = vpop.f32.mrf.mxu0  ;;  %v6509_v40 = vpop.eup %6508  ;;  %6520 = vpow2.f32 %v6087_v43  ;;  %v4654_v39 = vmax.f32 %v4519_v57, 0.0  ;;  %5533 = vxpose.xlu0.b32.cont [3/16] (narrow) %v6507_v23, 8  ;;  %v4719_v47 = vpack.c.bf16 %v4653_v20, %v4651_v37  ;;  %v4523_v41 = vadd.f32 %v4522_v46, %v9199_v60 }
 0x59f   :  { %v6088_v22 = vmul.f32 -1.442695, %v4933_v3  ;;  %v5345_v61 = vadd.f32 1.0, %v6509_v40  ;;  %v4524_v26 = vpop.f32.mrf.mxu1 }
 0x5a0   :  { %v4935_v19 = vpop.f32.mrf.mxu0  ;;  %v4720_v58 = vpack.c.bf16 %v4654_v39, %v4652_v8  ;;  %v4525_v42 = vadd.f32 %v4524_v26, %v9196_v54  ;;  %v4655_v5 = vmax.f32 %v4523_v41, 0.0 }
 0x5a1   :  { %6522 = vpow2.f32 %v6088_v22  ;;  %v4936_v31 = vadd.f32 %v9330_v56, %v4935_v19  ;;  %v4526_v50 = vpop.f32.mrf.mxu1 }
 0x5a2   :  { %v6511_v44 = vpop.eup %6510  ;;  %6524 = vrcp.f32 %v5345_v61  ;;  %v4937_v25 = vpop.f32.mrf.mxu0  ;;  %v4527_v53 = vadd.f32 %v4526_v50, %v9199_v60  ;;  %5130 = vmatprep.mubr.bf16.mxu0 %v4720_v58  ;;  %v4656_v13 = vmax.f32 %v4525_v42, 0.0 }
 0x5a3   :  { %v6513_v45 = vpop.eup %6512  ;;  %v5346_v48 = vadd.f32 1.0, %v6511_v44  ;;  %v6089_v49 = vmul.f32 -1.442695, %v4936_v31  ;;  %v4528_v12 = vpop.f32.mrf.mxu1  ;;  %5131 = vmatmul.mubr.bf16.gmra.mxu0 %v4719_v47 }
 0x5a4   :  { %5534 = vxpose.xlu0.b32.cont [4/16] (narrow) %v6513_v45, 8  ;;  %v4940_v28 = vpop.f32.mrf.mxu0  ;;  %v4529_v16 = vadd.f32 %v4528_v12, %v9196_v54  ;;  %v4657_v18 = vmax.f32 %v4527_v53, 0.0 }
 0x5a5   :  { %6526 = vrcp.f32 %v5346_v48  ;;  %v4941_v30 = vadd.f32 %v9330_v56, %v4940_v28 }
 0x5a6   :  { %v6515_v35 = vpop.eup %6514  ;;  %6528 = vpow2.f32 %v6089_v49  ;;  %v4942_v21 = vpop.f32.mrf.mxu0  ;;  %v4658_v62 = vmax.f32 %v4529_v16, 0.0  ;;  %v4721_v55 = vpack.c.bf16 %v4657_v18, %v4655_v5 }
 0x5a7   :  { %v6517_v9 = vpop.eup %6516  ;;  %v5347_v2 = vadd.f32 1.0, %v6515_v35  ;;  %v6090_v59 = vmul.f32 -1.442695, %v4941_v30 }
 0x5a8   :  { %5535 = vxpose.xlu0.b32.cont [5/16] (narrow) %v6517_v9, 8  ;;  %v4943_v60 = vpop.f32.mrf.mxu0  ;;  %v4722_v15 = vpack.c.bf16 %v4658_v62, %v4656_v13 }
 0x5a9   :  { %6530 = vrcp.f32 %v5347_v2  ;;  %v4944_v11 = vadd.f32 %v9330_v56, %v4943_v60 }
 0x5aa   :  { %6532 = vpow2.f32 %v6090_v59  ;;  %v4945_v54 = vpop.f32.mrf.mxu0  ;;  %v6519_v51 = vpop.eup %6518  ;;  %5138 = vmatprep.mubr.bf16.mxu0 %v4722_v15 }
 0x5ab   :  { %v6091_v52 = vmul.f32 -1.442695, %v4944_v11  ;;  %v6521_v27 = vpop.eup %6520  ;;  %5139 = vmatmul.mubr.bf16.gmra.mxu0 %v4721_v55 }
 0x5ac   :  { %5536 = vxpose.xlu0.b32.cont [6/16] (narrow) %v6519_v51, 8  ;;  %v4948_v36 = vpop.f32.mrf.mxu0  ;;  %v5348_v63 = vadd.f32 1.0, %v6521_v27 }
 0x5ad   :  { %6534 = vpow2.f32 %v6091_v52  ;;  %v4949_v6 = vadd.f32 %v9330_v56, %v4948_v36 }
 0x5ae   :  { %v6523_v1 = vpop.eup %6522  ;;  %v4950_v7 = vpop.f32.mrf.mxu0  ;;  %6536 = vrcp.f32 %v5348_v63 }
 0x5af   :  { %v6525_v0 = vpop.eup %6524  ;;  %v5349_v34 = vadd.f32 1.0, %v6523_v1  ;;  %v6092_v38 = vmul.f32 -1.442695, %v4949_v6 }
 0x5b0   :  { %5537 = vxpose.xlu0.b32.cont [7/16] (narrow) %v6525_v0, 8  ;;  %v4951_v4 = vpop.f32.mrf.mxu0 }
 0x5b1   :  { %6538 = vrcp.f32 %v5349_v34  ;;  %v4952_v29 = vadd.f32 %v9330_v56, %v4951_v4 }
 0x5b2   :  { %v6527_v17 = vpop.eup %6526  ;;  %6540 = vpow2.f32 %v6092_v38  ;;  %v4953_v33 = vpop.f32.mrf.mxu0 }
 0x5b3   :  { %v6529_v10 = vpop.eup %6528  ;;  %v6093_v43 = vmul.f32 -1.442695, %v4952_v29 }
 0x5b4   :  { %v5350_v32 = vadd.f32 1.0, %v6529_v10  ;;  %5538 = vxpose.xlu0.b32.cont [8/16] (narrow) %v6527_v17, 8  ;;  %v4956_v24 = vpop.f32.mrf.mxu0 }
 0x5b5   :  { %6542 = vpow2.f32 %v6093_v43  ;;  %v4957_v57 = vadd.f32 %v9330_v56, %v4956_v24 }
 0x5b6   :  { %v6531_v3 = vpop.eup %6530  ;;  %6544 = vrcp.f32 %v5350_v32  ;;  %v4958_v23 = vpop.f32.mrf.mxu0 }
 0x5b7   :  { %v6533_v20 = vpop.eup %6532  ;;  %v6094_v46 = vmul.f32 -1.442695, %v4957_v57 }
 0x5b8   :  { %v5351_v14 = vadd.f32 1.0, %v6533_v20  ;;  %5539 = vxpose.xlu0.b32.cont [9/16] (narrow) %v6531_v3, 8  ;;  %v4959_v40 = vpop.f32.mrf.mxu0 }
 0x5b9   :  { %6546 = vpow2.f32 %v6094_v46  ;;  %v4960_v8 = vadd.f32 %v9330_v56, %v4959_v40 }
 0x5ba   :  { %v6535_v39 = vpop.eup %6534  ;;  %6548 = vrcp.f32 %v5351_v14  ;;  %v4961_v22 = vpop.f32.mrf.mxu0 }
 0x5bb   :  { %v5352_v61 = vadd.f32 1.0, %v6535_v39  ;;  %v6095_v37 = vmul.f32 -1.442695, %v4960_v8  ;;  %v6537_v26 = vpop.eup %6536 }
 0x5bc   :  { %v4964_v19 = vpop.f32.mrf.mxu0  ;;  %5540 = vxpose.xlu0.b32.cont [10/16] (narrow) %v6537_v26, 8 }
 0x5bd   :  { %6550 = vrcp.f32 %v5352_v61  ;;  %v4965_v58 = vadd.f32 %v9330_v56, %v4964_v19 }
 0x5be   :  { %v6539_v31 = vpop.eup %6538  ;;  %6552 = vpow2.f32 %v6095_v37  ;;  %v4966_v44 = vpop.f32.mrf.mxu0 }
 0x5bf   :  { %v6541_v47 = vpop.eup %6540  ;;  %v6096_v50 = vmul.f32 -1.442695, %v4965_v58 }
 0x5c0   :  { %v5353_v25 = vadd.f32 1.0, %v6541_v47  ;;  %v4967_v45 = vpop.f32.mrf.mxu0  ;;  %5541 = vxpose.xlu0.b32.cont [11/16] (narrow) %v6539_v31, 8 }
 0x5c1   :  { %6554 = vpow2.f32 %v6096_v50  ;;  %v4968_v48 = vadd.f32 %v9330_v56, %v4967_v45 }
 0x5c2   :  { %v6543_v42 = vpop.eup %6542  ;;  %6556 = vrcp.f32 %v5353_v25  ;;  %v4969_v49 = vpop.f32.mrf.mxu0 }
 0x5c3   :  { %v6545_v53 = vpop.eup %6544  ;;  %v5354_v41 = vadd.f32 1.0, %v6543_v42  ;;  %v6097_v12 = vmul.f32 -1.442695, %v4968_v48 }
 0x5c4   :  { %v4972_v28 = vpop.f32.mrf.mxu0  ;;  %5542 = vxpose.xlu0.b32.cont [12/16] (narrow) %v6545_v53, 8 }
 0x5c5   :  { %6558 = vrcp.f32 %v5354_v41  ;;  %v4973_v16 = vadd.f32 %v9330_v56, %v4972_v28 }
 0x5c6   :  { %v6547_v30 = vpop.eup %6546  ;;  %6560 = vpow2.f32 %v6097_v12  ;;  %v4974_v35 = vpop.f32.mrf.mxu0 }
 0x5c7   :  { %v6549_v18 = vpop.eup %6548  ;;  %v5355_v21 = vadd.f32 1.0, %v6547_v30  ;;  %v6098_v9 = vmul.f32 -1.442695, %v4973_v16 }
 0x5c8   :  { %v4975_v2 = vpop.f32.mrf.mxu0  ;;  %5543 = vxpose.xlu0.b32.cont [13/16] (narrow) %v6549_v18, 8 }
 0x5c9   :  { %6562 = vrcp.f32 %v5355_v21  ;;  %v4976_v13 = vadd.f32 %v9330_v56, %v4975_v2 }
 0x5ca   :  { %v6551_v62 = vpop.eup %6550  ;;  %6564 = vpow2.f32 %v6098_v9  ;;  %v4977_v59 = vpop.f32.mrf.mxu0 }
 0x5cb   :  { %v6553_v5 = vpop.eup %6552  ;;  %v6099_v60 = vmul.f32 -1.442695, %v4976_v13 }
 0x5cc   :  { %v5356_v15 = vadd.f32 1.0, %v6553_v5  ;;  %v4980_v11 = vpop.f32.mrf.mxu0  ;;  %5544 = vxpose.xlu0.b32.cont [14/16] (narrow) %v6551_v62, 8 }
 0x5cd   :  { %6566 = vpow2.f32 %v6099_v60  ;;  %v4981_v55 = vadd.f32 %v9330_v56, %v4980_v11 }
 0x5ce   :  { %v6555_v54 = vpop.eup %6554  ;;  %6568 = vrcp.f32 %v5356_v15  ;;  %v4982_v51 = vpop.f32.mrf.mxu0 }
 0x5cf   :  { %v6557_v52 = vpop.eup %6556  ;;  %v5357_v27 = vadd.f32 1.0, %v6555_v54  ;;  %v6100_v36 = vmul.f32 -1.442695, %v4981_v55 }
 0x5d0   :  { %v4983_v63 = vpop.f32.mrf.mxu0  ;;  %5545 = vxpose.xlu0.b32.cont [15/16] (narrow) %v6557_v52, 8 }
 0x5d1   :  { %6570 = vrcp.f32 %v5357_v27  ;;  %v4984_v6 = vadd.f32 %v9330_v56, %v4983_v63 }
 0x5d2   :  { %v6559_v1 = vpop.eup %6558  ;;  %6572 = vpow2.f32 %v6100_v36  ;;  %v4985_v7 = vpop.f32.mrf.mxu0 }
 0x5d3   :  { %v6561_v0 = vpop.eup %6560  ;;  %v6101_v34 = vmul.f32 -1.442695, %v4984_v6 }
 0x5d4   :  { %v5358_v38 = vadd.f32 1.0, %v6561_v0  ;;  %v4988_v4 = vpop.f32.mrf.mxu0  ;;  %5546 = vxpose.xlu0.b32.end [16/16] (narrow) %v6559_v1, 8 }
 0x5d5   :  { %6574 = vpow2.f32 %v6101_v34  ;;  %v4989_v29 = vadd.f32 %v9330_v56, %v4988_v4 }
 0x5d6   :  { %v6563_v17 = vpop.eup %6562  ;;  %6576 = vrcp.f32 %v5358_v38  ;;  %v4990_v33 = vpop.f32.mrf.mxu0 }
 0x5d7   :  { %v6565_v10 = vpop.eup %6564  ;;  %v6102_v43 = vmul.f32 -1.442695, %v4989_v29  ;;  %5563 = vxpose.xlu1.b32.start [1/16] (narrow) %v6563_v17, 8 }
 0x5d8   :  { %v5359_v32 = vadd.f32 1.0, %v6565_v10  ;;  %v4991_v24 = vpop.f32.mrf.mxu0 }
 0x5d9   :  { %6578 = vpow2.f32 %v6102_v43  ;;  %v4992_v57 = vadd.f32 %v9330_v56, %v4991_v24 }
 0x5da   :  { %v6567_v3 = vpop.eup %6566  ;;  %6580 = vrcp.f32 %v5359_v32  ;;  %v4993_v23 = vpop.f32.mrf.mxu0 }
 0x5db   :  { %v6569_v20 = vpop.eup %6568  ;;  %v5360_v46 = vadd.f32 1.0, %v6567_v3  ;;  %v6103_v14 = vmul.f32 -1.442695, %v4992_v57 }
 0x5dc   :  { %5564 = vxpose.xlu1.b32.cont [2/16] (narrow) %v6569_v20, 8  ;;  %v4996_v40 = vpop.f32.mrf.mxu0 }
 0x5dd   :  { %6582 = vrcp.f32 %v5360_v46  ;;  %v4997_v8 = vadd.f32 %v9330_v56, %v4996_v40 }
 0x5de   :  { %v6571_v39 = vpop.eup %6570  ;;  %6584 = vpow2.f32 %v6103_v14  ;;  %v4998_v22 = vpop.f32.mrf.mxu0 }
 0x5df   :  { %v6573_v61 = vpop.eup %6572  ;;  %v6104_v37 = vmul.f32 -1.442695, %v4997_v8 }
 0x5e0   :  { %v5361_v26 = vadd.f32 1.0, %v6573_v61  ;;  %5565 = vxpose.xlu1.b32.cont [3/16] (narrow) %v6571_v39, 8  ;;  %v4999_v19 = vpop.f32.mrf.mxu0 }
 0x5e1   :  { %6586 = vpow2.f32 %v6104_v37  ;;  %v5000_v58 = vadd.f32 %v9330_v56, %v4999_v19 }
 0x5e2   :  { %v6575_v31 = vpop.eup %6574  ;;  %6588 = vrcp.f32 %v5361_v26  ;;  %v5001_v44 = vpop.f32.mrf.mxu0 }
 0x5e3   :  { %v6577_v47 = vpop.eup %6576  ;;  %v5362_v50 = vadd.f32 1.0, %v6575_v31  ;;  %v6105_v25 = vmul.f32 -1.442695, %v5000_v58 }
 0x5e4   :  { %5566 = vxpose.xlu1.b32.cont [4/16] (narrow) %v6577_v47, 8  ;;  %v5004_v45 = vpop.f32.mrf.mxu0 }
 0x5e5   :  { %6590 = vrcp.f32 %v5362_v50  ;;  %v5005_v48 = vadd.f32 %v9330_v56, %v5004_v45 }
 0x5e6   :  { %v6579_v42 = vpop.eup %6578  ;;  %6592 = vpow2.f32 %v6105_v25  ;;  %v5006_v49 = vpop.f32.mrf.mxu0 }
 0x5e7   :  { %v6581_v53 = vpop.eup %6580  ;;  %v5363_v41 = vadd.f32 1.0, %v6579_v42  ;;  %v6106_v12 = vmul.f32 -1.442695, %v5005_v48 }
 0x5e8   :  { %5567 = vxpose.xlu1.b32.cont [5/16] (narrow) %v6581_v53, 8  ;;  %v5007_v28 = vpop.f32.mrf.mxu0 }
 0x5e9   :  { %6594 = vrcp.f32 %v5363_v41  ;;  %v5008_v16 = vadd.f32 %v9330_v56, %v5007_v28 }
 0x5ea   :  { %v6583_v30 = vpop.eup %6582  ;;  %6596 = vpow2.f32 %v6106_v12  ;;  %v5009_v35 = vpop.f32.mrf.mxu0 }
 0x5eb   :  { %v6585_v18 = vpop.eup %6584  ;;  %v6107_v21 = vmul.f32 -1.442695, %v5008_v16 }
 0x5ec   :  { %v5364_v9 = vadd.f32 1.0, %v6585_v18  ;;  %5568 = vxpose.xlu1.b32.cont [6/16] (narrow) %v6583_v30, 8  ;;  %v5012_v2 = vpop.f32.mrf.mxu0 }
 0x5ed   :  { %6598 = vpow2.f32 %v6107_v21  ;;  %v5013_v13 = vadd.f32 %v9330_v56, %v5012_v2 }
 0x5ee   :  { %v6587_v62 = vpop.eup %6586  ;;  %6600 = vrcp.f32 %v5364_v9  ;;  %v5014_v59 = vpop.f32.mrf.mxu0 }
 0x5ef   :  { %v6589_v5 = vpop.eup %6588  ;;  %v5365_v60 = vadd.f32 1.0, %v6587_v62  ;;  %v6108_v15 = vmul.f32 -1.442695, %v5013_v13 }
 0x5f0   :  { %5569 = vxpose.xlu1.b32.cont [7/16] (narrow) %v6589_v5, 8  ;;  %v5015_v11 = vpop.f32.mrf.mxu0 }
 0x5f1   :  { %6602 = vrcp.f32 %v5365_v60  ;;  %v5016_v55 = vadd.f32 %v9330_v56, %v5015_v11 }
 0x5f2   :  { %v6591_v54 = vpop.eup %6590  ;;  %6604 = vpow2.f32 %v6108_v15  ;;  %v5017_v51 = vpop.f32.mrf.mxu0 }
 0x5f3   :  { %v6593_v52 = vpop.eup %6592  ;;  %v6109_v27 = vmul.f32 -1.442695, %v5016_v55 }
 0x5f4   :  { %v5366_v36 = vadd.f32 1.0, %v6593_v52  ;;  %5570 = vxpose.xlu1.b32.cont [8/16] (narrow) %v6591_v54, 8  ;;  %v5020_v63 = vpop.f32.mrf.mxu0 }
 0x5f5   :  { %6606 = vpow2.f32 %v6109_v27  ;;  %v5021_v6 = vadd.f32 %v9330_v56, %v5020_v63 }
 0x5f6   :  { %v6595_v1 = vpop.eup %6594  ;;  %6608 = vrcp.f32 %v5366_v36  ;;  %v5022_v7 = vpop.f32.mrf.mxu0 }
 0x5f7   :  { %v6597_v0 = vpop.eup %6596  ;;  %v6110_v34 = vmul.f32 -1.442695, %v5021_v6 }
 0x5f8   :  { %v5367_v38 = vadd.f32 1.0, %v6597_v0  ;;  %5571 = vxpose.xlu1.b32.cont [9/16] (narrow) %v6595_v1, 8  ;;  %v5023_v4 = vpop.f32.mrf.mxu0 }
 0x5f9   :  { %6610 = vpow2.f32 %v6110_v34  ;;  %v5024_v29 = vadd.f32 %v9330_v56, %v5023_v4 }
 0x5fa   :  { %v6599_v17 = vpop.eup %6598  ;;  %6612 = vrcp.f32 %v5367_v38  ;;  %v5025_v33 = vpop.f32.mrf.mxu0 }
 0x5fb   :  { %v6601_v10 = vpop.eup %6600  ;;  %v5368_v43 = vadd.f32 1.0, %v6599_v17  ;;  %v6111_v32 = vmul.f32 -1.442695, %v5024_v29 }
 0x5fc   :  { %5572 = vxpose.xlu1.b32.cont [10/16] (narrow) %v6601_v10, 8  ;;  %v5028_v24 = vpop.f32.mrf.mxu0 }
 0x5fd   :  { %6614 = vrcp.f32 %v5368_v43  ;;  %v5029_v57 = vadd.f32 %v9330_v56, %v5028_v24 }
 0x5fe   :  { %v6603_v3 = vpop.eup %6602  ;;  %6616 = vpow2.f32 %v6111_v32  ;;  %v5030_v23 = vpop.f32.mrf.mxu0 }
 0x5ff   :  { %v6605_v20 = vpop.eup %6604  ;;  %v6112_v46 = vmul.f32 -1.442695, %v5029_v57 }
 0x600   :  { %v5369_v14 = vadd.f32 1.0, %v6605_v20  ;;  %5573 = vxpose.xlu1.b32.cont [11/16] (narrow) %v6603_v3, 8  ;;  %v5031_v40 = vpop.f32.mrf.mxu0 }
 0x601   :  { %6618 = vpow2.f32 %v6112_v46  ;;  %v5032_v8 = vadd.f32 %v9330_v56, %v5031_v40 }
 0x602   :  { %v6607_v39 = vpop.eup %6606  ;;  %6620 = vrcp.f32 %v5369_v14  ;;  %v5033_v22 = vpop.f32.mrf.mxu0 }
 0x603   :  { %v6609_v61 = vpop.eup %6608  ;;  %v5370_v37 = vadd.f32 1.0, %v6607_v39  ;;  %v6113_v26 = vmul.f32 -1.442695, %v5032_v8  ;;  %v9402_v8 = vld [vmem:[#allocation2] ss:$0 sm:$0xff] }
 0x604   :  { %5574 = vxpose.xlu1.b32.cont [12/16] (narrow) %v6609_v61, 8  ;;  %v5036_v19 = vpop.f32.mrf.mxu0 }
 0x605   :  { %6622 = vrcp.f32 %v5370_v37  ;;  %v5037_v58 = vadd.f32 %v9330_v56, %v5036_v19 }
 0x606   :  { %v6611_v31 = vpop.eup %6610  ;;  %6624 = vpow2.f32 %v6113_v26  ;;  %v5038_v44 = vpop.f32.mrf.mxu0 }
 0x607   :  { %v6613_v47 = vpop.eup %6612  ;;  %v5371_v50 = vadd.f32 1.0, %v6611_v31  ;;  %v6114_v25 = vmul.f32 -1.442695, %v5037_v58 }
 0x608   :  { %5575 = vxpose.xlu1.b32.cont [13/16] (narrow) %v6613_v47, 8  ;;  %v5039_v45 = vpop.f32.mrf.mxu0 }
 0x609   :  { %6626 = vrcp.f32 %v5371_v50  ;;  %v5040_v48 = vadd.f32 %v9330_v56, %v5039_v45 }
 0x60a   :  { %v6615_v42 = vpop.eup %6614  ;;  %6628 = vpow2.f32 %v6114_v25  ;;  %v5041_v49 = vpop.f32.mrf.mxu0 }
 0x60b   :  { %v6617_v53 = vpop.eup %6616  ;;  %v6115_v41 = vmul.f32 -1.442695, %v5040_v48 }
 0x60c   :  { %v5372_v12 = vadd.f32 1.0, %v6617_v53  ;;  %5576 = vxpose.xlu1.b32.cont [14/16] (narrow) %v6615_v42, 8  ;;  %v5044_v28 = vpop.f32.mrf.mxu0 }
 0x60d   :  { %6630 = vpow2.f32 %v6115_v41  ;;  %v5045_v16 = vadd.f32 %v9330_v56, %v5044_v28 }
 0x60e   :  { %v6619_v30 = vpop.eup %6618  ;;  %6632 = vrcp.f32 %v5372_v12  ;;  %v5046_v35 = vpop.f32.mrf.mxu0 }
 0x60f   :  { %v6621_v18 = vpop.eup %6620  ;;  %v5373_v21 = vadd.f32 1.0, %v6619_v30  ;;  %v6116_v9 = vmul.f32 -1.442695, %v5045_v16 }
 0x610   :  { %5577 = vxpose.xlu1.b32.cont [15/16] (narrow) %v6621_v18, 8  ;;  %v5047_v2 = vpop.f32.mrf.mxu0 }
 0x611   :  { %6634 = vrcp.f32 %v5373_v21  ;;  %v5048_v13 = vadd.f32 %v9330_v56, %v5047_v2 }
 0x612   :  { %v6623_v62 = vpop.eup %6622  ;;  %6636 = vpow2.f32 %v6116_v9  ;;  %v5049_v59 = vpop.f32.mrf.mxu0 }
 0x613   :  { %v6625_v5 = vpop.eup %6624  ;;  %v6117_v60 = vmul.f32 -1.442695, %v5048_v13 }
 0x614   :  { %v5374_v15 = vadd.f32 1.0, %v6625_v5  ;;  %5578 = vxpose.xlu1.b32.end [16/16] (narrow) %v6623_v62, 8  ;;  %v5052_v11 = vpop.f32.mrf.mxu0 }
 0x615   :  { %6638 = vpow2.f32 %v6117_v60  ;;  %v5053_v55 = vadd.f32 %v9330_v56, %v5052_v11 }
 0x616   :  { %v6627_v54 = vpop.eup %6626  ;;  %6640 = vrcp.f32 %v5374_v15  ;;  %v5054_v51 = vpop.f32.mrf.mxu0 }
 0x617   :  { %v6629_v52 = vpop.eup %6628  ;;  %v6118_v27 = vmul.f32 -1.442695, %v5053_v55  ;;  %5595 = vxpose.xlu0.b32.start [1/16] (narrow) %v6627_v54, 8 }
 0x618   :  { %v5375_v36 = vadd.f32 1.0, %v6629_v52  ;;  %v5055_v63 = vpop.f32.mrf.mxu0 }
 0x619   :  { %6642 = vpow2.f32 %v6118_v27  ;;  %v5056_v6 = vadd.f32 %v9330_v56, %v5055_v63 }
 0x61a   :  { %v6631_v1 = vpop.eup %6630  ;;  %6644 = vrcp.f32 %v5375_v36  ;;  %v5057_v7 = vpop.f32.mrf.mxu0 }
 0x61b   :  { %v6633_v0 = vpop.eup %6632  ;;  %v5376_v34 = vadd.f32 1.0, %v6631_v1  ;;  %v6119_v38 = vmul.f32 -1.442695, %v5056_v6 }
 0x61c   :  { %5596 = vxpose.xlu0.b32.cont [2/16] (narrow) %v6633_v0, 8  ;;  %v5060_v4 = vpop.f32.mrf.mxu0 }
 0x61d   :  { %6646 = vrcp.f32 %v5376_v34  ;;  %v5061_v29 = vadd.f32 %v9330_v56, %v5060_v4 }
 0x61e   :  { %v6635_v17 = vpop.eup %6634  ;;  %6648 = vpow2.f32 %v6119_v38  ;;  %v5062_v33 = vpop.f32.mrf.mxu0 }
 0x61f   :  { %v6637_v10 = vpop.eup %6636  ;;  %v6120_v43 = vmul.f32 -1.442695, %v5061_v29 }
 0x620   :  { %v5377_v32 = vadd.f32 1.0, %v6637_v10  ;;  %5597 = vxpose.xlu0.b32.cont [3/16] (narrow) %v6635_v17, 8  ;;  %v5063_v24 = vpop.f32.mrf.mxu0 }
 0x621   :  { %6650 = vpow2.f32 %v6120_v43  ;;  %v5064_v57 = vadd.f32 %v9330_v56, %v5063_v24 }
 0x622   :  { %v6639_v3 = vpop.eup %6638  ;;  %6652 = vrcp.f32 %v5377_v32  ;;  %v5065_v23 = vpop.f32.mrf.mxu0 }
 0x623   :  { %v6641_v20 = vpop.eup %6640  ;;  %v5378_v46 = vadd.f32 1.0, %v6639_v3  ;;  %v6121_v14 = vmul.f32 -1.442695, %v5064_v57 }
 0x624   :  { %5598 = vxpose.xlu0.b32.cont [4/16] (narrow) %v6641_v20, 8  ;;  %v5068_v40 = vpop.f32.mrf.mxu0 }
 0x625   :  { %6654 = vrcp.f32 %v5378_v46  ;;  %v5069_v39 = vadd.f32 %v9402_v8, %v5068_v40 }
 0x626   :  { %v6643_v22 = vpop.eup %6642  ;;  %6656 = vpow2.f32 %v6121_v14  ;;  %v5070_v61 = vpop.f32.mrf.mxu0 }
 0x627   :  { %v6645_v37 = vpop.eup %6644  ;;  %v5379_v26 = vadd.f32 1.0, %v6643_v22  ;;  %v6122_v19 = vmul.f32 -1.442695, %v5069_v39 }
 0x628   :  { %5599 = vxpose.xlu0.b32.cont [5/16] (narrow) %v6645_v37, 8  ;;  %v5071_v56 = vpop.f32.mrf.mxu0 }
 0x629   :  { %6658 = vrcp.f32 %v5379_v26  ;;  %v5072_v58 = vadd.f32 %v9402_v8, %v5071_v56 }
 0x62a   :  { %v6647_v31 = vpop.eup %6646  ;;  %6660 = vpow2.f32 %v6122_v19  ;;  %v5073_v44 = vpop.f32.mrf.mxu0 }
 0x62b   :  { %v6649_v47 = vpop.eup %6648  ;;  %v6123_v50 = vmul.f32 -1.442695, %v5072_v58 }
 0x62c   :  { %v5380_v25 = vadd.f32 1.0, %v6649_v47  ;;  %5600 = vxpose.xlu0.b32.cont [6/16] (narrow) %v6647_v31, 8  ;;  %v5076_v45 = vpop.f32.mrf.mxu0 }
 0x62d   :  { %6662 = vpow2.f32 %v6123_v50  ;;  %v5077_v48 = vadd.f32 %v9402_v8, %v5076_v45 }
 0x62e   :  { %v6651_v42 = vpop.eup %6650  ;;  %6664 = vrcp.f32 %v5380_v25  ;;  %v5078_v49 = vpop.f32.mrf.mxu0 }
 0x62f   :  { %v6653_v53 = vpop.eup %6652  ;;  %v5381_v41 = vadd.f32 1.0, %v6651_v42  ;;  %v6124_v12 = vmul.f32 -1.442695, %v5077_v48 }
 0x630   :  { %5601 = vxpose.xlu0.b32.cont [7/16] (narrow) %v6653_v53, 8  ;;  %v5079_v28 = vpop.f32.mrf.mxu0 }
 0x631   :  { %6666 = vrcp.f32 %v5381_v41  ;;  %v5080_v16 = vadd.f32 %v9402_v8, %v5079_v28 }
 0x632   :  { %v6655_v30 = vpop.eup %6654  ;;  %6668 = vpow2.f32 %v6124_v12  ;;  %v5081_v35 = vpop.f32.mrf.mxu0 }
 0x633   :  { %v6657_v18 = vpop.eup %6656  ;;  %v6125_v21 = vmul.f32 -1.442695, %v5080_v16 }
 0x634   :  { %v5382_v9 = vadd.f32 1.0, %v6657_v18  ;;  %5602 = vxpose.xlu0.b32.cont [8/16] (narrow) %v6655_v30, 8  ;;  %v5084_v2 = vpop.f32.mrf.mxu0 }
 0x635   :  { %6670 = vpow2.f32 %v6125_v21  ;;  %v5085_v13 = vadd.f32 %v9402_v8, %v5084_v2 }
 0x636   :  { %v6659_v62 = vpop.eup %6658  ;;  %6672 = vrcp.f32 %v5382_v9  ;;  %v5086_v59 = vpop.f32.mrf.mxu0 }
 0x637   :  { %v6661_v5 = vpop.eup %6660  ;;  %v6126_v60 = vmul.f32 -1.442695, %v5085_v13 }
 0x638   :  { %v5383_v15 = vadd.f32 1.0, %v6661_v5  ;;  %5603 = vxpose.xlu0.b32.cont [9/16] (narrow) %v6659_v62, 8  ;;  %v5087_v11 = vpop.f32.mrf.mxu0 }
 0x639   :  { %6674 = vpow2.f32 %v6126_v60  ;;  %v5088_v55 = vadd.f32 %v9402_v8, %v5087_v11 }
 0x63a   :  { %v6663_v54 = vpop.eup %6662  ;;  %6676 = vrcp.f32 %v5383_v15  ;;  %v5089_v51 = vpop.f32.mrf.mxu0 }
 0x63b   :  { %v6665_v52 = vpop.eup %6664  ;;  %v5384_v27 = vadd.f32 1.0, %v6663_v54  ;;  %v6127_v36 = vmul.f32 -1.442695, %v5088_v55 }
 0x63c   :  { %5604 = vxpose.xlu0.b32.cont [10/16] (narrow) %v6665_v52, 8  ;;  %v5092_v63 = vpop.f32.mrf.mxu0 }
 0x63d   :  { %6678 = vrcp.f32 %v5384_v27  ;;  %v5093_v6 = vadd.f32 %v9402_v8, %v5092_v63 }
 0x63e   :  { %v6667_v1 = vpop.eup %6666  ;;  %6680 = vpow2.f32 %v6127_v36  ;;  %v5094_v7 = vpop.f32.mrf.mxu0 }
 0x63f   :  { %v6669_v0 = vpop.eup %6668  ;;  %v6128_v34 = vmul.f32 -1.442695, %v5093_v6 }
 0x640   :  { %v5385_v38 = vadd.f32 1.0, %v6669_v0  ;;  %5605 = vxpose.xlu0.b32.cont [11/16] (narrow) %v6667_v1, 8  ;;  %v5095_v4 = vpop.f32.mrf.mxu0 }
 0x641   :  { %6682 = vpow2.f32 %v6128_v34  ;;  %v5096_v29 = vadd.f32 %v9402_v8, %v5095_v4 }
 0x642   :  { %v6671_v17 = vpop.eup %6670  ;;  %6684 = vrcp.f32 %v5385_v38  ;;  %v5097_v33 = vpop.f32.mrf.mxu0 }
 0x643   :  { %v6673_v10 = vpop.eup %6672  ;;  %v5386_v43 = vadd.f32 1.0, %v6671_v17  ;;  %v6129_v32 = vmul.f32 -1.442695, %v5096_v29 }
 0x644   :  { %5606 = vxpose.xlu0.b32.cont [12/16] (narrow) %v6673_v10, 8  ;;  %v5100_v24 = vpop.f32.mrf.mxu0 }
 0x645   :  { %6686 = vrcp.f32 %v5386_v43  ;;  %v5101_v57 = vadd.f32 %v9402_v8, %v5100_v24 }
 0x646   :  { %v6675_v3 = vpop.eup %6674  ;;  %6688 = vpow2.f32 %v6129_v32  ;;  %v5102_v23 = vpop.f32.mrf.mxu0 }
 0x647   :  { %v6677_v20 = vpop.eup %6676  ;;  %v5387_v46 = vadd.f32 1.0, %v6675_v3  ;;  %v6130_v14 = vmul.f32 -1.442695, %v5101_v57 }
 0x648   :  { %5607 = vxpose.xlu0.b32.cont [13/16] (narrow) %v6677_v20, 8  ;;  %v5103_v40 = vpop.f32.mrf.mxu0 }
 0x649   :  { %6690 = vrcp.f32 %v5387_v46  ;;  %v5104_v39 = vadd.f32 %v9402_v8, %v5103_v40 }
 0x64a   :  { %v6679_v22 = vpop.eup %6678  ;;  %6692 = vpow2.f32 %v6130_v14  ;;  %v5105_v61 = vpop.f32.mrf.mxu0 }
 0x64b   :  { %v6681_v37 = vpop.eup %6680  ;;  %v6131_v26 = vmul.f32 -1.442695, %v5104_v39 }
 0x64c   :  { %v5388_v19 = vadd.f32 1.0, %v6681_v37  ;;  %5608 = vxpose.xlu0.b32.cont [14/16] (narrow) %v6679_v22, 8  ;;  %v5108_v56 = vpop.f32.mrf.mxu0 }
 0x64d   :  { %6694 = vpow2.f32 %v6131_v26  ;;  %v5109_v58 = vadd.f32 %v9402_v8, %v5108_v56 }
 0x64e   :  { %v6683_v31 = vpop.eup %6682  ;;  %6696 = vrcp.f32 %v5388_v19  ;;  %v5110_v44 = vpop.f32.mrf.mxu0 }
 0x64f   :  { %v6685_v47 = vpop.eup %6684  ;;  %v5389_v50 = vadd.f32 1.0, %v6683_v31  ;;  %v6132_v25 = vmul.f32 -1.442695, %v5109_v58 }
 0x650   :  { %5609 = vxpose.xlu0.b32.cont [15/16] (narrow) %v6685_v47, 8  ;;  %v5111_v45 = vpop.f32.mrf.mxu0 }
 0x651   :  { %6698 = vrcp.f32 %v5389_v50  ;;  %v5112_v48 = vadd.f32 %v9402_v8, %v5111_v45 }
 0x652   :  { %v6687_v42 = vpop.eup %6686  ;;  %6700 = vpow2.f32 %v6132_v25  ;;  %v5113_v49 = vpop.f32.mrf.mxu0 }
 0x653   :  { %v6689_v53 = vpop.eup %6688  ;;  %v6133_v41 = vmul.f32 -1.442695, %v5112_v48 }
 0x654   :  { %v5390_v12 = vadd.f32 1.0, %v6689_v53  ;;  %5610 = vxpose.xlu0.b32.end [16/16] (narrow) %v6687_v42, 8  ;;  %v5116_v28 = vpop.f32.mrf.mxu0 }
 0x655   :  { %6702 = vpow2.f32 %v6133_v41  ;;  %v5117_v16 = vadd.f32 %v9402_v8, %v5116_v28 }
 0x656   :  { %v6691_v30 = vpop.eup %6690  ;;  %6704 = vrcp.f32 %v5390_v12  ;;  %v5118_v35 = vpop.f32.mrf.mxu0 }
 0x657   :  { %v6693_v18 = vpop.eup %6692  ;;  %v6134_v21 = vmul.f32 -1.442695, %v5117_v16  ;;  %5627 = vxpose.xlu1.b32.start [1/16] (narrow) %v6691_v30, 8 }
 0x658   :  { %v5391_v9 = vadd.f32 1.0, %v6693_v18  ;;  %v5119_v2 = vpop.f32.mrf.mxu0 }
 0x659   :  { %6706 = vpow2.f32 %v6134_v21  ;;  %v5120_v13 = vadd.f32 %v9402_v8, %v5119_v2 }
 0x65a   :  { %v6695_v62 = vpop.eup %6694  ;;  %6708 = vrcp.f32 %v5391_v9  ;;  %v5121_v59 = vpop.f32.mrf.mxu0 }
 0x65b   :  { %v6697_v5 = vpop.eup %6696  ;;  %v5392_v60 = vadd.f32 1.0, %v6695_v62  ;;  %v6135_v15 = vmul.f32 -1.442695, %v5120_v13  ;;  %v6749_v13 = vmov 1966171168   ;;  %v5547_v59 = vpop.trf.xlu0 }
 0x65c   :  { %5628 = vxpose.xlu1.b32.cont [2/16] (narrow) %v6697_v5, 8  ;;  %v5124_v11 = vpop.f32.mrf.mxu0  ;;  %v5666_v62 = vunpack.c.l.s4 %v6749_v13  ;;  %v5579_v5 = vpop.trf.xlu1 }
 0x65d   :  { %6710 = vrcp.f32 %v5392_v60  ;;  %v5125_v55 = vadd.f32 %v9402_v8, %v5124_v11  ;;  %v9564_v11 = vld [vmem:[#allocation42_spill] sm:$0xff] }
 0x65e   :  { %v6699_v54 = vpop.eup %6698  ;;  %6712 = vpow2.f32 %v6135_v15  ;;  %v5126_v51 = vpop.f32.mrf.mxu0  ;;  %v5667_v60 = vunpack.c.0.s8 %v5666_v62 }
 0x65f   :  { %v6701_v52 = vpop.eup %6700  ;;  %v6136_v27 = vmul.f32 -1.442695, %v5125_v55 }
 0x660   :  { %v5393_v36 = vadd.f32 1.0, %v6701_v52  ;;  %5629 = vxpose.xlu1.b32.cont [3/16] (narrow) %v6699_v54, 8  ;;  %v5127_v63 = vpop.f32.mrf.mxu0  ;;  %v5670_v55 = vsub.s32 %v5667_v60, %v9564_v11  ;;  %v5663_v54 = vcombine.low %v5547_v59, %v5579_v5 }
 0x661   :  { %6714 = vpow2.f32 %v6136_v27  ;;  %v5128_v6 = vadd.f32 %v9402_v8, %v5127_v63 }
 0x662   :  { %v6703_v1 = vpop.eup %6702  ;;  %6716 = vrcp.f32 %v5393_v36  ;;  %v5129_v7 = vpop.f32.mrf.mxu0  ;;  %v5671_v27 = vrot.slane %v5663_v54, %v5670_v55 }
 0x663   :  { %v6705_v0 = vpop.eup %6704  ;;  %v5394_v34 = vadd.f32 1.0, %v6703_v1  ;;  %v6137_v38 = vmul.f32 -1.442695, %v5128_v6  ;;  %v9565_v6 = vlaneseq }
 0x664   :  { %5630 = vxpose.xlu1.b32.cont [4/16] (narrow) %v6705_v0, 8  ;;  %v5132_v4 = vpop.f32.mrf.mxu0 }
 0x665   :  { %6718 = vrcp.f32 %v5394_v34  ;;  %v5133_v29 = vadd.f32 %v9402_v8, %v5132_v4  ;;  %vm5690_vm1 = vcmp.lt.s32.totalorder %v9565_v6, 512 }
 0x666   :  { %v6707_v17 = vpop.eup %6706  ;;  %6720 = vpow2.f32 %v6137_v38  ;;  %v5134_v33 = vpop.f32.mrf.mxu0 }
 0x667   :  { %v6709_v10 = vpop.eup %6708  ;;  %v5395_v43 = vadd.f32 1.0, %v6707_v17  ;;  %v6138_v32 = vmul.f32 -1.442695, %v5133_v29 }
 0x668   :  { %5631 = vxpose.xlu1.b32.cont [5/16] (narrow) %v6709_v10, 8  ;;  %v5135_v24 = vpop.f32.mrf.mxu0 }
 0x669   :  { %6722 = vrcp.f32 %v5395_v43  ;;  %v5136_v57 = vadd.f32 %v9402_v8, %v5135_v24 }
 0x66a   :  { %v6711_v3 = vpop.eup %6710  ;;  %6724 = vpow2.f32 %v6138_v32  ;;  %v5137_v23 = vpop.f32.mrf.mxu0 }
 0x66b   :  { %v6713_v20 = vpop.eup %6712  ;;  %v6139_v46 = vmul.f32 -1.442695, %v5136_v57 }
 0x66c   :  { %v5396_v14 = vadd.f32 1.0, %v6713_v20  ;;  %5632 = vxpose.xlu1.b32.cont [6/16] (narrow) %v6711_v3, 8  ;;  %v5140_v40 = vpop.f32.mrf.mxu0 }
 0x66d   :  { %6726 = vpow2.f32 %v6139_v46  ;;  %v5141_v39 = vadd.f32 %v9402_v8, %v5140_v40 }
 0x66e   :  { %v6715_v22 = vpop.eup %6714  ;;  %6728 = vrcp.f32 %v5396_v14  ;;  %v5142_v61 = vpop.f32.mrf.mxu0 }
 0x66f   :  { %v6717_v37 = vpop.eup %6716  ;;  %v5397_v26 = vadd.f32 1.0, %v6715_v22  ;;  %v6140_v19 = vmul.f32 -1.442695, %v5141_v39 }
 0x670   :  { %5633 = vxpose.xlu1.b32.cont [7/16] (narrow) %v6717_v37, 8  ;;  %v5143_v56 = vpop.f32.mrf.mxu0 }
 0x671   :  { %6730 = vrcp.f32 %v5397_v26  ;;  %v5144_v58 = vadd.f32 %v9402_v8, %v5143_v56 }
 0x672   :  { %v6719_v31 = vpop.eup %6718  ;;  %6732 = vpow2.f32 %v6140_v19  ;;  %v5145_v44 = vpop.f32.mrf.mxu0 }
 0x673   :  { %v6721_v47 = vpop.eup %6720  ;;  %v6141_v50 = vmul.f32 -1.442695, %v5144_v58 }
 0x674   :  { %v5398_v25 = vadd.f32 1.0, %v6721_v47  ;;  %5634 = vxpose.xlu1.b32.cont [8/16] (narrow) %v6719_v31, 8 }
 0x675   :  { %6734 = vpow2.f32 %v6141_v50 }
 0x676   :  { %v6723_v45 = vpop.eup %6722  ;;  %6736 = vrcp.f32 %v5398_v25 }
 0x677   :  { %v6725_v48 = vpop.eup %6724 }
 0x678   :  { %v5399_v42 = vadd.f32 1.0, %v6725_v48  ;;  %5635 = vxpose.xlu1.b32.cont [9/16] (narrow) %v6723_v45, 8 }
 0x67a   :  { %v6727_v49 = vpop.eup %6726  ;;  %6738 = vrcp.f32 %v5399_v42 }
 0x67b   :  { %v6729_v53 = vpop.eup %6728  ;;  %v5400_v41 = vadd.f32 1.0, %v6727_v49 }
 0x67c   :  { %5636 = vxpose.xlu1.b32.cont [10/16] (narrow) %v6729_v53, 8 }
 0x67d   :  { %6740 = vrcp.f32 %v5400_v41 }
 0x67e   :  { %v6731_v8 = vpop.eup %6730 }
 0x67f   :  { %v6733_v12 = vpop.eup %6732 }
 0x680   :  { %v5401_v28 = vadd.f32 1.0, %v6733_v12  ;;  %5637 = vxpose.xlu1.b32.cont [11/16] (narrow) %v6731_v8, 8 }
 0x682   :  { %v6735_v16 = vpop.eup %6734  ;;  %6742 = vrcp.f32 %v5401_v28 }
 0x683   :  { %v6737_v30 = vpop.eup %6736  ;;  %v5402_v35 = vadd.f32 1.0, %v6735_v16 }
 0x684   :  { %5638 = vxpose.xlu1.b32.cont [12/16] (narrow) %v6737_v30, 8 }
 0x685   :  { %6744 = vrcp.f32 %v5402_v35 }
 0x687   :  { %v6739_v18 = vpop.eup %6738 }
 0x688   :  { %5639 = vxpose.xlu1.b32.cont [13/16] (narrow) %v6739_v18, 8 }
 0x68a   :  { %v6741_v21 = vpop.eup %6740 }
 0x68c   :  { %5640 = vxpose.xlu1.b32.cont [14/16] (narrow) %v6741_v21, 8 }
 0x68f   :  { %v6743_v9 = vpop.eup %6742 }
 0x690   :  { %5641 = vxpose.xlu1.b32.cont [15/16] (narrow) %v6743_v9, 8 }
 0x692   :  { %v6745_v2 = vpop.eup %6744 }
 0x694   :  { %5642 = vxpose.xlu1.b32.end [16/16] (narrow) %v6745_v2, 8  ;;  %v5611_v15 = vpop.trf.xlu0 }
 0x6d4   :  { %v5643_v51 = vpop.trf.xlu1 }
 0x6d5   :  { %v5664_v52 = vcombine.low %v5611_v15, %v5643_v51 }
 0x6d7   :  { %v5678_v36 = vrot.slane %v5664_v52, %v5670_v55 }
 0x6d9   :  { %v5679_v63 = vcombine.low %v5671_v27, %v5678_v36 }
 0x6db   :  { %v5686_v1 = vrot.slane %v5679_v63, %v5670_v55 }
 0x6dd   :  { %5692 = vst.msk [vmem:[%s9438_s9] sm:$0xf] %vm5690_vm1, %v5686_v1 }

</bundles_post_ra>
